<compile_context>
chip_gen: v7x
topology: tpu7x:2x2x1
jax: 0.10.0
libtpu: 0.0.40
codegen_flags: <defaults>
</compile_context>

<pallas_src>
import math
from functools import partial

import jax
import jax.numpy as jnp
from jax import lax
from jax.experimental import pallas as pl
from jax.experimental.pallas import tpu as pltpu

EPS = 1e-6          # LayerNormalization eps
NEG_INF = -1e9      # masked_fill value (matches the tutorial)


# --------------------------------------------------------------------------
# In-kernel helpers
# --------------------------------------------------------------------------
def _ln(x, alpha, bias):
    """Tutorial LayerNormalization: alpha*(x-mean)/(std+eps)+bias, unbiased std."""
    d = x.shape[-1]
    mean = jnp.mean(x, axis=-1, keepdims=True)
    var = jnp.sum((x - mean) ** 2, axis=-1, keepdims=True) * (1.0 / (d - 1))
    inv = pl.reciprocal(jnp.sqrt(var) + EPS)   # multiply instead of divide
    return alpha * ((x - mean) * inv) + bias


def _mha(q_bf16, k_sc, v_sc, ctx_sc, valid, h):
    """Multi-head attention core.  q: (tq, D) bf16; k/v scratch: (Sk, D) bf16;
    ctx scratch: (tq, D) f32 accumulator; valid: (tq, Sk) bool key mask."""
    D = q_bf16.shape[-1]
    Dh = D // h
    kb = k_sc[...]
    vb = v_sc[...]
    # TODO(synk): on v6e/v7x a head-batched 3-D dot_general over a (h, tq, Dh)
    # relayout would feed the 256-wide MXU better than per-head Dh slices.
    for hd in range(h):
        sl = slice(hd * Dh, (hd + 1) * Dh)
        s = jnp.einsum("qd,kd->qk", q_bf16[:, sl], kb[:, sl],
                       preferred_element_type=jnp.float32)
        s = jnp.where(valid, s, NEG_INF)
        m = jnp.max(s, axis=-1, keepdims=True)
        e = jnp.exp(s - m)
        p = e * pl.reciprocal(jnp.sum(e, axis=-1, keepdims=True), approx=True)
        ctx_sc[:, sl] = jnp.dot(p.astype(jnp.bfloat16), vb[:, sl],
                                preferred_element_type=jnp.float32)
    return ctx_sc[...]


# --------------------------------------------------------------------------
# Tiling / sizing helpers
# --------------------------------------------------------------------------
def _row_tile(m, cap=1024):
    t = cap
    while t >= 8:
        if m % t == 0:
            return t
        t //= 2
    return m


def _q_tile(s, cap=256):
    return s if s <= cap else _row_tile(s, cap)


def _v_tile(v, cap=2048):
    if v <= cap:
        return v
    t = cap
    while t >= 128:
        if v % t == 0:
            return t
        t //= 2
    return v


def _nbytes(shape, dtype):
    n = 1
    for s in shape:
        n *= int(s)
    return n * jnp.dtype(dtype).itemsize


def _vmem_limit(block_bytes, scratch_bytes=0):
    # double-buffered pipeline blocks + persistent scratch + headroom
    need = 2 * block_bytes + scratch_bytes + (4 << 20)
    return int(min(max(need, 16 << 20), 64 << 20))


# --------------------------------------------------------------------------
# Fused SELF-attention sublayer kernel
#   norm(x) -> Q/K/V -> masked multi-head attention -> Wo -> + x (residual)
# Grid: (batch, query-row tile).  K/V + norm(x) computed once per batch
# element into scratch (qt axis is "arbitrary").
# --------------------------------------------------------------------------
def _self_attn_kernel(len_ref, x_ref, a_ref, g_ref,
                      wq_ref, bq_ref, wk_ref, bk_ref, wv_ref, bv_ref,
                      wo_ref, bo_ref, o_ref, xn_sc, k_sc, v_sc, ctx_sc,
                      *, h, causal, tq):
    b = pl.program_id(0)
    qt = pl.program_id(1)
    S = x_ref.shape[1]
    kv_len = len_ref[b]
    alpha = a_ref[...]
    beta = g_ref[...]

    @pl.when(qt == 0)
    def _():
        xs = x_ref[0].astype(jnp.float32)                       # (S, D)
        xn = _ln(xs, alpha, beta).astype(jnp.bfloat16)
        xn_sc[...] = xn
        k_sc[...] = (jnp.dot(xn, wk_ref[...],
                             preferred_element_type=jnp.float32)
                     + bk_ref[...]).astype(jnp.bfloat16)
        v_sc[...] = (jnp.dot(xn, wv_ref[...],
                             preferred_element_type=jnp.float32)
                     + bv_ref[...]).astype(jnp.bfloat16)

    xq = x_ref[0, pl.ds(qt * tq, tq), :].astype(jnp.float32)    # residual rows
    xqn = xn_sc[pl.ds(qt * tq, tq), :]                          # reuse norm(x)
    # 1/sqrt(Dh) is folded into wq / bq at init time.
    q = (jnp.dot(xqn, wq_ref[...], preferred_element_type=jnp.float32)
         + bq_ref[...]).astype(jnp.bfloat16)

    # Padding (+ causal) mask rebuilt in-kernel from the per-batch length.
    key_idx = lax.broadcasted_iota(jnp.int32, (tq, S), 1)
    valid = key_idx < kv_len
    if causal:
        row_idx = qt * tq + lax.broadcasted_iota(jnp.int32, (tq, S), 0)
        valid = jnp.logical_and(valid, key_idx <= row_idx)

    ctx = _mha(q, k_sc, v_sc, ctx_sc, valid, h)
    y = (jnp.dot(ctx.astype(jnp.bfloat16), wo_ref[...],
                 preferred_element_type=jnp.float32) + bo_ref[...] + xq)
    o_ref[0] = y.astype(o_ref.dtype)


def self_attention_sublayer(x, kv_len, p, ln_p, *, h, causal):
    B, S, D = x.shape
    tq = _q_tile(S)
    grid = (B, S // tq)
    a = ln_p["alpha"].reshape(1, D)
    g = ln_p["bias"].reshape(1, D)
    const = lambda b, q, l: (0, 0)

    blk = (_nbytes((S, D), jnp.bfloat16) + _nbytes((tq, D), jnp.bfloat16)
           + 4 * _nbytes((D, D), jnp.bfloat16) + 6 * _nbytes((1, D), jnp.float32))
    scr = 3 * _nbytes((S, D), jnp.bfloat16) + _nbytes((tq, D), jnp.float32)

    # TODO(synk): constant-index weight BlockSpecs could use
    # pipeline_mode=pl.Buffered(1) to halve their VMEM footprint.
    return pl.pallas_call(
        partial(_self_attn_kernel, h=h, causal=causal, tq=tq),
        grid_spec=pltpu.PrefetchScalarGridSpec(
            num_scalar_prefetch=1,
            grid=grid,
            in_specs=[
                pl.BlockSpec((1, S, D), lambda b, q, l: (b, 0, 0)),   # x (full seq)
                pl.BlockSpec((1, D), const), pl.BlockSpec((1, D), const),   # LN
                pl.BlockSpec((D, D), const), pl.BlockSpec((1, D), const),   # Wq
                pl.BlockSpec((D, D), const), pl.BlockSpec((1, D), const),   # Wk
                pl.BlockSpec((D, D), const), pl.BlockSpec((1, D), const),   # Wv
                pl.BlockSpec((D, D), const), pl.BlockSpec((1, D), const),   # Wo
            ],
            out_specs=pl.BlockSpec((1, tq, D), lambda b, q, l: (b, q, 0)),
            scratch_shapes=[
                pltpu.VMEM((S, D), jnp.bfloat16),   # norm(x)
                pltpu.VMEM((S, D), jnp.bfloat16),   # K
                pltpu.VMEM((S, D), jnp.bfloat16),   # V
                pltpu.VMEM((tq, D), jnp.float32),   # per-head context accum
            ],
        ),
        out_shape=jax.ShapeDtypeStruct((B, S, D), jnp.bfloat16),
        compiler_params=pltpu.CompilerParams(
            dimension_semantics=("parallel", "arbitrary"),
            vmem_limit_bytes=_vmem_limit(blk, scr)),
    )(kv_len, x.astype(jnp.bfloat16), a, g,
      p["wq"], p["bq"].reshape(1, D), p["wk"], p["bk"].reshape(1, D),
      p["wv"], p["bv"].reshape(1, D), p["wo"], p["bo"].reshape(1, D))


# --------------------------------------------------------------------------
# Fused CROSS-attention sublayer kernel (encoder K/V computed once per batch)
# --------------------------------------------------------------------------
def _cross_attn_kernel(len_ref, x_ref, enc_ref, a_ref, g_ref,
                       wq_ref, bq_ref, wk_ref, bk_ref, wv_ref, bv_ref,
                       wo_ref, bo_ref, o_ref, k_sc, v_sc, ctx_sc, *, h):
    b = pl.program_id(0)
    qt = pl.program_id(1)
    Sk = enc_ref.shape[1]
    tq = x_ref.shape[1]
    kv_len = len_ref[b]

    # Encoder output is already layer-normed (fused into the last encoder FFN)
    # and, per the reference, is NOT re-normed for K/V.
    @pl.when(qt == 0)
    def _():
        e = enc_ref[0].astype(jnp.bfloat16)
        k_sc[...] = (jnp.dot(e, wk_ref[...],
                             preferred_element_type=jnp.float32)
                     + bk_ref[...]).astype(jnp.bfloat16)
        v_sc[...] = (jnp.dot(e, wv_ref[...],
                             preferred_element_type=jnp.float32)
                     + bv_ref[...]).astype(jnp.bfloat16)

    xq = x_ref[0].astype(jnp.float32)                            # (tq, D)
    xqn = _ln(xq, a_ref[...], g_ref[...]).astype(jnp.bfloat16)
    q = (jnp.dot(xqn, wq_ref[...], preferred_element_type=jnp.float32)
         + bq_ref[...]).astype(jnp.bfloat16)

    key_idx = lax.broadcasted_iota(jnp.int32, (tq, Sk), 1)
    valid = key_idx < kv_len                                     # src padding

    ctx = _mha(q, k_sc, v_sc, ctx_sc, valid, h)
    y = (jnp.dot(ctx.astype(jnp.bfloat16), wo_ref[...],
                 preferred_element_type=jnp.float32) + bo_ref[...] + xq)
    o_ref[0] = y.astype(o_ref.dtype)


def cross_attention_sublayer(x, enc, kv_len, p, ln_p, *, h):
    B, Sq, D = x.shape
    Sk = enc.shape[1]
    tq = _q_tile(Sq)
    grid = (B, Sq // tq)
    a = ln_p["alpha"].reshape(1, D)
    g = ln_p["bias"].reshape(1, D)
    const = lambda b, q, l: (0, 0)

    blk = (2 * _nbytes((tq, D), jnp.bfloat16) + _nbytes((Sk, D), jnp.bfloat16)
           + 4 * _nbytes((D, D), jnp.bfloat16) + 6 * _nbytes((1, D), jnp.float32))
    scr = 2 * _nbytes((Sk, D), jnp.bfloat16) + _nbytes((tq, D), jnp.float32)

    return pl.pallas_call(
        partial(_cross_attn_kernel, h=h),
        grid_spec=pltpu.PrefetchScalarGridSpec(
            num_scalar_prefetch=1,
            grid=grid,
            in_specs=[
                pl.BlockSpec((1, tq, D), lambda b, q, l: (b, q, 0)),  # x q-tile
                pl.BlockSpec((1, Sk, D), lambda b, q, l: (b, 0, 0)),  # encoder out
                pl.BlockSpec((1, D), const), pl.BlockSpec((1, D), const),
                pl.BlockSpec((D, D), const), pl.BlockSpec((1, D), const),
                pl.BlockSpec((D, D), const), pl.BlockSpec((1, D), const),
                pl.BlockSpec((D, D), const), pl.BlockSpec((1, D), const),
                pl.BlockSpec((D, D), const), pl.BlockSpec((1, D), const),
            ],
            out_specs=pl.BlockSpec((1, tq, D), lambda b, q, l: (b, q, 0)),
            scratch_shapes=[
                pltpu.VMEM((Sk, D), jnp.bfloat16),   # K
                pltpu.VMEM((Sk, D), jnp.bfloat16),   # V
                pltpu.VMEM((tq, D), jnp.float32),    # per-head context accum
            ],
        ),
        out_shape=jax.ShapeDtypeStruct((B, Sq, D), jnp.bfloat16),
        compiler_params=pltpu.CompilerParams(
            dimension_semantics=("parallel", "arbitrary"),
            vmem_limit_bytes=_vmem_limit(blk, scr)),
    )(kv_len, x.astype(jnp.bfloat16), enc.astype(jnp.bfloat16), a, g,
      p["wq"], p["bq"].reshape(1, D), p["wk"], p["bk"].reshape(1, D),
      p["wv"], p["bv"].reshape(1, D), p["wo"], p["bo"].reshape(1, D))


# --------------------------------------------------------------------------
# Fused feed-forward sublayer: norm(x) -> w1+relu -> w2 -> + x
# (optionally followed by the fused encoder-final LayerNorm)
# --------------------------------------------------------------------------
def _ffn_kernel(*refs, final_norm):
    if final_norm:
        (x_ref, a_ref, g_ref, w1_ref, b1_ref, w2_ref, b2_ref,
         fa_ref, fg_ref, o_ref) = refs
    else:
        (x_ref, a_ref, g_ref, w1_ref, b1_ref, w2_ref, b2_ref, o_ref) = refs
    x = x_ref[...].astype(jnp.float32)
    xn = _ln(x, a_ref[...], g_ref[...]).astype(jnp.bfloat16)
    h1 = jnp.dot(xn, w1_ref[...], preferred_element_type=jnp.float32) + b1_ref[...]
    h1 = jnp.maximum(h1, 0.0).astype(jnp.bfloat16)
    y = jnp.dot(h1, w2_ref[...], preferred_element_type=jnp.float32) + b2_ref[...] + x
    if final_norm:
        y = _ln(y, fa_ref[...], fg_ref[...])
    o_ref[...] = y.astype(o_ref.dtype)


def ffn_sublayer(x, ln_p, ffn_p, *, final_norm=None):
    B, S, D = x.shape
    Dff = ffn_p["w1"].shape[1]
    M = B * S
    tm = _row_tile(M)
    const = lambda i: (0, 0)

    in_specs = [
        pl.BlockSpec((tm, D), lambda i: (i, 0)),
        pl.BlockSpec((1, D), const), pl.BlockSpec((1, D), const),
        pl.BlockSpec((D, Dff), const), pl.BlockSpec((1, Dff), const),
        pl.BlockSpec((Dff, D), const), pl.BlockSpec((1, D), const),
    ]
    args = [x.reshape(M, D).astype(jnp.bfloat16),
            ln_p["alpha"].reshape(1, D), ln_p["bias"].reshape(1, D),
            ffn_p["w1"], ffn_p["b1"].reshape(1, Dff),
            ffn_p["w2"], ffn_p["b2"].reshape(1, D)]
    if final_norm is not None:
        in_specs += [pl.BlockSpec((1, D), const), pl.BlockSpec((1, D), const)]
        args += [final_norm["alpha"].reshape(1, D),
                 final_norm["bias"].reshape(1, D)]

    blk = (2 * _nbytes((tm, D), jnp.bfloat16) + 2 * _nbytes((D, Dff), jnp.bfloat16)
           + _nbytes((1, Dff), jnp.float32) + 3 * _nbytes((1, D), jnp.float32))
    y = pl.pallas_call(
        partial(_ffn_kernel, final_norm=final_norm is not None),
        grid=(M // tm,),
        in_specs=in_specs,
        out_specs=pl.BlockSpec((tm, D), lambda i: (i, 0)),
        out_shape=jax.ShapeDtypeStruct((M, D), jnp.bfloat16),
        compiler_params=pltpu.CompilerParams(
            dimension_semantics=("parallel",),
            vmem_limit_bytes=_vmem_limit(blk, _nbytes((tm, Dff), jnp.float32))),
    )(*args)
    return y.reshape(B, S, D)


# --------------------------------------------------------------------------
# Final LayerNorm + ProjectionLayer (Linear + log_softmax), vocab-tiled.
# Pass 1: per-vocab-tile logits + online logsumexp; Pass 2: logits - lse.
# --------------------------------------------------------------------------
def _proj_lse_kernel(x_ref, a_ref, g_ref, w_ref, b_ref, logits_ref, lse_ref,
                     xn_sc, m_sc, l_sc):
    j = pl.program_id(1)

    @pl.when(j == 0)
    def _():
        x = x_ref[...].astype(jnp.float32)
        xn_sc[...] = _ln(x, a_ref[...], g_ref[...]).astype(jnp.bfloat16)
        m_sc[...] = jnp.full_like(m_sc, -jnp.inf)
        l_sc[...] = jnp.zeros_like(l_sc)

    logits = (jnp.dot(xn_sc[...], w_ref[...],
                      preferred_element_type=jnp.float32) + b_ref[...])
    logits_ref[...] = logits

    m_prev = m_sc[...]
    m_new = jnp.maximum(m_prev, jnp.max(logits, axis=-1, keepdims=True))
    l_sc[...] = (l_sc[...] * jnp.exp(m_prev - m_new)
                 + jnp.sum(jnp.exp(logits - m_new), axis=-1, keepdims=True))
    m_sc[...] = m_new

    @pl.when(j == pl.num_programs(1) - 1)
    def _():
        lse_ref[...] = m_sc[...] + jnp.log(l_sc[...])


def _sub_lse_kernel(logits_ref, lse_ref, o_ref):
    o_ref[...] = logits_ref[...] - lse_ref[...]


def norm_project(x, ln_p, w, b):
    B, S, D = x.shape
    V = w.shape[1]
    M = B * S
    tm = _row_tile(M, cap=512)
    tv = _v_tile(V)
    grid = (M // tm, V // tv)
    x2 = x.reshape(M, D).astype(jnp.bfloat16)
    a = ln_p["alpha"].reshape(1, D)
    g = ln_p["bias"].reshape(1, D)
    const = lambda i, j: (0, 0)

    blk = (_nbytes((tm, D), jnp.bfloat16) + _nbytes((D, tv), jnp.bfloat16)
           + _nbytes((tm, tv), jnp.float32) + _nbytes((1, tv), jnp.float32))
    scr = _nbytes((tm, D), jnp.bfloat16) + 2 * _nbytes((tm, 1), jnp.float32)

    logits, lse = pl.pallas_call(
        _proj_lse_kernel,
        grid=grid,
        in_specs=[
            pl.BlockSpec((tm, D), lambda i, j: (i, 0)),
            pl.BlockSpec((1, D), const), pl.BlockSpec((1, D), const),
            pl.BlockSpec((D, tv), lambda i, j: (0, j)),
            pl.BlockSpec((1, tv), lambda i, j: (0, j)),
        ],
        out_specs=[pl.BlockSpec((tm, tv), lambda i, j: (i, j)),
                   pl.BlockSpec((tm, 1), lambda i, j: (i, 0))],
        out_shape=[jax.ShapeDtypeStruct((M, V), jnp.float32),
                   jax.ShapeDtypeStruct((M, 1), jnp.float32)],
        scratch_shapes=[pltpu.VMEM((tm, D), jnp.bfloat16),
                        pltpu.VMEM((tm, 1), jnp.float32),
                        pltpu.VMEM((tm, 1), jnp.float32)],
        compiler_params=pltpu.CompilerParams(
            dimension_semantics=("parallel", "arbitrary"),
            vmem_limit_bytes=_vmem_limit(blk, scr)),
    )(x2, a, g, w, b.reshape(1, V))

    out = pl.pallas_call(
        _sub_lse_kernel,
        grid=grid,
        in_specs=[pl.BlockSpec((tm, tv), lambda i, j: (i, j)),
                  pl.BlockSpec((tm, 1), lambda i, j: (i, 0))],
        out_specs=pl.BlockSpec((tm, tv), lambda i, j: (i, j)),
        out_shape=jax.ShapeDtypeStruct((M, V), jnp.float32),
        compiler_params=pltpu.CompilerParams(
            dimension_semantics=("parallel", "parallel")),
    )(logits, lse)
    return out.reshape(B, S, V)


# --------------------------------------------------------------------------
# Model glue
# --------------------------------------------------------------------------
def sinusoidal_pe(seq_len, d_model):
    pos = jnp.arange(seq_len, dtype=jnp.float32)[:, None]
    div = jnp.exp(jnp.arange(0, d_model, 2, dtype=jnp.float32)
                  * (-math.log(10000.0) / d_model))
    pe = jnp.zeros((seq_len, d_model), jnp.float32)
    pe = pe.at[:, 0::2].set(jnp.sin(pos * div))
    pe = pe.at[:, 1::2].set(jnp.cos(pos * div))
    return pe


def transformer_forward(params, src, tgt, src_mask, tgt_mask, *, h, d_model):
    del d_model  # sqrt(d_model) is folded into the embedding tables
    B, Ssrc = src.shape
    Stgt = tgt.shape[1]

    # Masks are the tutorial's key-padding(+causal) masks; the kernels rebuild
    # them in VMEM from per-batch prefix lengths (no dense (B,S,S) mask DMA).
    # TODO(synk): arbitrary dense attention masks would need a bool-mask path.
    src_len = jnp.sum(jnp.asarray(src_mask, jnp.int32).reshape(B, Ssrc),
                      axis=-1).astype(jnp.int32)
    tgt_len = jnp.sum(jnp.asarray(tgt_mask, jnp.int32)
                      .reshape(B, Stgt, Stgt)[:, -1, :],
                      axis=-1).astype(jnp.int32)

    # Embedding gather + sinusoidal PE stay in XLA (fuses for free).
    x = (jnp.take(params["src_emb"], src, axis=0)
         + params["src_pe"][:Ssrc]).astype(jnp.bfloat16)
    n_enc = len(params["encoder_layers"])
    for li, lp in enumerate(params["encoder_layers"]):
        x = self_attention_sublayer(x, src_len, lp["self_attn"], lp["norm1"],
                                    h=h, causal=False)
        x = ffn_sublayer(x, lp["norm2"], lp["ffn"],
                         final_norm=params["enc_norm"] if li == n_enc - 1 else None)
    enc = x   # encoder-final LayerNorm already applied (fused into last FFN)

    y = (jnp.take(params["tgt_emb"], tgt, axis=0)
         + params["tgt_pe"][:Stgt]).astype(jnp.bfloat16)
    for lp in params["decoder_layers"]:
        y = self_attention_sublayer(y, tgt_len, lp["self_attn"], lp["norm1"],
                                    h=h, causal=True)
        y = cross_attention_sublayer(y, enc, src_len, lp["cross_attn"],
                                     lp["norm2"], h=h)
        y = ffn_sublayer(y, lp["norm3"], lp["ffn"])

    # Final decoder LayerNorm is fused into the vocab-tiled projection.
    return norm_project(y, params["dec_norm"], params["proj_w"], params["proj_b"])


# --------------------------------------------------------------------------
# Deterministic parameter initialization (matmul weights stored bf16)
# --------------------------------------------------------------------------
def init_params(key, *, src_vocab, tgt_vocab, d_model, n_heads, n_layers,
                d_ff, seq_len):
    keys = jax.random.split(key, 256)
    it = iter(keys)

    def w32(shape, scale=0.02):
        return scale * jax.random.normal(next(it), shape, jnp.float32)

    def wb(shape, scale=0.02):
        return w32(shape, scale).astype(jnp.bfloat16)

    zeros = lambda shape: jnp.zeros(shape, jnp.float32)
    ones = lambda shape: jnp.ones(shape, jnp.float32)
    norm = lambda: {"alpha": ones((d_model,)), "bias": zeros((d_model,))}
    q_scale = 1.0 / math.sqrt(d_model // n_heads)   # folded into Wq / bq

    def attn():
        return {"wq": (w32((d_model, d_model)) * q_scale).astype(jnp.bfloat16),
                "bq": zeros((d_model,)),
                "wk": wb((d_model, d_model)), "bk": zeros((d_model,)),
                "wv": wb((d_model, d_model)), "bv": zeros((d_model,)),
                "wo": wb((d_model, d_model)), "bo": zeros((d_model,))}

    def ffn():
        return {"w1": wb((d_model, d_ff)), "b1": zeros((d_ff,)),
                "w2": wb((d_ff, d_model)), "b2": zeros((d_model,))}

    emb_scale = math.sqrt(d_model)   # InputEmbeddings * sqrt(d_model), folded
    return {
        "src_emb": w32((src_vocab, d_model), 1.0) * emb_scale,
        "tgt_emb": w32((tgt_vocab, d_model), 1.0) * emb_scale,
        "src_pe": sinusoidal_pe(seq_len, d_model),
        "tgt_pe": sinusoidal_pe(seq_len, d_model),
        "encoder_layers": [
            {"self_attn": attn(), "ffn": ffn(),
             "norm1": norm(), "norm2": norm()} for _ in range(n_layers)],
        "decoder_layers": [
            {"self_attn": attn(), "cross_attn": attn(), "ffn": ffn(),
             "norm1": norm(), "norm2": norm(), "norm3": norm()}
            for _ in range(n_layers)],
        "enc_norm": norm(),
        "dec_norm": norm(),
        "proj_w": wb((d_model, tgt_vocab)),
        "proj_b": zeros((tgt_vocab,)),
    }


# --------------------------------------------------------------------------
if __name__ == "__main__":
    B, S_SRC, S_TGT = 2, 8, 8
    D_MODEL, H, D_FF, N_LAYERS = 128, 4, 256, 2
    SRC_VOCAB, TGT_VOCAB = 48, 64

    key = jax.random.PRNGKey(0)
    pkey, skey, tkey = jax.random.split(key, 3)

    params = init_params(pkey, src_vocab=SRC_VOCAB, tgt_vocab=TGT_VOCAB,
                         d_model=D_MODEL, n_heads=H, n_layers=N_LAYERS,
                         d_ff=D_FF, seq_len=max(S_SRC, S_TGT))

    src = jax.random.randint(skey, (B, S_SRC), 0, SRC_VOCAB, dtype=jnp.int32)
    tgt = jax.random.randint(tkey, (B, S_TGT), 0, TGT_VOCAB, dtype=jnp.int32)

    # src padding mask (B,1,1,S_src): batch 0 fully valid, batch 1 pads last 2
    src_valid = jnp.array([[1] * S_SRC, [1] * (S_SRC - 2) + [0, 0]], jnp.int32)
    src_mask = src_valid[:, None, None, :]
    # tgt mask (B,1,S_tgt,S_tgt): causal & (all-valid) padding
    causal = jnp.tril(jnp.ones((S_TGT, S_TGT), jnp.int32))
    tgt_valid = jnp.ones((B, S_TGT), jnp.int32)
    tgt_mask = (tgt_valid[:, None, None, :] * causal[None, None, :, :]).astype(jnp.int32)

    fwd = jax.jit(partial(transformer_forward, h=H, d_model=D_MODEL))
    out = fwd(params, src, tgt, src_mask, tgt_mask)
    out = jax.block_until_ready(out)

    assert out.shape == (B, S_TGT, TGT_VOCAB), out.shape
    assert bool(jnp.all(jnp.isfinite(out)))
    # log_softmax rows must sum to ~1 in probability space
    row_sums = jnp.exp(out).sum(-1)
    assert bool(jnp.all(jnp.abs(row_sums - 1.0) < 1e-2)), row_sums
    print("KERNEL_OK")
</pallas_src>

<mosaic_0001>
module attributes {stable_mosaic.version = 11 : i64} {
  func.func @_ffn_kernel(%arg0: i32, %arg1: memref<16x128xbf16, #tpu.memory_space<vmem>>, %arg2: memref<1x128xf32, #tpu.memory_space<vmem>>, %arg3: memref<1x128xf32, #tpu.memory_space<vmem>>, %arg4: memref<128x256xbf16, #tpu.memory_space<vmem>>, %arg5: memref<1x256xf32, #tpu.memory_space<vmem>>, %arg6: memref<256x128xbf16, #tpu.memory_space<vmem>>, %arg7: memref<1x128xf32, #tpu.memory_space<vmem>>, %arg8: memref<16x128xbf16, #tpu.memory_space<vmem>>) attributes {dimension_semantics = [#tpu.dimension_semantics<parallel>], iteration_bounds = array<i64: 1>, scalar_prefetch = 0 : i64, scratch_operands = 0 : i64, tpu.core_type = #tpu.core_type<tc>, window_params = [{transform_indices = @transform_0, window_bounds = array<i64: 16, 128>}, {pipeline_mode = #tpu.pipeline_mode<synchronous>, transform_indices = @transform_1, window_bounds = array<i64: 1, 128>}, {pipeline_mode = #tpu.pipeline_mode<synchronous>, transform_indices = @transform_2, window_bounds = array<i64: 1, 128>}, {pipeline_mode = #tpu.pipeline_mode<synchronous>, transform_indices = @transform_3, window_bounds = array<i64: 128, 256>}, {pipeline_mode = #tpu.pipeline_mode<synchronous>, transform_indices = @transform_4, window_bounds = array<i64: 1, 256>}, {pipeline_mode = #tpu.pipeline_mode<synchronous>, transform_indices = @transform_5, window_bounds = array<i64: 256, 128>}, {pipeline_mode = #tpu.pipeline_mode<synchronous>, transform_indices = @transform_6, window_bounds = array<i64: 1, 128>}, {transform_indices = @transform_7, window_bounds = array<i64: 16, 128>}]} {
    %c0 = arith.constant 0 : index
    %c0_0 = arith.constant 0 : index
    %0 = vector.load %arg1[%c0, %c0_0] : memref<16x128xbf16, #tpu.memory_space<vmem>>, vector<16x128xbf16>
    %1 = arith.extf %0 : vector<16x128xbf16> to vector<16x128xf32>
    %c0_1 = arith.constant 0 : index
    %c0_2 = arith.constant 0 : index
    %2 = vector.load %arg2[%c0_1, %c0_2] : memref<1x128xf32, #tpu.memory_space<vmem>>, vector<1x128xf32>
    %c0_3 = arith.constant 0 : index
    %c0_4 = arith.constant 0 : index
    %3 = vector.load %arg3[%c0_3, %c0_4] : memref<1x128xf32, #tpu.memory_space<vmem>>, vector<1x128xf32>
    %cst = arith.constant dense<0.000000e+00> : vector<16xf32>
    %4 = vector.multi_reduction <add>, %1, %cst [1] : vector<16x128xf32> to vector<16xf32>
    %5 = vector.shape_cast %4 : vector<16xf32> to vector<16x1xf32>
    %cst_5 = arith.constant 1.280000e+02 : f32
    %6 = vector.broadcast %cst_5 : f32 to vector<16x1xf32>
    %7 = arith.divf %5, %6 : vector<16x1xf32>
    %8 = vector.broadcast %7 : vector<16x1xf32> to vector<16x128xf32>
    %9 = arith.subf %1, %8 : vector<16x128xf32>
    %10 = arith.mulf %9, %9 : vector<16x128xf32>
    %cst_6 = arith.constant dense<0.000000e+00> : vector<16xf32>
    %11 = vector.multi_reduction <add>, %10, %cst_6 [1] : vector<16x128xf32> to vector<16xf32>
    %12 = vector.shape_cast %11 : vector<16xf32> to vector<16x1xf32>
    %cst_7 = arith.constant 0.00787401571 : f32
    %13 = vector.broadcast %cst_7 : f32 to vector<16x1xf32>
    %14 = arith.mulf %12, %13 : vector<16x1xf32>
    %15 = math.sqrt %14 : vector<16x1xf32>
    %cst_8 = arith.constant 9.99999997E-7 : f32
    %16 = vector.broadcast %cst_8 : f32 to vector<16x1xf32>
    %17 = arith.addf %15, %16 : vector<16x1xf32>
    %18 = tpu.reciprocal %17 : vector<16x1xf32> -> vector<16x1xf32>
    %19 = vector.broadcast %7 : vector<16x1xf32> to vector<16x128xf32>
    %20 = arith.subf %1, %19 : vector<16x128xf32>
    %21 = vector.broadcast %18 : vector<16x1xf32> to vector<16x128xf32>
    %22 = arith.mulf %20, %21 : vector<16x128xf32>
    %23 = vector.broadcast %2 : vector<1x128xf32> to vector<16x128xf32>
    %24 = arith.mulf %23, %22 : vector<16x128xf32>
    %25 = vector.broadcast %3 : vector<1x128xf32> to vector<16x128xf32>
    %26 = arith.addf %24, %25 : vector<16x128xf32>
    %27 = arith.truncf %26 : vector<16x128xf32> to vector<16x128xbf16>
    %c0_9 = arith.constant 0 : index
    %c0_10 = arith.constant 0 : index
    %28 = vector.load %arg4[%c0_9, %c0_10] : memref<128x256xbf16, #tpu.memory_space<vmem>>, vector<128x256xbf16>
    %cst_11 = arith.constant dense<0.000000e+00> : vector<16x256xf32>
    %29 = tpu.matmul %27, %28, %cst_11 {dimension_numbers = #tpu.dot_dimension_numbers<[1], [0], [0], [1], [0, 0, 1, 1], [], []>} : vector<16x128xbf16>, vector<128x256xbf16>, vector<16x256xf32> -> vector<16x256xf32>
    %c0_12 = arith.constant 0 : index
    %c0_13 = arith.constant 0 : index
    %30 = vector.load %arg5[%c0_12, %c0_13] : memref<1x256xf32, #tpu.memory_space<vmem>>, vector<1x256xf32>
    %31 = vector.broadcast %30 : vector<1x256xf32> to vector<16x256xf32>
    %32 = arith.addf %29, %31 : vector<16x256xf32>
    %cst_14 = arith.constant 0.000000e+00 : f32
    %33 = vector.broadcast %cst_14 : f32 to vector<16x256xf32>
    %34 = arith.maximumf %32, %33 : vector<16x256xf32>
    %35 = arith.truncf %34 : vector<16x256xf32> to vector<16x256xbf16>
    %c0_15 = arith.constant 0 : index
    %c0_16 = arith.constant 0 : index
    %36 = vector.load %arg6[%c0_15, %c0_16] : memref<256x128xbf16, #tpu.memory_space<vmem>>, vector<256x128xbf16>
    %cst_17 = arith.constant dense<0.000000e+00> : vector<16x128xf32>
    %37 = tpu.matmul %35, %36, %cst_17 {dimension_numbers = #tpu.dot_dimension_numbers<[1], [0], [0], [1], [0, 0, 1, 1], [], []>} : vector<16x256xbf16>, vector<256x128xbf16>, vector<16x128xf32> -> vector<16x128xf32>
    %c0_18 = arith.constant 0 : index
    %c0_19 = arith.constant 0 : index
    %38 = vector.load %arg7[%c0_18, %c0_19] : memref<1x128xf32, #tpu.memory_space<vmem>>, vector<1x128xf32>
    %39 = vector.broadcast %38 : vector<1x128xf32> to vector<16x128xf32>
    %40 = arith.addf %37, %39 : vector<16x128xf32>
    %41 = arith.addf %40, %1 : vector<16x128xf32>
    %42 = arith.truncf %41 : vector<16x128xf32> to vector<16x128xbf16>
    %c0_20 = arith.constant 0 : index
    %c0_21 = arith.constant 0 : index
    %43 = vector.load %arg8[%c0_20, %c0_21] : memref<16x128xbf16, #tpu.memory_space<vmem>>, vector<16x128xbf16>
    tpu.vector_store %arg8[%c0_20, %c0_21], %42 {strides = array<i32>} : memref<16x128xbf16, #tpu.memory_space<vmem>>, vector<16x128xbf16>,
    return
  }
  func.func @transform_0(%arg0: i32) -> (i32, i32) {
    %c0_i32 = arith.constant 0 : i32
    %c0_i32_0 = arith.constant 0 : i32
    return %arg0, %c0_i32 : i32, i32
  }
  func.func @transform_1(%arg0: i32) -> (i32, i32) {
    %c0_i32 = arith.constant 0 : i32
    %c0_i32_0 = arith.constant 0 : i32
    %c0_i32_1 = arith.constant 0 : i32
    return %c0_i32, %c0_i32_0 : i32, i32
  }
  func.func @transform_2(%arg0: i32) -> (i32, i32) {
    %c0_i32 = arith.constant 0 : i32
    %c0_i32_0 = arith.constant 0 : i32
    %c0_i32_1 = arith.constant 0 : i32
    return %c0_i32, %c0_i32_0 : i32, i32
  }
  func.func @transform_3(%arg0: i32) -> (i32, i32) {
    %c0_i32 = arith.constant 0 : i32
    %c0_i32_0 = arith.constant 0 : i32
    %c0_i32_1 = arith.constant 0 : i32
    return %c0_i32, %c0_i32_0 : i32, i32
  }
  func.func @transform_4(%arg0: i32) -> (i32, i32) {
    %c0_i32 = arith.constant 0 : i32
    %c0_i32_0 = arith.constant 0 : i32
    %c0_i32_1 = arith.constant 0 : i32
    return %c0_i32, %c0_i32_0 : i32, i32
  }
  func.func @transform_5(%arg0: i32) -> (i32, i32) {
    %c0_i32 = arith.constant 0 : i32
    %c0_i32_0 = arith.constant 0 : i32
    %c0_i32_1 = arith.constant 0 : i32
    return %c0_i32, %c0_i32_0 : i32, i32
  }
  func.func @transform_6(%arg0: i32) -> (i32, i32) {
    %c0_i32 = arith.constant 0 : i32
    %c0_i32_0 = arith.constant 0 : i32
    %c0_i32_1 = arith.constant 0 : i32
    return %c0_i32, %c0_i32_0 : i32, i32
  }
  func.func @transform_7(%arg0: i32) -> (i32, i32) {
    %c0_i32 = arith.constant 0 : i32
    %c0_i32_0 = arith.constant 0 : i32
    return %arg0, %c0_i32 : i32, i32
  }
}

module attributes {stable_mosaic.version = 11 : i64} {
  func.func @_ffn_kernel(%arg0: i32, %arg1: memref<16x128xbf16, #tpu.memory_space<vmem>>, %arg2: memref<1x128xf32, #tpu.memory_space<vmem>>, %arg3: memref<1x128xf32, #tpu.memory_space<vmem>>, %arg4: memref<128x256xbf16, #tpu.memory_space<vmem>>, %arg5: memref<1x256xf32, #tpu.memory_space<vmem>>, %arg6: memref<256x128xbf16, #tpu.memory_space<vmem>>, %arg7: memref<1x128xf32, #tpu.memory_space<vmem>>, %arg8: memref<1x128xf32, #tpu.memory_space<vmem>>, %arg9: memref<1x128xf32, #tpu.memory_space<vmem>>, %arg10: memref<16x128xbf16, #tpu.memory_space<vmem>>) attributes {dimension_semantics = [#tpu.dimension_semantics<parallel>], iteration_bounds = array<i64: 1>, scalar_prefetch = 0 : i64, scratch_operands = 0 : i64, tpu.core_type = #tpu.core_type<tc>, window_params = [{transform_indices = @transform_0, window_bounds = array<i64: 16, 128>}, {pipeline_mode = #tpu.pipeline_mode<synchronous>, transform_indices = @transform_1, window_bounds = array<i64: 1, 128>}, {pipeline_mode = #tpu.pipeline_mode<synchronous>, transform_indices = @transform_2, window_bounds = array<i64: 1, 128>}, {pipeline_mode = #tpu.pipeline_mode<synchronous>, transform_indices = @transform_3, window_bounds = array<i64: 128, 256>}, {pipeline_mode = #tpu.pipeline_mode<synchronous>, transform_indices = @transform_4, window_bounds = array<i64: 1, 256>}, {pipeline_mode = #tpu.pipeline_mode<synchronous>, transform_indices = @transform_5, window_bounds = array<i64: 256, 128>}, {pipeline_mode = #tpu.pipeline_mode<synchronous>, transform_indices = @transform_6, window_bounds = array<i64: 1, 128>}, {pipeline_mode = #tpu.pipeline_mode<synchronous>, transform_indices = @transform_7, window_bounds = array<i64: 1, 128>}, {pipeline_mode = #tpu.pipeline_mode<synchronous>, transform_indices = @transform_8, window_bounds = array<i64: 1, 128>}, {transform_indices = @transform_9, window_bounds = array<i64: 16, 128>}]} {
    %c0 = arith.constant 0 : index
    %c0_0 = arith.constant 0 : index
    %0 = vector.load %arg1[%c0, %c0_0] : memref<16x128xbf16, #tpu.memory_space<vmem>>, vector<16x128xbf16>
    %1 = arith.extf %0 : vector<16x128xbf16> to vector<16x128xf32>
    %c0_1 = arith.constant 0 : index
    %c0_2 = arith.constant 0 : index
    %2 = vector.load %arg2[%c0_1, %c0_2] : memref<1x128xf32, #tpu.memory_space<vmem>>, vector<1x128xf32>
    %c0_3 = arith.constant 0 : index
    %c0_4 = arith.constant 0 : index
    %3 = vector.load %arg3[%c0_3, %c0_4] : memref<1x128xf32, #tpu.memory_space<vmem>>, vector<1x128xf32>
    %cst = arith.constant dense<0.000000e+00> : vector<16xf32>
    %4 = vector.multi_reduction <add>, %1, %cst [1] : vector<16x128xf32> to vector<16xf32>
    %5 = vector.shape_cast %4 : vector<16xf32> to vector<16x1xf32>
    %cst_5 = arith.constant 1.280000e+02 : f32
    %6 = vector.broadcast %cst_5 : f32 to vector<16x1xf32>
    %7 = arith.divf %5, %6 : vector<16x1xf32>
    %8 = vector.broadcast %7 : vector<16x1xf32> to vector<16x128xf32>
    %9 = arith.subf %1, %8 : vector<16x128xf32>
    %10 = arith.mulf %9, %9 : vector<16x128xf32>
    %cst_6 = arith.constant dense<0.000000e+00> : vector<16xf32>
    %11 = vector.multi_reduction <add>, %10, %cst_6 [1] : vector<16x128xf32> to vector<16xf32>
    %12 = vector.shape_cast %11 : vector<16xf32> to vector<16x1xf32>
    %cst_7 = arith.constant 0.00787401571 : f32
    %13 = vector.broadcast %cst_7 : f32 to vector<16x1xf32>
    %14 = arith.mulf %12, %13 : vector<16x1xf32>
    %15 = math.sqrt %14 : vector<16x1xf32>
    %cst_8 = arith.constant 9.99999997E-7 : f32
    %16 = vector.broadcast %cst_8 : f32 to vector<16x1xf32>
    %17 = arith.addf %15, %16 : vector<16x1xf32>
    %18 = tpu.reciprocal %17 : vector<16x1xf32> -> vector<16x1xf32>
    %19 = vector.broadcast %7 : vector<16x1xf32> to vector<16x128xf32>
    %20 = arith.subf %1, %19 : vector<16x128xf32>
    %21 = vector.broadcast %18 : vector<16x1xf32> to vector<16x128xf32>
    %22 = arith.mulf %20, %21 : vector<16x128xf32>
    %23 = vector.broadcast %2 : vector<1x128xf32> to vector<16x128xf32>
    %24 = arith.mulf %23, %22 : vector<16x128xf32>
    %25 = vector.broadcast %3 : vector<1x128xf32> to vector<16x128xf32>
    %26 = arith.addf %24, %25 : vector<16x128xf32>
    %27 = arith.truncf %26 : vector<16x128xf32> to vector<16x128xbf16>
    %c0_9 = arith.constant 0 : index
    %c0_10 = arith.constant 0 : index
    %28 = vector.load %arg4[%c0_9, %c0_10] : memref<128x256xbf16, #tpu.memory_space<vmem>>, vector<128x256xbf16>
    %cst_11 = arith.constant dense<0.000000e+00> : vector<16x256xf32>
    %29 = tpu.matmul %27, %28, %cst_11 {dimension_numbers = #tpu.dot_dimension_numbers<[1], [0], [0], [1], [0, 0, 1, 1], [], []>} : vector<16x128xbf16>, vector<128x256xbf16>, vector<16x256xf32> -> vector<16x256xf32>
    %c0_12 = arith.constant 0 : index
    %c0_13 = arith.constant 0 : index
    %30 = vector.load %arg5[%c0_12, %c0_13] : memref<1x256xf32, #tpu.memory_space<vmem>>, vector<1x256xf32>
    %31 = vector.broadcast %30 : vector<1x256xf32> to vector<16x256xf32>
    %32 = arith.addf %29, %31 : vector<16x256xf32>
    %cst_14 = arith.constant 0.000000e+00 : f32
    %33 = vector.broadcast %cst_14 : f32 to vector<16x256xf32>
    %34 = arith.maximumf %32, %33 : vector<16x256xf32>
    %35 = arith.truncf %34 : vector<16x256xf32> to vector<16x256xbf16>
    %c0_15 = arith.constant 0 : index
    %c0_16 = arith.constant 0 : index
    %36 = vector.load %arg6[%c0_15, %c0_16] : memref<256x128xbf16, #tpu.memory_space<vmem>>, vector<256x128xbf16>
    %cst_17 = arith.constant dense<0.000000e+00> : vector<16x128xf32>
    %37 = tpu.matmul %35, %36, %cst_17 {dimension_numbers = #tpu.dot_dimension_numbers<[1], [0], [0], [1], [0, 0, 1, 1], [], []>} : vector<16x256xbf16>, vector<256x128xbf16>, vector<16x128xf32> -> vector<16x128xf32>
    %c0_18 = arith.constant 0 : index
    %c0_19 = arith.constant 0 : index
    %38 = vector.load %arg7[%c0_18, %c0_19] : memref<1x128xf32, #tpu.memory_space<vmem>>, vector<1x128xf32>
    %39 = vector.broadcast %38 : vector<1x128xf32> to vector<16x128xf32>
    %40 = arith.addf %37, %39 : vector<16x128xf32>
    %41 = arith.addf %40, %1 : vector<16x128xf32>
    %c0_20 = arith.constant 0 : index
    %c0_21 = arith.constant 0 : index
    %42 = vector.load %arg8[%c0_20, %c0_21] : memref<1x128xf32, #tpu.memory_space<vmem>>, vector<1x128xf32>
    %c0_22 = arith.constant 0 : index
    %c0_23 = arith.constant 0 : index
    %43 = vector.load %arg9[%c0_22, %c0_23] : memref<1x128xf32, #tpu.memory_space<vmem>>, vector<1x128xf32>
    %cst_24 = arith.constant dense<0.000000e+00> : vector<16xf32>
    %44 = vector.multi_reduction <add>, %41, %cst_24 [1] : vector<16x128xf32> to vector<16xf32>
    %45 = vector.shape_cast %44 : vector<16xf32> to vector<16x1xf32>
    %cst_25 = arith.constant 1.280000e+02 : f32
    %46 = vector.broadcast %cst_25 : f32 to vector<16x1xf32>
    %47 = arith.divf %45, %46 : vector<16x1xf32>
    %48 = vector.broadcast %47 : vector<16x1xf32> to vector<16x128xf32>
    %49 = arith.subf %41, %48 : vector<16x128xf32>
    %50 = arith.mulf %49, %49 : vector<16x128xf32>
    %cst_26 = arith.constant dense<0.000000e+00> : vector<16xf32>
    %51 = vector.multi_reduction <add>, %50, %cst_26 [1] : vector<16x128xf32> to vector<16xf32>
    %52 = vector.shape_cast %51 : vector<16xf32> to vector<16x1xf32>
    %cst_27 = arith.constant 0.00787401571 : f32
    %53 = vector.broadcast %cst_27 : f32 to vector<16x1xf32>
    %54 = arith.mulf %52, %53 : vector<16x1xf32>
    %55 = math.sqrt %54 : vector<16x1xf32>
    %cst_28 = arith.constant 9.99999997E-7 : f32
    %56 = vector.broadcast %cst_28 : f32 to vector<16x1xf32>
    %57 = arith.addf %55, %56 : vector<16x1xf32>
    %58 = tpu.reciprocal %57 : vector<16x1xf32> -> vector<16x1xf32>
    %59 = vector.broadcast %47 : vector<16x1xf32> to vector<16x128xf32>
    %60 = arith.subf %41, %59 : vector<16x128xf32>
    %61 = vector.broadcast %58 : vector<16x1xf32> to vector<16x128xf32>
    %62 = arith.mulf %60, %61 : vector<16x128xf32>
    %63 = vector.broadcast %42 : vector<1x128xf32> to vector<16x128xf32>
    %64 = arith.mulf %63, %62 : vector<16x128xf32>
    %65 = vector.broadcast %43 : vector<1x128xf32> to vector<16x128xf32>
    %66 = arith.addf %64, %65 : vector<16x128xf32>
    %67 = arith.truncf %66 : vector<16x128xf32> to vector<16x128xbf16>
    %c0_29 = arith.constant 0 : index
    %c0_30 = arith.constant 0 : index
    %68 = vector.load %arg10[%c0_29, %c0_30] : memref<16x128xbf16, #tpu.memory_space<vmem>>, vector<16x128xbf16>
    tpu.vector_store %arg10[%c0_29, %c0_30], %67 {strides = array<i32>} : memref<16x128xbf16, #tpu.memory_space<vmem>>, vector<16x128xbf16>,
    return
  }
  func.func @transform_0(%arg0: i32) -> (i32, i32) {
    %c0_i32 = arith.constant 0 : i32
    %c0_i32_0 = arith.constant 0 : i32
    return %arg0, %c0_i32 : i32, i32
  }
  func.func @transform_1(%arg0: i32) -> (i32, i32) {
    %c0_i32 = arith.constant 0 : i32
    %c0_i32_0 = arith.constant 0 : i32
    %c0_i32_1 = arith.constant 0 : i32
    return %c0_i32, %c0_i32_0 : i32, i32
  }
  func.func @transform_2(%arg0: i32) -> (i32, i32) {
    %c0_i32 = arith.constant 0 : i32
    %c0_i32_0 = arith.constant 0 : i32
    %c0_i32_1 = arith.constant 0 : i32
    return %c0_i32, %c0_i32_0 : i32, i32
  }
  func.func @transform_3(%arg0: i32) -> (i32, i32) {
    %c0_i32 = arith.constant 0 : i32
    %c0_i32_0 = arith.constant 0 : i32
    %c0_i32_1 = arith.constant 0 : i32
    return %c0_i32, %c0_i32_0 : i32, i32
  }
  func.func @transform_4(%arg0: i32) -> (i32, i32) {
    %c0_i32 = arith.constant 0 : i32
    %c0_i32_0 = arith.constant 0 : i32
    %c0_i32_1 = arith.constant 0 : i32
    return %c0_i32, %c0_i32_0 : i32, i32
  }
  func.func @transform_5(%arg0: i32) -> (i32, i32) {
    %c0_i32 = arith.constant 0 : i32
    %c0_i32_0 = arith.constant 0 : i32
    %c0_i32_1 = arith.constant 0 : i32
    return %c0_i32, %c0_i32_0 : i32, i32
  }
  func.func @transform_6(%arg0: i32) -> (i32, i32) {
    %c0_i32 = arith.constant 0 : i32
    %c0_i32_0 = arith.constant 0 : i32
    %c0_i32_1 = arith.constant 0 : i32
    return %c0_i32, %c0_i32_0 : i32, i32
  }
  func.func @transform_7(%arg0: i32) -> (i32, i32) {
    %c0_i32 = arith.constant 0 : i32
    %c0_i32_0 = arith.constant 0 : i32
    %c0_i32_1 = arith.constant 0 : i32
    return %c0_i32, %c0_i32_0 : i32, i32
  }
  func.func @transform_8(%arg0: i32) -> (i32, i32) {
    %c0_i32 = arith.constant 0 : i32
    %c0_i32_0 = arith.constant 0 : i32
    %c0_i32_1 = arith.constant 0 : i32
    return %c0_i32, %c0_i32_0 : i32, i32
  }
  func.func @transform_9(%arg0: i32) -> (i32, i32) {
    %c0_i32 = arith.constant 0 : i32
    %c0_i32_0 = arith.constant 0 : i32
    return %arg0, %c0_i32 : i32, i32
  }
}

module attributes {stable_mosaic.version = 11 : i64} {
  func.func @_self_attn_kernel(%arg0: i32, %arg1: i32, %arg2: memref<2xi32, #tpu.memory_space<smem>>, %arg3: memref<1x8x128xbf16, #tpu.memory_space<vmem>>, %arg4: memref<1x128xf32, #tpu.memory_space<vmem>>, %arg5: memref<1x128xf32, #tpu.memory_space<vmem>>, %arg6: memref<128x128xbf16, #tpu.memory_space<vmem>>, %arg7: memref<1x128xf32, #tpu.memory_space<vmem>>, %arg8: memref<128x128xbf16, #tpu.memory_space<vmem>>, %arg9: memref<1x128xf32, #tpu.memory_space<vmem>>, %arg10: memref<128x128xbf16, #tpu.memory_space<vmem>>, %arg11: memref<1x128xf32, #tpu.memory_space<vmem>>, %arg12: memref<128x128xbf16, #tpu.memory_space<vmem>>, %arg13: memref<1x128xf32, #tpu.memory_space<vmem>>, %arg14: memref<1x8x128xbf16, #tpu.memory_space<vmem>>, %arg15: memref<8x128xbf16, #tpu.memory_space<vmem>>, %arg16: memref<8x128xbf16, #tpu.memory_space<vmem>>, %arg17: memref<8x128xbf16, #tpu.memory_space<vmem>>, %arg18: memref<8x128xf32, #tpu.memory_space<vmem>>) attributes {dimension_semantics = [#tpu.dimension_semantics<parallel>, #tpu.dimension_semantics<arbitrary>], iteration_bounds = array<i64: 2, 1>, scalar_prefetch = 1 : i64, scratch_operands = 4 : i64, tpu.core_type = #tpu.core_type<tc>, window_params = [{transform_indices = @transform_0, window_bounds = array<i64: 1, 8, 128>}, {pipeline_mode = #tpu.pipeline_mode<synchronous>, transform_indices = @transform_1, window_bounds = array<i64: 1, 128>}, {pipeline_mode = #tpu.pipeline_mode<synchronous>, transform_indices = @transform_2, window_bounds = array<i64: 1, 128>}, {pipeline_mode = #tpu.pipeline_mode<synchronous>, transform_indices = @transform_3, window_bounds = array<i64: 128, 128>}, {pipeline_mode = #tpu.pipeline_mode<synchronous>, transform_indices = @transform_4, window_bounds = array<i64: 1, 128>}, {pipeline_mode = #tpu.pipeline_mode<synchronous>, transform_indices = @transform_5, window_bounds = array<i64: 128, 128>}, {pipeline_mode = #tpu.pipeline_mode<synchronous>, transform_indices = @transform_6, window_bounds = array<i64: 1, 128>}, {pipeline_mode = #tpu.pipeline_mode<synchronous>, transform_indices = @transform_7, window_bounds = array<i64: 128, 128>}, {pipeline_mode = #tpu.pipeline_mode<synchronous>, transform_indices = @transform_8, window_bounds = array<i64: 1, 128>}, {pipeline_mode = #tpu.pipeline_mode<synchronous>, transform_indices = @transform_9, window_bounds = array<i64: 128, 128>}, {pipeline_mode = #tpu.pipeline_mode<synchronous>, transform_indices = @transform_10, window_bounds = array<i64: 1, 128>}, {transform_indices = @transform_11, window_bounds = array<i64: 1, 8, 128>}]} {
    %0 = arith.index_cast %arg0 : i32 to index
    %1 = memref.load %arg2[%0] : memref<2xi32, #tpu.memory_space<smem>>
    %c0 = arith.constant 0 : index
    %c0_0 = arith.constant 0 : index
    %2 = vector.load %arg4[%c0, %c0_0] : memref<1x128xf32, #tpu.memory_space<vmem>>, vector<1x128xf32>
    %c0_1 = arith.constant 0 : index
    %c0_2 = arith.constant 0 : index
    %3 = vector.load %arg5[%c0_1, %c0_2] : memref<1x128xf32, #tpu.memory_space<vmem>>, vector<1x128xf32>
    %c0_i32 = arith.constant 0 : i32
    %4 = arith.cmpi eq, %arg1, %c0_i32 : i32
    %5 = arith.extui %4 : i1 to i32
    %c0_i32_3 = arith.constant 0 : i32
    %6 = arith.cmpi ne, %5, %c0_i32_3 : i32
    scf.if %6 {
      %c0_51 = arith.constant 0 : index
      %c0_52 = arith.constant 0 : index
      %c0_53 = arith.constant 0 : index
      %114 = vector.load %arg3[%c0_51, %c0_52, %c0_53] : memref<1x8x128xbf16, #tpu.memory_space<vmem>>, vector<1x8x128xbf16>
      %115 = vector.shape_cast %114 : vector<1x8x128xbf16> to vector<8x128xbf16>
      %116 = arith.extf %115 : vector<8x128xbf16> to vector<8x128xf32>
      %cst_54 = arith.constant dense<0.000000e+00> : vector<8xf32>
      %117 = vector.multi_reduction <add>, %116, %cst_54 [1] : vector<8x128xf32> to vector<8xf32>
      %118 = vector.shape_cast %117 : vector<8xf32> to vector<8x1xf32>
      %cst_55 = arith.constant 1.280000e+02 : f32
      %119 = vector.broadcast %cst_55 : f32 to vector<8x1xf32>
      %120 = arith.divf %118, %119 : vector<8x1xf32>
      %121 = vector.broadcast %120 : vector<8x1xf32> to vector<8x128xf32>
      %122 = arith.subf %116, %121 : vector<8x128xf32>
      %123 = arith.mulf %122, %122 : vector<8x128xf32>
      %cst_56 = arith.constant dense<0.000000e+00> : vector<8xf32>
      %124 = vector.multi_reduction <add>, %123, %cst_56 [1] : vector<8x128xf32> to vector<8xf32>
      %125 = vector.shape_cast %124 : vector<8xf32> to vector<8x1xf32>
      %cst_57 = arith.constant 0.00787401571 : f32
      %126 = vector.broadcast %cst_57 : f32 to vector<8x1xf32>
      %127 = arith.mulf %125, %126 : vector<8x1xf32>
      %128 = math.sqrt %127 : vector<8x1xf32>
      %cst_58 = arith.constant 9.99999997E-7 : f32
      %129 = vector.broadcast %cst_58 : f32 to vector<8x1xf32>
      %130 = arith.addf %128, %129 : vector<8x1xf32>
      %131 = tpu.reciprocal %130 : vector<8x1xf32> -> vector<8x1xf32>
      %132 = vector.broadcast %120 : vector<8x1xf32> to vector<8x128xf32>
      %133 = arith.subf %116, %132 : vector<8x128xf32>
      %134 = vector.broadcast %131 : vector<8x1xf32> to vector<8x128xf32>
      %135 = arith.mulf %133, %134 : vector<8x128xf32>
      %136 = vector.broadcast %2 : vector<1x128xf32> to vector<8x128xf32>
      %137 = arith.mulf %136, %135 : vector<8x128xf32>
      %138 = vector.broadcast %3 : vector<1x128xf32> to vector<8x128xf32>
      %139 = arith.addf %137, %138 : vector<8x128xf32>
      %140 = arith.truncf %139 : vector<8x128xf32> to vector<8x128xbf16>
      %c0_59 = arith.constant 0 : index
      %c0_60 = arith.constant 0 : index
      %141 = vector.load %arg15[%c0_59, %c0_60] : memref<8x128xbf16, #tpu.memory_space<vmem>>, vector<8x128xbf16>
      tpu.vector_store %arg15[%c0_59, %c0_60], %140 {strides = array<i32>} : memref<8x128xbf16, #tpu.memory_space<vmem>>, vector<8x128xbf16>,
      %c0_61 = arith.constant 0 : index
      %c0_62 = arith.constant 0 : index
      %142 = vector.load %arg8[%c0_61, %c0_62] : memref<128x128xbf16, #tpu.memory_space<vmem>>, vector<128x128xbf16>
      %cst_63 = arith.constant dense<0.000000e+00> : vector<8x128xf32>
      %143 = tpu.matmul %140, %142, %cst_63 {dimension_numbers = #tpu.dot_dimension_numbers<[1], [0], [0], [1], [0, 0, 1, 1], [], []>} : vector<8x128xbf16>, vector<128x128xbf16>, vector<8x128xf32> -> vector<8x128xf32>
      %c0_64 = arith.constant 0 : index
      %c0_65 = arith.constant 0 : index
      %144 = vector.load %arg9[%c0_64, %c0_65] : memref<1x128xf32, #tpu.memory_space<vmem>>, vector<1x128xf32>
      %145 = vector.broadcast %144 : vector<1x128xf32> to vector<8x128xf32>
      %146 = arith.addf %143, %145 : vector<8x128xf32>
      %147 = arith.truncf %146 : vector<8x128xf32> to vector<8x128xbf16>
      %c0_66 = arith.constant 0 : index
      %c0_67 = arith.constant 0 : index
      %148 = vector.load %arg16[%c0_66, %c0_67] : memref<8x128xbf16, #tpu.memory_space<vmem>>, vector<8x128xbf16>
      tpu.vector_store %arg16[%c0_66, %c0_67], %147 {strides = array<i32>} : memref<8x128xbf16, #tpu.memory_space<vmem>>, vector<8x128xbf16>,
      %c0_68 = arith.constant 0 : index
      %c0_69 = arith.constant 0 : index
      %149 = vector.load %arg10[%c0_68, %c0_69] : memref<128x128xbf16, #tpu.memory_space<vmem>>, vector<128x128xbf16>
      %cst_70 = arith.constant dense<0.000000e+00> : vector<8x128xf32>
      %150 = tpu.matmul %140, %149, %cst_70 {dimension_numbers = #tpu.dot_dimension_numbers<[1], [0], [0], [1], [0, 0, 1, 1], [], []>} : vector<8x128xbf16>, vector<128x128xbf16>, vector<8x128xf32> -> vector<8x128xf32>
      %c0_71 = arith.constant 0 : index
      %c0_72 = arith.constant 0 : index
      %151 = vector.load %arg11[%c0_71, %c0_72] : memref<1x128xf32, #tpu.memory_space<vmem>>, vector<1x128xf32>
      %152 = vector.broadcast %151 : vector<1x128xf32> to vector<8x128xf32>
      %153 = arith.addf %150, %152 : vector<8x128xf32>
      %154 = arith.truncf %153 : vector<8x128xf32> to vector<8x128xbf16>
      %c0_73 = arith.constant 0 : index
      %c0_74 = arith.constant 0 : index
      %155 = vector.load %arg17[%c0_73, %c0_74] : memref<8x128xbf16, #tpu.memory_space<vmem>>, vector<8x128xbf16>
      tpu.vector_store %arg17[%c0_73, %c0_74], %154 {strides = array<i32>} : memref<8x128xbf16, #tpu.memory_space<vmem>>, vector<8x128xbf16>,
    } else {
    }
    %c8_i32 = arith.constant 8 : i32
    %7 = arith.muli %arg1, %c8_i32 : i32
    %c0_4 = arith.constant 0 : index
    %8 = arith.index_cast %7 : i32 to index
    %c0_5 = arith.constant 0 : index
    %9 = vector.load %arg3[%c0_4, %8, %c0_5] : memref<1x8x128xbf16, #tpu.memory_space<vmem>>, vector<1x8x128xbf16>
    %10 = vector.shape_cast %9 : vector<1x8x128xbf16> to vector<8x128xbf16>
    %11 = arith.extf %10 : vector<8x128xbf16> to vector<8x128xf32>
    %c8_i32_6 = arith.constant 8 : i32
    %12 = arith.muli %arg1, %c8_i32_6 : i32
    %13 = arith.index_cast %12 : i32 to index
    %c0_7 = arith.constant 0 : index
    %14 = vector.load %arg15[%13, %c0_7] : memref<8x128xbf16, #tpu.memory_space<vmem>>, vector<8x128xbf16>
    %c0_8 = arith.constant 0 : index
    %c0_9 = arith.constant 0 : index
    %15 = vector.load %arg6[%c0_8, %c0_9] : memref<128x128xbf16, #tpu.memory_space<vmem>>, vector<128x128xbf16>
    %cst = arith.constant dense<0.000000e+00> : vector<8x128xf32>
    %16 = tpu.matmul %14, %15, %cst {dimension_numbers = #tpu.dot_dimension_numbers<[1], [0], [0], [1], [0, 0, 1, 1], [], []>} : vector<8x128xbf16>, vector<128x128xbf16>, vector<8x128xf32> -> vector<8x128xf32>
    %c0_10 = arith.constant 0 : index
    %c0_11 = arith.constant 0 : index
    %17 = vector.load %arg7[%c0_10, %c0_11] : memref<1x128xf32, #tpu.memory_space<vmem>>, vector<1x128xf32>
    %18 = vector.broadcast %17 : vector<1x128xf32> to vector<8x128xf32>
    %19 = arith.addf %16, %18 : vector<8x128xf32>
    %20 = arith.truncf %19 : vector<8x128xf32> to vector<8x128xbf16>
    %21 = tpu.iota {dimensions = array<i32: 1>} : vector<8x8xi32>
    %22 = vector.broadcast %1 : i32 to vector<8x8xi32>
    %23 = arith.cmpi slt, %21, %22 : vector<8x8xi32>
    %c0_12 = arith.constant 0 : index
    %c0_13 = arith.constant 0 : index
    %24 = vector.load %arg16[%c0_12, %c0_13] : memref<8x128xbf16, #tpu.memory_space<vmem>>, vector<8x128xbf16>
    %c0_14 = arith.constant 0 : index
    %c0_15 = arith.constant 0 : index
    %25 = vector.load %arg17[%c0_14, %c0_15] : memref<8x128xbf16, #tpu.memory_space<vmem>>, vector<8x128xbf16>
    %26 = vector.extract_strided_slice %20 {offsets = [0, 0], sizes = [8, 32], strides = [1, 1]} : vector<8x128xbf16> to vector<8x32xbf16>
    %27 = vector.extract_strided_slice %24 {offsets = [0, 0], sizes = [8, 32], strides = [1, 1]} : vector<8x128xbf16> to vector<8x32xbf16>
    "tpu.trace_start"() <{level = 10 : i32, message = "qd,kd->qk"}> : () -> ()
    %cst_16 = arith.constant dense<0.000000e+00> : vector<8x8xf32>
    %28 = tpu.matmul %26, %27, %cst_16 {dimension_numbers = #tpu.dot_dimension_numbers<[1], [1], [0], [0], [0, 0, 1, 0], [], []>} : vector<8x32xbf16>, vector<8x32xbf16>, vector<8x8xf32> -> vector<8x8xf32>
    %cst_17 = arith.constant -1.000000e+09 : f32
    "tpu.trace_stop"() : () -> ()
    %29 = vector.broadcast %cst_17 : f32 to vector<8x8xf32>
    %30 = arith.select %23, %28, %29 : vector<8x8xi1>, vector<8x8xf32>
    %cst_18 = arith.constant dense<0xFF800000> : vector<8xf32>
    %31 = vector.multi_reduction <maximumf>, %30, %cst_18 [1] : vector<8x8xf32> to vector<8xf32>
    %32 = vector.shape_cast %31 : vector<8xf32> to vector<8x1xf32>
    %33 = vector.broadcast %32 : vector<8x1xf32> to vector<8x8xf32>
    %34 = arith.subf %30, %33 : vector<8x8xf32>
    %35 = math.exp %34 : vector<8x8xf32>
    %cst_19 = arith.constant dense<0.000000e+00> : vector<8xf32>
    %36 = vector.multi_reduction <add>, %35, %cst_19 [1] : vector<8x8xf32> to vector<8xf32>
    %37 = vector.shape_cast %36 : vector<8xf32> to vector<8x1xf32>
    %38 = tpu.reciprocal %37 {approx = true} : vector<8x1xf32> -> vector<8x1xf32>
    %39 = vector.broadcast %38 : vector<8x1xf32> to vector<8x8xf32>
    %40 = arith.mulf %35, %39 : vector<8x8xf32>
    %41 = arith.truncf %40 : vector<8x8xf32> to vector<8x8xbf16>
    %42 = vector.extract_strided_slice %25 {offsets = [0, 0], sizes = [8, 32], strides = [1, 1]} : vector<8x128xbf16> to vector<8x32xbf16>
    %cst_20 = arith.constant dense<0.000000e+00> : vector<8x32xf32>
    %43 = tpu.matmul %41, %42, %cst_20 {dimension_numbers = #tpu.dot_dimension_numbers<[1], [0], [0], [1], [0, 0, 1, 1], [], []>} : vector<8x8xbf16>, vector<8x32xbf16>, vector<8x32xf32> -> vector<8x32xf32>
    %c0_21 = arith.constant 0 : index
    %c0_22 = arith.constant 0 : index
    %44 = vector.load %arg18[%c0_21, %c0_22] : memref<8x128xf32, #tpu.memory_space<vmem>>, vector<8x32xf32>
    tpu.vector_store %arg18[%c0_21, %c0_22], %43 {strides = array<i32>} : memref<8x128xf32, #tpu.memory_space<vmem>>, vector<8x32xf32>,
    %45 = vector.extract_strided_slice %20 {offsets = [0, 32], sizes = [8, 32], strides = [1, 1]} : vector<8x128xbf16> to vector<8x32xbf16>
    %46 = vector.extract_strided_slice %24 {offsets = [0, 32], sizes = [8, 32], strides = [1, 1]} : vector<8x128xbf16> to vector<8x32xbf16>
    "tpu.trace_start"() <{level = 10 : i32, message = "qd,kd->qk"}> : () -> ()
    %cst_23 = arith.constant dense<0.000000e+00> : vector<8x8xf32>
    %47 = tpu.matmul %45, %46, %cst_23 {dimension_numbers = #tpu.dot_dimension_numbers<[1], [1], [0], [0], [0, 0, 1, 0], [], []>} : vector<8x32xbf16>, vector<8x32xbf16>, vector<8x8xf32> -> vector<8x8xf32>
    %cst_24 = arith.constant -1.000000e+09 : f32
    "tpu.trace_stop"() : () -> ()
    %48 = vector.broadcast %cst_24 : f32 to vector<8x8xf32>
    %49 = arith.select %23, %47, %48 : vector<8x8xi1>, vector<8x8xf32>
    %cst_25 = arith.constant dense<0xFF800000> : vector<8xf32>
    %50 = vector.multi_reduction <maximumf>, %49, %cst_25 [1] : vector<8x8xf32> to vector<8xf32>
    %51 = vector.shape_cast %50 : vector<8xf32> to vector<8x1xf32>
    %52 = vector.broadcast %51 : vector<8x1xf32> to vector<8x8xf32>
    %53 = arith.subf %49, %52 : vector<8x8xf32>
    %54 = math.exp %53 : vector<8x8xf32>
    %cst_26 = arith.constant dense<0.000000e+00> : vector<8xf32>
    %55 = vector.multi_reduction <add>, %54, %cst_26 [1] : vector<8x8xf32> to vector<8xf32>
    %56 = vector.shape_cast %55 : vector<8xf32> to vector<8x1xf32>
    %57 = tpu.reciprocal %56 {approx = true} : vector<8x1xf32> -> vector<8x1xf32>
    %58 = vector.broadcast %57 : vector<8x1xf32> to vector<8x8xf32>
    %59 = arith.mulf %54, %58 : vector<8x8xf32>
    %60 = arith.truncf %59 : vector<8x8xf32> to vector<8x8xbf16>
    %61 = vector.extract_strided_slice %25 {offsets = [0, 32], sizes = [8, 32], strides = [1, 1]} : vector<8x128xbf16> to vector<8x32xbf16>
    %cst_27 = arith.constant dense<0.000000e+00> : vector<8x32xf32>
    %62 = tpu.matmul %60, %61, %cst_27 {dimension_numbers = #tpu.dot_dimension_numbers<[1], [0], [0], [1], [0, 0, 1, 1], [], []>} : vector<8x8xbf16>, vector<8x32xbf16>, vector<8x32xf32> -> vector<8x32xf32>
    %c0_28 = arith.constant 0 : index
    %c32 = arith.constant 32 : index
    %63 = vector.load %arg18[%c0_28, %c32] : memref<8x128xf32, #tpu.memory_space<vmem>>, vector<8x32xf32>
    tpu.vector_store %arg18[%c0_28, %c32], %62 {strides = array<i32>} : memref<8x128xf32, #tpu.memory_space<vmem>>, vector<8x32xf32>,
    %64 = vector.extract_strided_slice %20 {offsets = [0, 64], sizes = [8, 32], strides = [1, 1]} : vector<8x128xbf16> to vector<8x32xbf16>
    %65 = vector.extract_strided_slice %24 {offsets = [0, 64], sizes = [8, 32], strides = [1, 1]} : vector<8x128xbf16> to vector<8x32xbf16>
    "tpu.trace_start"() <{level = 10 : i32, message = "qd,kd->qk"}> : () -> ()
    %cst_29 = arith.constant dense<0.000000e+00> : vector<8x8xf32>
    %66 = tpu.matmul %64, %65, %cst_29 {dimension_numbers = #tpu.dot_dimension_numbers<[1], [1], [0], [0], [0, 0, 1, 0], [], []>} : vector<8x32xbf16>, vector<8x32xbf16>, vector<8x8xf32> -> vector<8x8xf32>
    %cst_30 = arith.constant -1.000000e+09 : f32
    "tpu.trace_stop"() : () -> ()
    %67 = vector.broadcast %cst_30 : f32 to vector<8x8xf32>
    %68 = arith.select %23, %66, %67 : vector<8x8xi1>, vector<8x8xf32>
    %cst_31 = arith.constant dense<0xFF800000> : vector<8xf32>
    %69 = vector.multi_reduction <maximumf>, %68, %cst_31 [1] : vector<8x8xf32> to vector<8xf32>
    %70 = vector.shape_cast %69 : vector<8xf32> to vector<8x1xf32>
    %71 = vector.broadcast %70 : vector<8x1xf32> to vector<8x8xf32>
    %72 = arith.subf %68, %71 : vector<8x8xf32>
    %73 = math.exp %72 : vector<8x8xf32>
    %cst_32 = arith.constant dense<0.000000e+00> : vector<8xf32>
    %74 = vector.multi_reduction <add>, %73, %cst_32 [1] : vector<8x8xf32> to vector<8xf32>
    %75 = vector.shape_cast %74 : vector<8xf32> to vector<8x1xf32>
    %76 = tpu.reciprocal %75 {approx = true} : vector<8x1xf32> -> vector<8x1xf32>
    %77 = vector.broadcast %76 : vector<8x1xf32> to vector<8x8xf32>
    %78 = arith.mulf %73, %77 : vector<8x8xf32>
    %79 = arith.truncf %78 : vector<8x8xf32> to vector<8x8xbf16>
    %80 = vector.extract_strided_slice %25 {offsets = [0, 64], sizes = [8, 32], strides = [1, 1]} : vector<8x128xbf16> to vector<8x32xbf16>
    %cst_33 = arith.constant dense<0.000000e+00> : vector<8x32xf32>
    %81 = tpu.matmul %79, %80, %cst_33 {dimension_numbers = #tpu.dot_dimension_numbers<[1], [0], [0], [1], [0, 0, 1, 1], [], []>} : vector<8x8xbf16>, vector<8x32xbf16>, vector<8x32xf32> -> vector<8x32xf32>
    %c0_34 = arith.constant 0 : index
    %c64 = arith.constant 64 : index
    %82 = vector.load %arg18[%c0_34, %c64] : memref<8x128xf32, #tpu.memory_space<vmem>>, vector<8x32xf32>
    tpu.vector_store %arg18[%c0_34, %c64], %81 {strides = array<i32>} : memref<8x128xf32, #tpu.memory_space<vmem>>, vector<8x32xf32>,
    %83 = vector.extract_strided_slice %20 {offsets = [0, 96], sizes = [8, 32], strides = [1, 1]} : vector<8x128xbf16> to vector<8x32xbf16>
    %84 = vector.extract_strided_slice %24 {offsets = [0, 96], sizes = [8, 32], strides = [1, 1]} : vector<8x128xbf16> to vector<8x32xbf16>
    "tpu.trace_start"() <{level = 10 : i32, message = "qd,kd->qk"}> : () -> ()
    %cst_35 = arith.constant dense<0.000000e+00> : vector<8x8xf32>
    %85 = tpu.matmul %83, %84, %cst_35 {dimension_numbers = #tpu.dot_dimension_numbers<[1], [1], [0], [0], [0, 0, 1, 0], [], []>} : vector<8x32xbf16>, vector<8x32xbf16>, vector<8x8xf32> -> vector<8x8xf32>
    %cst_36 = arith.constant -1.000000e+09 : f32
    "tpu.trace_stop"() : () -> ()
    %86 = vector.broadcast %cst_36 : f32 to vector<8x8xf32>
    %87 = arith.select %23, %85, %86 : vector<8x8xi1>, vector<8x8xf32>
    %cst_37 = arith.constant dense<0xFF800000> : vector<8xf32>
    %88 = vector.multi_reduction <maximumf>, %87, %cst_37 [1] : vector<8x8xf32> to vector<8xf32>
    %89 = vector.shape_cast %88 : vector<8xf32> to vector<8x1xf32>
    %90 = vector.broadcast %89 : vector<8x1xf32> to vector<8x8xf32>
    %91 = arith.subf %87, %90 : vector<8x8xf32>
    %92 = math.exp %91 : vector<8x8xf32>
    %cst_38 = arith.constant dense<0.000000e+00> : vector<8xf32>
    %93 = vector.multi_reduction <add>, %92, %cst_38 [1] : vector<8x8xf32> to vector<8xf32>
    %94 = vector.shape_cast %93 : vector<8xf32> to vector<8x1xf32>
    %95 = tpu.reciprocal %94 {approx = true} : vector<8x1xf32> -> vector<8x1xf32>
    %96 = vector.broadcast %95 : vector<8x1xf32> to vector<8x8xf32>
    %97 = arith.mulf %92, %96 : vector<8x8xf32>
    %98 = arith.truncf %97 : vector<8x8xf32> to vector<8x8xbf16>
    %99 = vector.extract_strided_slice %25 {offsets = [0, 96], sizes = [8, 32], strides = [1, 1]} : vector<8x128xbf16> to vector<8x32xbf16>
    %cst_39 = arith.constant dense<0.000000e+00> : vector<8x32xf32>
    %100 = tpu.matmul %98, %99, %cst_39 {dimension_numbers = #tpu.dot_dimension_numbers<[1], [0], [0], [1], [0, 0, 1, 1], [], []>} : vector<8x8xbf16>, vector<8x32xbf16>, vector<8x32xf32> -> vector<8x32xf32>
    %c0_40 = arith.constant 0 : index
    %c96 = arith.constant 96 : index
    %101 = vector.load %arg18[%c0_40, %c96] : memref<8x128xf32, #tpu.memory_space<vmem>>, vector<8x32xf32>
    tpu.vector_store %arg18[%c0_40, %c96], %100 {strides = array<i32>} : memref<8x128xf32, #tpu.memory_space<vmem>>, vector<8x32xf32>,
    %c0_41 = arith.constant 0 : index
    %c0_42 = arith.constant 0 : index
    %102 = vector.load %arg18[%c0_41, %c0_42] : memref<8x128xf32, #tpu.memory_space<vmem>>, vector<8x128xf32>
    %103 = arith.truncf %102 : vector<8x128xf32> to vector<8x128xbf16>
    %c0_43 = arith.constant 0 : index
    %c0_44 = arith.constant 0 : index
    %104 = vector.load %arg12[%c0_43, %c0_44] : memref<128x128xbf16, #tpu.memory_space<vmem>>, vector<128x128xbf16>
    %cst_45 = arith.constant dense<0.000000e+00> : vector<8x128xf32>
    %105 = tpu.matmul %103, %104, %cst_45 {dimension_numbers = #tpu.dot_dimension_numbers<[1], [0], [0], [1], [0, 0, 1, 1], [], []>} : vector<8x128xbf16>, vector<128x128xbf16>, vector<8x128xf32> -> vector<8x128xf32>
    %c0_46 = arith.constant 0 : index
    %c0_47 = arith.constant 0 : index
    %106 = vector.load %arg13[%c0_46, %c0_47] : memref<1x128xf32, #tpu.memory_space<vmem>>, vector<1x128xf32>
    %107 = vector.broadcast %106 : vector<1x128xf32> to vector<8x128xf32>
    %108 = arith.addf %105, %107 : vector<8x128xf32>
    %109 = arith.addf %108, %11 : vector<8x128xf32>
    %110 = arith.truncf %109 : vector<8x128xf32> to vector<8x128xbf16>
    %c0_48 = arith.constant 0 : index
    %c0_49 = arith.constant 0 : index
    %c0_50 = arith.constant 0 : index
    %111 = vector.load %arg14[%c0_48, %c0_49, %c0_50] : memref<1x8x128xbf16, #tpu.memory_space<vmem>>, vector<1x8x128xbf16>
    %112 = vector.shape_cast %111 : vector<1x8x128xbf16> to vector<8x128xbf16>
    %113 = vector.shape_cast %110 : vector<8x128xbf16> to vector<1x8x128xbf16>
    tpu.vector_store %arg14[%c0_48, %c0_49, %c0_50], %113 {strides = array<i32>} : memref<1x8x128xbf16, #tpu.memory_space<vmem>>, vector<1x8x128xbf16>,
    return
  }
  func.func @transform_0(%arg0: i32, %arg1: i32, %arg2: memref<2xi32, #tpu.memory_space<smem>>) -> (i32, i32, i32) {
    %c0_i32 = arith.constant 0 : i32
    %c0_i32_0 = arith.constant 0 : i32
    %c0_i32_1 = arith.constant 0 : i32
    return %arg0, %c0_i32, %c0_i32_0 : i32, i32, i32
  }
  func.func @transform_1(%arg0: i32, %arg1: i32, %arg2: memref<2xi32, #tpu.memory_space<smem>>) -> (i32, i32) {
    %c0_i32 = arith.constant 0 : i32
    %c0_i32_0 = arith.constant 0 : i32
    %c0_i32_1 = arith.constant 0 : i32
    return %c0_i32, %c0_i32_0 : i32, i32
  }
  func.func @transform_2(%arg0: i32, %arg1: i32, %arg2: memref<2xi32, #tpu.memory_space<smem>>) -> (i32, i32) {
    %c0_i32 = arith.constant 0 : i32
    %c0_i32_0 = arith.constant 0 : i32
    %c0_i32_1 = arith.constant 0 : i32
    return %c0_i32, %c0_i32_0 : i32, i32
  }
  func.func @transform_3(%arg0: i32, %arg1: i32, %arg2: memref<2xi32, #tpu.memory_space<smem>>) -> (i32, i32) {
    %c0_i32 = arith.constant 0 : i32
    %c0_i32_0 = arith.constant 0 : i32
    %c0_i32_1 = arith.constant 0 : i32
    return %c0_i32, %c0_i32_0 : i32, i32
  }
  func.func @transform_4(%arg0: i32, %arg1: i32, %arg2: memref<2xi32, #tpu.memory_space<smem>>) -> (i32, i32) {
    %c0_i32 = arith.constant 0 : i32
    %c0_i32_0 = arith.constant 0 : i32
    %c0_i32_1 = arith.constant 0 : i32
    return %c0_i32, %c0_i32_0 : i32, i32
  }
  func.func @transform_5(%arg0: i32, %arg1: i32, %arg2: memref<2xi32, #tpu.memory_space<smem>>) -> (i32, i32) {
    %c0_i32 = arith.constant 0 : i32
    %c0_i32_0 = arith.constant 0 : i32
    %c0_i32_1 = arith.constant 0 : i32
    return %c0_i32, %c0_i32_0 : i32, i32
  }
  func.func @transform_6(%arg0: i32, %arg1: i32, %arg2: memref<2xi32, #tpu.memory_space<smem>>) -> (i32, i32) {
    %c0_i32 = arith.constant 0 : i32
    %c0_i32_0 = arith.constant 0 : i32
    %c0_i32_1 = arith.constant 0 : i32
    return %c0_i32, %c0_i32_0 : i32, i32
  }
  func.func @transform_7(%arg0: i32, %arg1: i32, %arg2: memref<2xi32, #tpu.memory_space<smem>>) -> (i32, i32) {
    %c0_i32 = arith.constant 0 : i32
    %c0_i32_0 = arith.constant 0 : i32
    %c0_i32_1 = arith.constant 0 : i32
    return %c0_i32, %c0_i32_0 : i32, i32
  }
  func.func @transform_8(%arg0: i32, %arg1: i32, %arg2: memref<2xi32, #tpu.memory_space<smem>>) -> (i32, i32) {
    %c0_i32 = arith.constant 0 : i32
    %c0_i32_0 = arith.constant 0 : i32
    %c0_i32_1 = arith.constant 0 : i32
    return %c0_i32, %c0_i32_0 : i32, i32
  }
  func.func @transform_9(%arg0: i32, %arg1: i32, %arg2: memref<2xi32, #tpu.memory_space<smem>>) -> (i32, i32) {
    %c0_i32 = arith.constant 0 : i32
    %c0_i32_0 = arith.constant 0 : i32
    %c0_i32_1 = arith.constant 0 : i32
    return %c0_i32, %c0_i32_0 : i32, i32
  }
  func.func @transform_10(%arg0: i32, %arg1: i32, %arg2: memref<2xi32, #tpu.memory_space<smem>>) -> (i32, i32) {
    %c0_i32 = arith.constant 0 : i32
    %c0_i32_0 = arith.constant 0 : i32
    %c0_i32_1 = arith.constant 0 : i32
    return %c0_i32, %c0_i32_0 : i32, i32
  }
  func.func @transform_11(%arg0: i32, %arg1: i32, %arg2: memref<2xi32, #tpu.memory_space<smem>>) -> (i32, i32, i32) {
    %c0_i32 = arith.constant 0 : i32
    %c0_i32_0 = arith.constant 0 : i32
    return %arg0, %arg1, %c0_i32 : i32, i32, i32
  }
}

module attributes {stable_mosaic.version = 11 : i64} {
  func.func @_self_attn_kernel(%arg0: i32, %arg1: i32, %arg2: memref<2xi32, #tpu.memory_space<smem>>, %arg3: memref<1x8x128xbf16, #tpu.memory_space<vmem>>, %arg4: memref<1x128xf32, #tpu.memory_space<vmem>>, %arg5: memref<1x128xf32, #tpu.memory_space<vmem>>, %arg6: memref<128x128xbf16, #tpu.memory_space<vmem>>, %arg7: memref<1x128xf32, #tpu.memory_space<vmem>>, %arg8: memref<128x128xbf16, #tpu.memory_space<vmem>>, %arg9: memref<1x128xf32, #tpu.memory_space<vmem>>, %arg10: memref<128x128xbf16, #tpu.memory_space<vmem>>, %arg11: memref<1x128xf32, #tpu.memory_space<vmem>>, %arg12: memref<128x128xbf16, #tpu.memory_space<vmem>>, %arg13: memref<1x128xf32, #tpu.memory_space<vmem>>, %arg14: memref<1x8x128xbf16, #tpu.memory_space<vmem>>, %arg15: memref<8x128xbf16, #tpu.memory_space<vmem>>, %arg16: memref<8x128xbf16, #tpu.memory_space<vmem>>, %arg17: memref<8x128xbf16, #tpu.memory_space<vmem>>, %arg18: memref<8x128xf32, #tpu.memory_space<vmem>>) attributes {dimension_semantics = [#tpu.dimension_semantics<parallel>, #tpu.dimension_semantics<arbitrary>], iteration_bounds = array<i64: 2, 1>, scalar_prefetch = 1 : i64, scratch_operands = 4 : i64, tpu.core_type = #tpu.core_type<tc>, window_params = [{transform_indices = @transform_0, window_bounds = array<i64: 1, 8, 128>}, {pipeline_mode = #tpu.pipeline_mode<synchronous>, transform_indices = @transform_1, window_bounds = array<i64: 1, 128>}, {pipeline_mode = #tpu.pipeline_mode<synchronous>, transform_indices = @transform_2, window_bounds = array<i64: 1, 128>}, {pipeline_mode = #tpu.pipeline_mode<synchronous>, transform_indices = @transform_3, window_bounds = array<i64: 128, 128>}, {pipeline_mode = #tpu.pipeline_mode<synchronous>, transform_indices = @transform_4, window_bounds = array<i64: 1, 128>}, {pipeline_mode = #tpu.pipeline_mode<synchronous>, transform_indices = @transform_5, window_bounds = array<i64: 128, 128>}, {pipeline_mode = #tpu.pipeline_mode<synchronous>, transform_indices = @transform_6, window_bounds = array<i64: 1, 128>}, {pipeline_mode = #tpu.pipeline_mode<synchronous>, transform_indices = @transform_7, window_bounds = array<i64: 128, 128>}, {pipeline_mode = #tpu.pipeline_mode<synchronous>, transform_indices = @transform_8, window_bounds = array<i64: 1, 128>}, {pipeline_mode = #tpu.pipeline_mode<synchronous>, transform_indices = @transform_9, window_bounds = array<i64: 128, 128>}, {pipeline_mode = #tpu.pipeline_mode<synchronous>, transform_indices = @transform_10, window_bounds = array<i64: 1, 128>}, {transform_indices = @transform_11, window_bounds = array<i64: 1, 8, 128>}]} {
    %0 = arith.index_cast %arg0 : i32 to index
    %1 = memref.load %arg2[%0] : memref<2xi32, #tpu.memory_space<smem>>
    %c0 = arith.constant 0 : index
    %c0_0 = arith.constant 0 : index
    %2 = vector.load %arg4[%c0, %c0_0] : memref<1x128xf32, #tpu.memory_space<vmem>>, vector<1x128xf32>
    %c0_1 = arith.constant 0 : index
    %c0_2 = arith.constant 0 : index
    %3 = vector.load %arg5[%c0_1, %c0_2] : memref<1x128xf32, #tpu.memory_space<vmem>>, vector<1x128xf32>
    %c0_i32 = arith.constant 0 : i32
    %4 = arith.cmpi eq, %arg1, %c0_i32 : i32
    %5 = arith.extui %4 : i1 to i32
    %c0_i32_3 = arith.constant 0 : i32
    %6 = arith.cmpi ne, %5, %c0_i32_3 : i32
    scf.if %6 {
      %c0_52 = arith.constant 0 : index
      %c0_53 = arith.constant 0 : index
      %c0_54 = arith.constant 0 : index
      %120 = vector.load %arg3[%c0_52, %c0_53, %c0_54] : memref<1x8x128xbf16, #tpu.memory_space<vmem>>, vector<1x8x128xbf16>
      %121 = vector.shape_cast %120 : vector<1x8x128xbf16> to vector<8x128xbf16>
      %122 = arith.extf %121 : vector<8x128xbf16> to vector<8x128xf32>
      %cst_55 = arith.constant dense<0.000000e+00> : vector<8xf32>
      %123 = vector.multi_reduction <add>, %122, %cst_55 [1] : vector<8x128xf32> to vector<8xf32>
      %124 = vector.shape_cast %123 : vector<8xf32> to vector<8x1xf32>
      %cst_56 = arith.constant 1.280000e+02 : f32
      %125 = vector.broadcast %cst_56 : f32 to vector<8x1xf32>
      %126 = arith.divf %124, %125 : vector<8x1xf32>
      %127 = vector.broadcast %126 : vector<8x1xf32> to vector<8x128xf32>
      %128 = arith.subf %122, %127 : vector<8x128xf32>
      %129 = arith.mulf %128, %128 : vector<8x128xf32>
      %cst_57 = arith.constant dense<0.000000e+00> : vector<8xf32>
      %130 = vector.multi_reduction <add>, %129, %cst_57 [1] : vector<8x128xf32> to vector<8xf32>
      %131 = vector.shape_cast %130 : vector<8xf32> to vector<8x1xf32>
      %cst_58 = arith.constant 0.00787401571 : f32
      %132 = vector.broadcast %cst_58 : f32 to vector<8x1xf32>
      %133 = arith.mulf %131, %132 : vector<8x1xf32>
      %134 = math.sqrt %133 : vector<8x1xf32>
      %cst_59 = arith.constant 9.99999997E-7 : f32
      %135 = vector.broadcast %cst_59 : f32 to vector<8x1xf32>
      %136 = arith.addf %134, %135 : vector<8x1xf32>
      %137 = tpu.reciprocal %136 : vector<8x1xf32> -> vector<8x1xf32>
      %138 = vector.broadcast %126 : vector<8x1xf32> to vector<8x128xf32>
      %139 = arith.subf %122, %138 : vector<8x128xf32>
      %140 = vector.broadcast %137 : vector<8x1xf32> to vector<8x128xf32>
      %141 = arith.mulf %139, %140 : vector<8x128xf32>
      %142 = vector.broadcast %2 : vector<1x128xf32> to vector<8x128xf32>
      %143 = arith.mulf %142, %141 : vector<8x128xf32>
      %144 = vector.broadcast %3 : vector<1x128xf32> to vector<8x128xf32>
      %145 = arith.addf %143, %144 : vector<8x128xf32>
      %146 = arith.truncf %145 : vector<8x128xf32> to vector<8x128xbf16>
      %c0_60 = arith.constant 0 : index
      %c0_61 = arith.constant 0 : index
      %147 = vector.load %arg15[%c0_60, %c0_61] : memref<8x128xbf16, #tpu.memory_space<vmem>>, vector<8x128xbf16>
      tpu.vector_store %arg15[%c0_60, %c0_61], %146 {strides = array<i32>} : memref<8x128xbf16, #tpu.memory_space<vmem>>, vector<8x128xbf16>,
      %c0_62 = arith.constant 0 : index
      %c0_63 = arith.constant 0 : index
      %148 = vector.load %arg8[%c0_62, %c0_63] : memref<128x128xbf16, #tpu.memory_space<vmem>>, vector<128x128xbf16>
      %cst_64 = arith.constant dense<0.000000e+00> : vector<8x128xf32>
      %149 = tpu.matmul %146, %148, %cst_64 {dimension_numbers = #tpu.dot_dimension_numbers<[1], [0], [0], [1], [0, 0, 1, 1], [], []>} : vector<8x128xbf16>, vector<128x128xbf16>, vector<8x128xf32> -> vector<8x128xf32>
      %c0_65 = arith.constant 0 : index
      %c0_66 = arith.constant 0 : index
      %150 = vector.load %arg9[%c0_65, %c0_66] : memref<1x128xf32, #tpu.memory_space<vmem>>, vector<1x128xf32>
      %151 = vector.broadcast %150 : vector<1x128xf32> to vector<8x128xf32>
      %152 = arith.addf %149, %151 : vector<8x128xf32>
      %153 = arith.truncf %152 : vector<8x128xf32> to vector<8x128xbf16>
      %c0_67 = arith.constant 0 : index
      %c0_68 = arith.constant 0 : index
      %154 = vector.load %arg16[%c0_67, %c0_68] : memref<8x128xbf16, #tpu.memory_space<vmem>>, vector<8x128xbf16>
      tpu.vector_store %arg16[%c0_67, %c0_68], %153 {strides = array<i32>} : memref<8x128xbf16, #tpu.memory_space<vmem>>, vector<8x128xbf16>,
      %c0_69 = arith.constant 0 : index
      %c0_70 = arith.constant 0 : index
      %155 = vector.load %arg10[%c0_69, %c0_70] : memref<128x128xbf16, #tpu.memory_space<vmem>>, vector<128x128xbf16>
      %cst_71 = arith.constant dense<0.000000e+00> : vector<8x128xf32>
      %156 = tpu.matmul %146, %155, %cst_71 {dimension_numbers = #tpu.dot_dimension_numbers<[1], [0], [0], [1], [0, 0, 1, 1], [], []>} : vector<8x128xbf16>, vector<128x128xbf16>, vector<8x128xf32> -> vector<8x128xf32>
      %c0_72 = arith.constant 0 : index
      %c0_73 = arith.constant 0 : index
      %157 = vector.load %arg11[%c0_72, %c0_73] : memref<1x128xf32, #tpu.memory_space<vmem>>, vector<1x128xf32>
      %158 = vector.broadcast %157 : vector<1x128xf32> to vector<8x128xf32>
      %159 = arith.addf %156, %158 : vector<8x128xf32>
      %160 = arith.truncf %159 : vector<8x128xf32> to vector<8x128xbf16>
      %c0_74 = arith.constant 0 : index
      %c0_75 = arith.constant 0 : index
      %161 = vector.load %arg17[%c0_74, %c0_75] : memref<8x128xbf16, #tpu.memory_space<vmem>>, vector<8x128xbf16>
      tpu.vector_store %arg17[%c0_74, %c0_75], %160 {strides = array<i32>} : memref<8x128xbf16, #tpu.memory_space<vmem>>, vector<8x128xbf16>,
    } else {
    }
    %c8_i32 = arith.constant 8 : i32
    %7 = arith.muli %arg1, %c8_i32 : i32
    %c0_4 = arith.constant 0 : index
    %8 = arith.index_cast %7 : i32 to index
    %c0_5 = arith.constant 0 : index
    %9 = vector.load %arg3[%c0_4, %8, %c0_5] : memref<1x8x128xbf16, #tpu.memory_space<vmem>>, vector<1x8x128xbf16>
    %10 = vector.shape_cast %9 : vector<1x8x128xbf16> to vector<8x128xbf16>
    %11 = arith.extf %10 : vector<8x128xbf16> to vector<8x128xf32>
    %c8_i32_6 = arith.constant 8 : i32
    %12 = arith.muli %arg1, %c8_i32_6 : i32
    %13 = arith.index_cast %12 : i32 to index
    %c0_7 = arith.constant 0 : index
    %14 = vector.load %arg15[%13, %c0_7] : memref<8x128xbf16, #tpu.memory_space<vmem>>, vector<8x128xbf16>
    %c0_8 = arith.constant 0 : index
    %c0_9 = arith.constant 0 : index
    %15 = vector.load %arg6[%c0_8, %c0_9] : memref<128x128xbf16, #tpu.memory_space<vmem>>, vector<128x128xbf16>
    %cst = arith.constant dense<0.000000e+00> : vector<8x128xf32>
    %16 = tpu.matmul %14, %15, %cst {dimension_numbers = #tpu.dot_dimension_numbers<[1], [0], [0], [1], [0, 0, 1, 1], [], []>} : vector<8x128xbf16>, vector<128x128xbf16>, vector<8x128xf32> -> vector<8x128xf32>
    %c0_10 = arith.constant 0 : index
    %c0_11 = arith.constant 0 : index
    %17 = vector.load %arg7[%c0_10, %c0_11] : memref<1x128xf32, #tpu.memory_space<vmem>>, vector<1x128xf32>
    %18 = vector.broadcast %17 : vector<1x128xf32> to vector<8x128xf32>
    %19 = arith.addf %16, %18 : vector<8x128xf32>
    %20 = arith.truncf %19 : vector<8x128xf32> to vector<8x128xbf16>
    %21 = tpu.iota {dimensions = array<i32: 1>} : vector<8x8xi32>
    %22 = vector.broadcast %1 : i32 to vector<8x8xi32>
    %23 = arith.cmpi slt, %21, %22 : vector<8x8xi32>
    %c8_i32_12 = arith.constant 8 : i32
    %24 = arith.muli %arg1, %c8_i32_12 : i32
    %25 = tpu.iota {dimensions = array<i32: 0>} : vector<8x8xi32>
    %26 = vector.broadcast %24 : i32 to vector<8x8xi32>
    %27 = arith.addi %26, %25 : vector<8x8xi32>
    %28 = arith.cmpi sle, %21, %27 : vector<8x8xi32>
    %29 = arith.andi %23, %28 : vector<8x8xi1>
    %c0_13 = arith.constant 0 : index
    %c0_14 = arith.constant 0 : index
    %30 = vector.load %arg16[%c0_13, %c0_14] : memref<8x128xbf16, #tpu.memory_space<vmem>>, vector<8x128xbf16>
    %c0_15 = arith.constant 0 : index
    %c0_16 = arith.constant 0 : index
    %31 = vector.load %arg17[%c0_15, %c0_16] : memref<8x128xbf16, #tpu.memory_space<vmem>>, vector<8x128xbf16>
    %32 = vector.extract_strided_slice %20 {offsets = [0, 0], sizes = [8, 32], strides = [1, 1]} : vector<8x128xbf16> to vector<8x32xbf16>
    %33 = vector.extract_strided_slice %30 {offsets = [0, 0], sizes = [8, 32], strides = [1, 1]} : vector<8x128xbf16> to vector<8x32xbf16>
    "tpu.trace_start"() <{level = 10 : i32, message = "qd,kd->qk"}> : () -> ()
    %cst_17 = arith.constant dense<0.000000e+00> : vector<8x8xf32>
    %34 = tpu.matmul %32, %33, %cst_17 {dimension_numbers = #tpu.dot_dimension_numbers<[1], [1], [0], [0], [0, 0, 1, 0], [], []>} : vector<8x32xbf16>, vector<8x32xbf16>, vector<8x8xf32> -> vector<8x8xf32>
    %cst_18 = arith.constant -1.000000e+09 : f32
    "tpu.trace_stop"() : () -> ()
    %35 = vector.broadcast %cst_18 : f32 to vector<8x8xf32>
    %36 = arith.select %29, %34, %35 : vector<8x8xi1>, vector<8x8xf32>
    %cst_19 = arith.constant dense<0xFF800000> : vector<8xf32>
    %37 = vector.multi_reduction <maximumf>, %36, %cst_19 [1] : vector<8x8xf32> to vector<8xf32>
    %38 = vector.shape_cast %37 : vector<8xf32> to vector<8x1xf32>
    %39 = vector.broadcast %38 : vector<8x1xf32> to vector<8x8xf32>
    %40 = arith.subf %36, %39 : vector<8x8xf32>
    %41 = math.exp %40 : vector<8x8xf32>
    %cst_20 = arith.constant dense<0.000000e+00> : vector<8xf32>
    %42 = vector.multi_reduction <add>, %41, %cst_20 [1] : vector<8x8xf32> to vector<8xf32>
    %43 = vector.shape_cast %42 : vector<8xf32> to vector<8x1xf32>
    %44 = tpu.reciprocal %43 {approx = true} : vector<8x1xf32> -> vector<8x1xf32>
    %45 = vector.broadcast %44 : vector<8x1xf32> to vector<8x8xf32>
    %46 = arith.mulf %41, %45 : vector<8x8xf32>
    %47 = arith.truncf %46 : vector<8x8xf32> to vector<8x8xbf16>
    %48 = vector.extract_strided_slice %31 {offsets = [0, 0], sizes = [8, 32], strides = [1, 1]} : vector<8x128xbf16> to vector<8x32xbf16>
    %cst_21 = arith.constant dense<0.000000e+00> : vector<8x32xf32>
    %49 = tpu.matmul %47, %48, %cst_21 {dimension_numbers = #tpu.dot_dimension_numbers<[1], [0], [0], [1], [0, 0, 1, 1], [], []>} : vector<8x8xbf16>, vector<8x32xbf16>, vector<8x32xf32> -> vector<8x32xf32>
    %c0_22 = arith.constant 0 : index
    %c0_23 = arith.constant 0 : index
    %50 = vector.load %arg18[%c0_22, %c0_23] : memref<8x128xf32, #tpu.memory_space<vmem>>, vector<8x32xf32>
    tpu.vector_store %arg18[%c0_22, %c0_23], %49 {strides = array<i32>} : memref<8x128xf32, #tpu.memory_space<vmem>>, vector<8x32xf32>,
    %51 = vector.extract_strided_slice %20 {offsets = [0, 32], sizes = [8, 32], strides = [1, 1]} : vector<8x128xbf16> to vector<8x32xbf16>
    %52 = vector.extract_strided_slice %30 {offsets = [0, 32], sizes = [8, 32], strides = [1, 1]} : vector<8x128xbf16> to vector<8x32xbf16>
    "tpu.trace_start"() <{level = 10 : i32, message = "qd,kd->qk"}> : () -> ()
    %cst_24 = arith.constant dense<0.000000e+00> : vector<8x8xf32>
    %53 = tpu.matmul %51, %52, %cst_24 {dimension_numbers = #tpu.dot_dimension_numbers<[1], [1], [0], [0], [0, 0, 1, 0], [], []>} : vector<8x32xbf16>, vector<8x32xbf16>, vector<8x8xf32> -> vector<8x8xf32>
    %cst_25 = arith.constant -1.000000e+09 : f32
    "tpu.trace_stop"() : () -> ()
    %54 = vector.broadcast %cst_25 : f32 to vector<8x8xf32>
    %55 = arith.select %29, %53, %54 : vector<8x8xi1>, vector<8x8xf32>
    %cst_26 = arith.constant dense<0xFF800000> : vector<8xf32>
    %56 = vector.multi_reduction <maximumf>, %55, %cst_26 [1] : vector<8x8xf32> to vector<8xf32>
    %57 = vector.shape_cast %56 : vector<8xf32> to vector<8x1xf32>
    %58 = vector.broadcast %57 : vector<8x1xf32> to vector<8x8xf32>
    %59 = arith.subf %55, %58 : vector<8x8xf32>
    %60 = math.exp %59 : vector<8x8xf32>
    %cst_27 = arith.constant dense<0.000000e+00> : vector<8xf32>
    %61 = vector.multi_reduction <add>, %60, %cst_27 [1] : vector<8x8xf32> to vector<8xf32>
    %62 = vector.shape_cast %61 : vector<8xf32> to vector<8x1xf32>
    %63 = tpu.reciprocal %62 {approx = true} : vector<8x1xf32> -> vector<8x1xf32>
    %64 = vector.broadcast %63 : vector<8x1xf32> to vector<8x8xf32>
    %65 = arith.mulf %60, %64 : vector<8x8xf32>
    %66 = arith.truncf %65 : vector<8x8xf32> to vector<8x8xbf16>
    %67 = vector.extract_strided_slice %31 {offsets = [0, 32], sizes = [8, 32], strides = [1, 1]} : vector<8x128xbf16> to vector<8x32xbf16>
    %cst_28 = arith.constant dense<0.000000e+00> : vector<8x32xf32>
    %68 = tpu.matmul %66, %67, %cst_28 {dimension_numbers = #tpu.dot_dimension_numbers<[1], [0], [0], [1], [0, 0, 1, 1], [], []>} : vector<8x8xbf16>, vector<8x32xbf16>, vector<8x32xf32> -> vector<8x32xf32>
    %c0_29 = arith.constant 0 : index
    %c32 = arith.constant 32 : index
    %69 = vector.load %arg18[%c0_29, %c32] : memref<8x128xf32, #tpu.memory_space<vmem>>, vector<8x32xf32>
    tpu.vector_store %arg18[%c0_29, %c32], %68 {strides = array<i32>} : memref<8x128xf32, #tpu.memory_space<vmem>>, vector<8x32xf32>,
    %70 = vector.extract_strided_slice %20 {offsets = [0, 64], sizes = [8, 32], strides = [1, 1]} : vector<8x128xbf16> to vector<8x32xbf16>
    %71 = vector.extract_strided_slice %30 {offsets = [0, 64], sizes = [8, 32], strides = [1, 1]} : vector<8x128xbf16> to vector<8x32xbf16>
    "tpu.trace_start"() <{level = 10 : i32, message = "qd,kd->qk"}> : () -> ()
    %cst_30 = arith.constant dense<0.000000e+00> : vector<8x8xf32>
    %72 = tpu.matmul %70, %71, %cst_30 {dimension_numbers = #tpu.dot_dimension_numbers<[1], [1], [0], [0], [0, 0, 1, 0], [], []>} : vector<8x32xbf16>, vector<8x32xbf16>, vector<8x8xf32> -> vector<8x8xf32>
    %cst_31 = arith.constant -1.000000e+09 : f32
    "tpu.trace_stop"() : () -> ()
    %73 = vector.broadcast %cst_31 : f32 to vector<8x8xf32>
    %74 = arith.select %29, %72, %73 : vector<8x8xi1>, vector<8x8xf32>
    %cst_32 = arith.constant dense<0xFF800000> : vector<8xf32>
    %75 = vector.multi_reduction <maximumf>, %74, %cst_32 [1] : vector<8x8xf32> to vector<8xf32>
    %76 = vector.shape_cast %75 : vector<8xf32> to vector<8x1xf32>
    %77 = vector.broadcast %76 : vector<8x1xf32> to vector<8x8xf32>
    %78 = arith.subf %74, %77 : vector<8x8xf32>
    %79 = math.exp %78 : vector<8x8xf32>
    %cst_33 = arith.constant dense<0.000000e+00> : vector<8xf32>
    %80 = vector.multi_reduction <add>, %79, %cst_33 [1] : vector<8x8xf32> to vector<8xf32>
    %81 = vector.shape_cast %80 : vector<8xf32> to vector<8x1xf32>
    %82 = tpu.reciprocal %81 {approx = true} : vector<8x1xf32> -> vector<8x1xf32>
    %83 = vector.broadcast %82 : vector<8x1xf32> to vector<8x8xf32>
    %84 = arith.mulf %79, %83 : vector<8x8xf32>
    %85 = arith.truncf %84 : vector<8x8xf32> to vector<8x8xbf16>
    %86 = vector.extract_strided_slice %31 {offsets = [0, 64], sizes = [8, 32], strides = [1, 1]} : vector<8x128xbf16> to vector<8x32xbf16>
    %cst_34 = arith.constant dense<0.000000e+00> : vector<8x32xf32>
    %87 = tpu.matmul %85, %86, %cst_34 {dimension_numbers = #tpu.dot_dimension_numbers<[1], [0], [0], [1], [0, 0, 1, 1], [], []>} : vector<8x8xbf16>, vector<8x32xbf16>, vector<8x32xf32> -> vector<8x32xf32>
    %c0_35 = arith.constant 0 : index
    %c64 = arith.constant 64 : index
    %88 = vector.load %arg18[%c0_35, %c64] : memref<8x128xf32, #tpu.memory_space<vmem>>, vector<8x32xf32>
    tpu.vector_store %arg18[%c0_35, %c64], %87 {strides = array<i32>} : memref<8x128xf32, #tpu.memory_space<vmem>>, vector<8x32xf32>,
    %89 = vector.extract_strided_slice %20 {offsets = [0, 96], sizes = [8, 32], strides = [1, 1]} : vector<8x128xbf16> to vector<8x32xbf16>
    %90 = vector.extract_strided_slice %30 {offsets = [0, 96], sizes = [8, 32], strides = [1, 1]} : vector<8x128xbf16> to vector<8x32xbf16>
    "tpu.trace_start"() <{level = 10 : i32, message = "qd,kd->qk"}> : () -> ()
    %cst_36 = arith.constant dense<0.000000e+00> : vector<8x8xf32>
    %91 = tpu.matmul %89, %90, %cst_36 {dimension_numbers = #tpu.dot_dimension_numbers<[1], [1], [0], [0], [0, 0, 1, 0], [], []>} : vector<8x32xbf16>, vector<8x32xbf16>, vector<8x8xf32> -> vector<8x8xf32>
    %cst_37 = arith.constant -1.000000e+09 : f32
    "tpu.trace_stop"() : () -> ()
    %92 = vector.broadcast %cst_37 : f32 to vector<8x8xf32>
    %93 = arith.select %29, %91, %92 : vector<8x8xi1>, vector<8x8xf32>
    %cst_38 = arith.constant dense<0xFF800000> : vector<8xf32>
    %94 = vector.multi_reduction <maximumf>, %93, %cst_38 [1] : vector<8x8xf32> to vector<8xf32>
    %95 = vector.shape_cast %94 : vector<8xf32> to vector<8x1xf32>
    %96 = vector.broadcast %95 : vector<8x1xf32> to vector<8x8xf32>
    %97 = arith.subf %93, %96 : vector<8x8xf32>
    %98 = math.exp %97 : vector<8x8xf32>
    %cst_39 = arith.constant dense<0.000000e+00> : vector<8xf32>
    %99 = vector.multi_reduction <add>, %98, %cst_39 [1] : vector<8x8xf32> to vector<8xf32>
    %100 = vector.shape_cast %99 : vector<8xf32> to vector<8x1xf32>
    %101 = tpu.reciprocal %100 {approx = true} : vector<8x1xf32> -> vector<8x1xf32>
    %102 = vector.broadcast %101 : vector<8x1xf32> to vector<8x8xf32>
    %103 = arith.mulf %98, %102 : vector<8x8xf32>
    %104 = arith.truncf %103 : vector<8x8xf32> to vector<8x8xbf16>
    %105 = vector.extract_strided_slice %31 {offsets = [0, 96], sizes = [8, 32], strides = [1, 1]} : vector<8x128xbf16> to vector<8x32xbf16>
    %cst_40 = arith.constant dense<0.000000e+00> : vector<8x32xf32>
    %106 = tpu.matmul %104, %105, %cst_40 {dimension_numbers = #tpu.dot_dimension_numbers<[1], [0], [0], [1], [0, 0, 1, 1], [], []>} : vector<8x8xbf16>, vector<8x32xbf16>, vector<8x32xf32> -> vector<8x32xf32>
    %c0_41 = arith.constant 0 : index
    %c96 = arith.constant 96 : index
    %107 = vector.load %arg18[%c0_41, %c96] : memref<8x128xf32, #tpu.memory_space<vmem>>, vector<8x32xf32>
    tpu.vector_store %arg18[%c0_41, %c96], %106 {strides = array<i32>} : memref<8x128xf32, #tpu.memory_space<vmem>>, vector<8x32xf32>,
    %c0_42 = arith.constant 0 : index
    %c0_43 = arith.constant 0 : index
    %108 = vector.load %arg18[%c0_42, %c0_43] : memref<8x128xf32, #tpu.memory_space<vmem>>, vector<8x128xf32>
    %109 = arith.truncf %108 : vector<8x128xf32> to vector<8x128xbf16>
    %c0_44 = arith.constant 0 : index
    %c0_45 = arith.constant 0 : index
    %110 = vector.load %arg12[%c0_44, %c0_45] : memref<128x128xbf16, #tpu.memory_space<vmem>>, vector<128x128xbf16>
    %cst_46 = arith.constant dense<0.000000e+00> : vector<8x128xf32>
    %111 = tpu.matmul %109, %110, %cst_46 {dimension_numbers = #tpu.dot_dimension_numbers<[1], [0], [0], [1], [0, 0, 1, 1], [], []>} : vector<8x128xbf16>, vector<128x128xbf16>, vector<8x128xf32> -> vector<8x128xf32>
    %c0_47 = arith.constant 0 : index
    %c0_48 = arith.constant 0 : index
    %112 = vector.load %arg13[%c0_47, %c0_48] : memref<1x128xf32, #tpu.memory_space<vmem>>, vector<1x128xf32>
    %113 = vector.broadcast %112 : vector<1x128xf32> to vector<8x128xf32>
    %114 = arith.addf %111, %113 : vector<8x128xf32>
    %115 = arith.addf %114, %11 : vector<8x128xf32>
    %116 = arith.truncf %115 : vector<8x128xf32> to vector<8x128xbf16>
    %c0_49 = arith.constant 0 : index
    %c0_50 = arith.constant 0 : index
    %c0_51 = arith.constant 0 : index
    %117 = vector.load %arg14[%c0_49, %c0_50, %c0_51] : memref<1x8x128xbf16, #tpu.memory_space<vmem>>, vector<1x8x128xbf16>
    %118 = vector.shape_cast %117 : vector<1x8x128xbf16> to vector<8x128xbf16>
    %119 = vector.shape_cast %116 : vector<8x128xbf16> to vector<1x8x128xbf16>
    tpu.vector_store %arg14[%c0_49, %c0_50, %c0_51], %119 {strides = array<i32>} : memref<1x8x128xbf16, #tpu.memory_space<vmem>>, vector<1x8x128xbf16>,
    return
  }
  func.func @transform_0(%arg0: i32, %arg1: i32, %arg2: memref<2xi32, #tpu.memory_space<smem>>) -> (i32, i32, i32) {
    %c0_i32 = arith.constant 0 : i32
    %c0_i32_0 = arith.constant 0 : i32
    %c0_i32_1 = arith.constant 0 : i32
    return %arg0, %c0_i32, %c0_i32_0 : i32, i32, i32
  }
  func.func @transform_1(%arg0: i32, %arg1: i32, %arg2: memref<2xi32, #tpu.memory_space<smem>>) -> (i32, i32) {
    %c0_i32 = arith.constant 0 : i32
    %c0_i32_0 = arith.constant 0 : i32
    %c0_i32_1 = arith.constant 0 : i32
    return %c0_i32, %c0_i32_0 : i32, i32
  }
  func.func @transform_2(%arg0: i32, %arg1: i32, %arg2: memref<2xi32, #tpu.memory_space<smem>>) -> (i32, i32) {
    %c0_i32 = arith.constant 0 : i32
    %c0_i32_0 = arith.constant 0 : i32
    %c0_i32_1 = arith.constant 0 : i32
    return %c0_i32, %c0_i32_0 : i32, i32
  }
  func.func @transform_3(%arg0: i32, %arg1: i32, %arg2: memref<2xi32, #tpu.memory_space<smem>>) -> (i32, i32) {
    %c0_i32 = arith.constant 0 : i32
    %c0_i32_0 = arith.constant 0 : i32
    %c0_i32_1 = arith.constant 0 : i32
    return %c0_i32, %c0_i32_0 : i32, i32
  }
  func.func @transform_4(%arg0: i32, %arg1: i32, %arg2: memref<2xi32, #tpu.memory_space<smem>>) -> (i32, i32) {
    %c0_i32 = arith.constant 0 : i32
    %c0_i32_0 = arith.constant 0 : i32
    %c0_i32_1 = arith.constant 0 : i32
    return %c0_i32, %c0_i32_0 : i32, i32
  }
  func.func @transform_5(%arg0: i32, %arg1: i32, %arg2: memref<2xi32, #tpu.memory_space<smem>>) -> (i32, i32) {
    %c0_i32 = arith.constant 0 : i32
    %c0_i32_0 = arith.constant 0 : i32
    %c0_i32_1 = arith.constant 0 : i32
    return %c0_i32, %c0_i32_0 : i32, i32
  }
  func.func @transform_6(%arg0: i32, %arg1: i32, %arg2: memref<2xi32, #tpu.memory_space<smem>>) -> (i32, i32) {
    %c0_i32 = arith.constant 0 : i32
    %c0_i32_0 = arith.constant 0 : i32
    %c0_i32_1 = arith.constant 0 : i32
    return %c0_i32, %c0_i32_0 : i32, i32
  }
  func.func @transform_7(%arg0: i32, %arg1: i32, %arg2: memref<2xi32, #tpu.memory_space<smem>>) -> (i32, i32) {
    %c0_i32 = arith.constant 0 : i32
    %c0_i32_0 = arith.constant 0 : i32
    %c0_i32_1 = arith.constant 0 : i32
    return %c0_i32, %c0_i32_0 : i32, i32
  }
  func.func @transform_8(%arg0: i32, %arg1: i32, %arg2: memref<2xi32, #tpu.memory_space<smem>>) -> (i32, i32) {
    %c0_i32 = arith.constant 0 : i32
    %c0_i32_0 = arith.constant 0 : i32
    %c0_i32_1 = arith.constant 0 : i32
    return %c0_i32, %c0_i32_0 : i32, i32
  }
  func.func @transform_9(%arg0: i32, %arg1: i32, %arg2: memref<2xi32, #tpu.memory_space<smem>>) -> (i32, i32) {
    %c0_i32 = arith.constant 0 : i32
    %c0_i32_0 = arith.constant 0 : i32
    %c0_i32_1 = arith.constant 0 : i32
    return %c0_i32, %c0_i32_0 : i32, i32
  }
  func.func @transform_10(%arg0: i32, %arg1: i32, %arg2: memref<2xi32, #tpu.memory_space<smem>>) -> (i32, i32) {
    %c0_i32 = arith.constant 0 : i32
    %c0_i32_0 = arith.constant 0 : i32
    %c0_i32_1 = arith.constant 0 : i32
    return %c0_i32, %c0_i32_0 : i32, i32
  }
  func.func @transform_11(%arg0: i32, %arg1: i32, %arg2: memref<2xi32, #tpu.memory_space<smem>>) -> (i32, i32, i32) {
    %c0_i32 = arith.constant 0 : i32
    %c0_i32_0 = arith.constant 0 : i32
    return %arg0, %arg1, %c0_i32 : i32, i32, i32
  }
}

module attributes {stable_mosaic.version = 11 : i64} {
  func.func @_cross_attn_kernel(%arg0: i32, %arg1: i32, %arg2: memref<2xi32, #tpu.memory_space<smem>>, %arg3: memref<1x8x128xbf16, #tpu.memory_space<vmem>>, %arg4: memref<1x8x128xbf16, #tpu.memory_space<vmem>>, %arg5: memref<1x128xf32, #tpu.memory_space<vmem>>, %arg6: memref<1x128xf32, #tpu.memory_space<vmem>>, %arg7: memref<128x128xbf16, #tpu.memory_space<vmem>>, %arg8: memref<1x128xf32, #tpu.memory_space<vmem>>, %arg9: memref<128x128xbf16, #tpu.memory_space<vmem>>, %arg10: memref<1x128xf32, #tpu.memory_space<vmem>>, %arg11: memref<128x128xbf16, #tpu.memory_space<vmem>>, %arg12: memref<1x128xf32, #tpu.memory_space<vmem>>, %arg13: memref<128x128xbf16, #tpu.memory_space<vmem>>, %arg14: memref<1x128xf32, #tpu.memory_space<vmem>>, %arg15: memref<1x8x128xbf16, #tpu.memory_space<vmem>>, %arg16: memref<8x128xbf16, #tpu.memory_space<vmem>>, %arg17: memref<8x128xbf16, #tpu.memory_space<vmem>>, %arg18: memref<8x128xf32, #tpu.memory_space<vmem>>) attributes {dimension_semantics = [#tpu.dimension_semantics<parallel>, #tpu.dimension_semantics<arbitrary>], iteration_bounds = array<i64: 2, 1>, scalar_prefetch = 1 : i64, scratch_operands = 3 : i64, tpu.core_type = #tpu.core_type<tc>, window_params = [{transform_indices = @transform_0, window_bounds = array<i64: 1, 8, 128>}, {transform_indices = @transform_1, window_bounds = array<i64: 1, 8, 128>}, {pipeline_mode = #tpu.pipeline_mode<synchronous>, transform_indices = @transform_2, window_bounds = array<i64: 1, 128>}, {pipeline_mode = #tpu.pipeline_mode<synchronous>, transform_indices = @transform_3, window_bounds = array<i64: 1, 128>}, {pipeline_mode = #tpu.pipeline_mode<synchronous>, transform_indices = @transform_4, window_bounds = array<i64: 128, 128>}, {pipeline_mode = #tpu.pipeline_mode<synchronous>, transform_indices = @transform_5, window_bounds = array<i64: 1, 128>}, {pipeline_mode = #tpu.pipeline_mode<synchronous>, transform_indices = @transform_6, window_bounds = array<i64: 128, 128>}, {pipeline_mode = #tpu.pipeline_mode<synchronous>, transform_indices = @transform_7, window_bounds = array<i64: 1, 128>}, {pipeline_mode = #tpu.pipeline_mode<synchronous>, transform_indices = @transform_8, window_bounds = array<i64: 128, 128>}, {pipeline_mode = #tpu.pipeline_mode<synchronous>, transform_indices = @transform_9, window_bounds = array<i64: 1, 128>}, {pipeline_mode = #tpu.pipeline_mode<synchronous>, transform_indices = @transform_10, window_bounds = array<i64: 128, 128>}, {pipeline_mode = #tpu.pipeline_mode<synchronous>, transform_indices = @transform_11, window_bounds = array<i64: 1, 128>}, {transform_indices = @transform_12, window_bounds = array<i64: 1, 8, 128>}]} {
    %0 = arith.index_cast %arg0 : i32 to index
    %1 = memref.load %arg2[%0] : memref<2xi32, #tpu.memory_space<smem>>
    %c0_i32 = arith.constant 0 : i32
    %2 = arith.cmpi eq, %arg1, %c0_i32 : i32
    %3 = arith.extui %2 : i1 to i32
    %c0_i32_0 = arith.constant 0 : i32
    %4 = arith.cmpi ne, %3, %c0_i32_0 : i32
    scf.if %4 {
      %c0_55 = arith.constant 0 : index
      %c0_56 = arith.constant 0 : index
      %c0_57 = arith.constant 0 : index
      %133 = vector.load %arg4[%c0_55, %c0_56, %c0_57] : memref<1x8x128xbf16, #tpu.memory_space<vmem>>, vector<1x8x128xbf16>
      %134 = vector.shape_cast %133 : vector<1x8x128xbf16> to vector<8x128xbf16>
      %c0_58 = arith.constant 0 : index
      %c0_59 = arith.constant 0 : index
      %135 = vector.load %arg9[%c0_58, %c0_59] : memref<128x128xbf16, #tpu.memory_space<vmem>>, vector<128x128xbf16>
      %cst_60 = arith.constant dense<0.000000e+00> : vector<8x128xf32>
      %136 = tpu.matmul %134, %135, %cst_60 {dimension_numbers = #tpu.dot_dimension_numbers<[1], [0], [0], [1], [0, 0, 1, 1], [], []>} : vector<8x128xbf16>, vector<128x128xbf16>, vector<8x128xf32> -> vector<8x128xf32>
      %c0_61 = arith.constant 0 : index
      %c0_62 = arith.constant 0 : index
      %137 = vector.load %arg10[%c0_61, %c0_62] : memref<1x128xf32, #tpu.memory_space<vmem>>, vector<1x128xf32>
      %138 = vector.broadcast %137 : vector<1x128xf32> to vector<8x128xf32>
      %139 = arith.addf %136, %138 : vector<8x128xf32>
      %140 = arith.truncf %139 : vector<8x128xf32> to vector<8x128xbf16>
      %c0_63 = arith.constant 0 : index
      %c0_64 = arith.constant 0 : index
      %141 = vector.load %arg16[%c0_63, %c0_64] : memref<8x128xbf16, #tpu.memory_space<vmem>>, vector<8x128xbf16>
      tpu.vector_store %arg16[%c0_63, %c0_64], %140 {strides = array<i32>} : memref<8x128xbf16, #tpu.memory_space<vmem>>, vector<8x128xbf16>,
      %c0_65 = arith.constant 0 : index
      %c0_66 = arith.constant 0 : index
      %142 = vector.load %arg11[%c0_65, %c0_66] : memref<128x128xbf16, #tpu.memory_space<vmem>>, vector<128x128xbf16>
      %cst_67 = arith.constant dense<0.000000e+00> : vector<8x128xf32>
      %143 = tpu.matmul %134, %142, %cst_67 {dimension_numbers = #tpu.dot_dimension_numbers<[1], [0], [0], [1], [0, 0, 1, 1], [], []>} : vector<8x128xbf16>, vector<128x128xbf16>, vector<8x128xf32> -> vector<8x128xf32>
      %c0_68 = arith.constant 0 : index
      %c0_69 = arith.constant 0 : index
      %144 = vector.load %arg12[%c0_68, %c0_69] : memref<1x128xf32, #tpu.memory_space<vmem>>, vector<1x128xf32>
      %145 = vector.broadcast %144 : vector<1x128xf32> to vector<8x128xf32>
      %146 = arith.addf %143, %145 : vector<8x128xf32>
      %147 = arith.truncf %146 : vector<8x128xf32> to vector<8x128xbf16>
      %c0_70 = arith.constant 0 : index
      %c0_71 = arith.constant 0 : index
      %148 = vector.load %arg17[%c0_70, %c0_71] : memref<8x128xbf16, #tpu.memory_space<vmem>>, vector<8x128xbf16>
      tpu.vector_store %arg17[%c0_70, %c0_71], %147 {strides = array<i32>} : memref<8x128xbf16, #tpu.memory_space<vmem>>, vector<8x128xbf16>,
    } else {
    }
    %c0 = arith.constant 0 : index
    %c0_1 = arith.constant 0 : index
    %c0_2 = arith.constant 0 : index
    %5 = vector.load %arg3[%c0, %c0_1, %c0_2] : memref<1x8x128xbf16, #tpu.memory_space<vmem>>, vector<1x8x128xbf16>
    %6 = vector.shape_cast %5 : vector<1x8x128xbf16> to vector<8x128xbf16>
    %7 = arith.extf %6 : vector<8x128xbf16> to vector<8x128xf32>
    %c0_3 = arith.constant 0 : index
    %c0_4 = arith.constant 0 : index
    %8 = vector.load %arg5[%c0_3, %c0_4] : memref<1x128xf32, #tpu.memory_space<vmem>>, vector<1x128xf32>
    %c0_5 = arith.constant 0 : index
    %c0_6 = arith.constant 0 : index
    %9 = vector.load %arg6[%c0_5, %c0_6] : memref<1x128xf32, #tpu.memory_space<vmem>>, vector<1x128xf32>
    %cst = arith.constant dense<0.000000e+00> : vector<8xf32>
    %10 = vector.multi_reduction <add>, %7, %cst [1] : vector<8x128xf32> to vector<8xf32>
    %11 = vector.shape_cast %10 : vector<8xf32> to vector<8x1xf32>
    %cst_7 = arith.constant 1.280000e+02 : f32
    %12 = vector.broadcast %cst_7 : f32 to vector<8x1xf32>
    %13 = arith.divf %11, %12 : vector<8x1xf32>
    %14 = vector.broadcast %13 : vector<8x1xf32> to vector<8x128xf32>
    %15 = arith.subf %7, %14 : vector<8x128xf32>
    %16 = arith.mulf %15, %15 : vector<8x128xf32>
    %cst_8 = arith.constant dense<0.000000e+00> : vector<8xf32>
    %17 = vector.multi_reduction <add>, %16, %cst_8 [1] : vector<8x128xf32> to vector<8xf32>
    %18 = vector.shape_cast %17 : vector<8xf32> to vector<8x1xf32>
    %cst_9 = arith.constant 0.00787401571 : f32
    %19 = vector.broadcast %cst_9 : f32 to vector<8x1xf32>
    %20 = arith.mulf %18, %19 : vector<8x1xf32>
    %21 = math.sqrt %20 : vector<8x1xf32>
    %cst_10 = arith.constant 9.99999997E-7 : f32
    %22 = vector.broadcast %cst_10 : f32 to vector<8x1xf32>
    %23 = arith.addf %21, %22 : vector<8x1xf32>
    %24 = tpu.reciprocal %23 : vector<8x1xf32> -> vector<8x1xf32>
    %25 = vector.broadcast %13 : vector<8x1xf32> to vector<8x128xf32>
    %26 = arith.subf %7, %25 : vector<8x128xf32>
    %27 = vector.broadcast %24 : vector<8x1xf32> to vector<8x128xf32>
    %28 = arith.mulf %26, %27 : vector<8x128xf32>
    %29 = vector.broadcast %8 : vector<1x128xf32> to vector<8x128xf32>
    %30 = arith.mulf %29, %28 : vector<8x128xf32>
    %31 = vector.broadcast %9 : vector<1x128xf32> to vector<8x128xf32>
    %32 = arith.addf %30, %31 : vector<8x128xf32>
    %33 = arith.truncf %32 : vector<8x128xf32> to vector<8x128xbf16>
    %c0_11 = arith.constant 0 : index
    %c0_12 = arith.constant 0 : index
    %34 = vector.load %arg7[%c0_11, %c0_12] : memref<128x128xbf16, #tpu.memory_space<vmem>>, vector<128x128xbf16>
    %cst_13 = arith.constant dense<0.000000e+00> : vector<8x128xf32>
    %35 = tpu.matmul %33, %34, %cst_13 {dimension_numbers = #tpu.dot_dimension_numbers<[1], [0], [0], [1], [0, 0, 1, 1], [], []>} : vector<8x128xbf16>, vector<128x128xbf16>, vector<8x128xf32> -> vector<8x128xf32>
    %c0_14 = arith.constant 0 : index
    %c0_15 = arith.constant 0 : index
    %36 = vector.load %arg8[%c0_14, %c0_15] : memref<1x128xf32, #tpu.memory_space<vmem>>, vector<1x128xf32>
    %37 = vector.broadcast %36 : vector<1x128xf32> to vector<8x128xf32>
    %38 = arith.addf %35, %37 : vector<8x128xf32>
    %39 = arith.truncf %38 : vector<8x128xf32> to vector<8x128xbf16>
    %40 = tpu.iota {dimensions = array<i32: 1>} : vector<8x8xi32>
    %41 = vector.broadcast %1 : i32 to vector<8x8xi32>
    %42 = arith.cmpi slt, %40, %41 : vector<8x8xi32>
    %c0_16 = arith.constant 0 : index
    %c0_17 = arith.constant 0 : index
    %43 = vector.load %arg16[%c0_16, %c0_17] : memref<8x128xbf16, #tpu.memory_space<vmem>>, vector<8x128xbf16>
    %c0_18 = arith.constant 0 : index
    %c0_19 = arith.constant 0 : index
    %44 = vector.load %arg17[%c0_18, %c0_19] : memref<8x128xbf16, #tpu.memory_space<vmem>>, vector<8x128xbf16>
    %45 = vector.extract_strided_slice %39 {offsets = [0, 0], sizes = [8, 32], strides = [1, 1]} : vector<8x128xbf16> to vector<8x32xbf16>
    %46 = vector.extract_strided_slice %43 {offsets = [0, 0], sizes = [8, 32], strides = [1, 1]} : vector<8x128xbf16> to vector<8x32xbf16>
    "tpu.trace_start"() <{level = 10 : i32, message = "qd,kd->qk"}> : () -> ()
    %cst_20 = arith.constant dense<0.000000e+00> : vector<8x8xf32>
    %47 = tpu.matmul %45, %46, %cst_20 {dimension_numbers = #tpu.dot_dimension_numbers<[1], [1], [0], [0], [0, 0, 1, 0], [], []>} : vector<8x32xbf16>, vector<8x32xbf16>, vector<8x8xf32> -> vector<8x8xf32>
    %cst_21 = arith.constant -1.000000e+09 : f32
    "tpu.trace_stop"() : () -> ()
    %48 = vector.broadcast %cst_21 : f32 to vector<8x8xf32>
    %49 = arith.select %42, %47, %48 : vector<8x8xi1>, vector<8x8xf32>
    %cst_22 = arith.constant dense<0xFF800000> : vector<8xf32>
    %50 = vector.multi_reduction <maximumf>, %49, %cst_22 [1] : vector<8x8xf32> to vector<8xf32>
    %51 = vector.shape_cast %50 : vector<8xf32> to vector<8x1xf32>
    %52 = vector.broadcast %51 : vector<8x1xf32> to vector<8x8xf32>
    %53 = arith.subf %49, %52 : vector<8x8xf32>
    %54 = math.exp %53 : vector<8x8xf32>
    %cst_23 = arith.constant dense<0.000000e+00> : vector<8xf32>
    %55 = vector.multi_reduction <add>, %54, %cst_23 [1] : vector<8x8xf32> to vector<8xf32>
    %56 = vector.shape_cast %55 : vector<8xf32> to vector<8x1xf32>
    %57 = tpu.reciprocal %56 {approx = true} : vector<8x1xf32> -> vector<8x1xf32>
    %58 = vector.broadcast %57 : vector<8x1xf32> to vector<8x8xf32>
    %59 = arith.mulf %54, %58 : vector<8x8xf32>
    %60 = arith.truncf %59 : vector<8x8xf32> to vector<8x8xbf16>
    %61 = vector.extract_strided_slice %44 {offsets = [0, 0], sizes = [8, 32], strides = [1, 1]} : vector<8x128xbf16> to vector<8x32xbf16>
    %cst_24 = arith.constant dense<0.000000e+00> : vector<8x32xf32>
    %62 = tpu.matmul %60, %61, %cst_24 {dimension_numbers = #tpu.dot_dimension_numbers<[1], [0], [0], [1], [0, 0, 1, 1], [], []>} : vector<8x8xbf16>, vector<8x32xbf16>, vector<8x32xf32> -> vector<8x32xf32>
    %c0_25 = arith.constant 0 : index
    %c0_26 = arith.constant 0 : index
    %63 = vector.load %arg18[%c0_25, %c0_26] : memref<8x128xf32, #tpu.memory_space<vmem>>, vector<8x32xf32>
    tpu.vector_store %arg18[%c0_25, %c0_26], %62 {strides = array<i32>} : memref<8x128xf32, #tpu.memory_space<vmem>>, vector<8x32xf32>,
    %64 = vector.extract_strided_slice %39 {offsets = [0, 32], sizes = [8, 32], strides = [1, 1]} : vector<8x128xbf16> to vector<8x32xbf16>
    %65 = vector.extract_strided_slice %43 {offsets = [0, 32], sizes = [8, 32], strides = [1, 1]} : vector<8x128xbf16> to vector<8x32xbf16>
    "tpu.trace_start"() <{level = 10 : i32, message = "qd,kd->qk"}> : () -> ()
    %cst_27 = arith.constant dense<0.000000e+00> : vector<8x8xf32>
    %66 = tpu.matmul %64, %65, %cst_27 {dimension_numbers = #tpu.dot_dimension_numbers<[1], [1], [0], [0], [0, 0, 1, 0], [], []>} : vector<8x32xbf16>, vector<8x32xbf16>, vector<8x8xf32> -> vector<8x8xf32>
    %cst_28 = arith.constant -1.000000e+09 : f32
    "tpu.trace_stop"() : () -> ()
    %67 = vector.broadcast %cst_28 : f32 to vector<8x8xf32>
    %68 = arith.select %42, %66, %67 : vector<8x8xi1>, vector<8x8xf32>
    %cst_29 = arith.constant dense<0xFF800000> : vector<8xf32>
    %69 = vector.multi_reduction <maximumf>, %68, %cst_29 [1] : vector<8x8xf32> to vector<8xf32>
    %70 = vector.shape_cast %69 : vector<8xf32> to vector<8x1xf32>
    %71 = vector.broadcast %70 : vector<8x1xf32> to vector<8x8xf32>
    %72 = arith.subf %68, %71 : vector<8x8xf32>
    %73 = math.exp %72 : vector<8x8xf32>
    %cst_30 = arith.constant dense<0.000000e+00> : vector<8xf32>
    %74 = vector.multi_reduction <add>, %73, %cst_30 [1] : vector<8x8xf32> to vector<8xf32>
    %75 = vector.shape_cast %74 : vector<8xf32> to vector<8x1xf32>
    %76 = tpu.reciprocal %75 {approx = true} : vector<8x1xf32> -> vector<8x1xf32>
    %77 = vector.broadcast %76 : vector<8x1xf32> to vector<8x8xf32>
    %78 = arith.mulf %73, %77 : vector<8x8xf32>
    %79 = arith.truncf %78 : vector<8x8xf32> to vector<8x8xbf16>
    %80 = vector.extract_strided_slice %44 {offsets = [0, 32], sizes = [8, 32], strides = [1, 1]} : vector<8x128xbf16> to vector<8x32xbf16>
    %cst_31 = arith.constant dense<0.000000e+00> : vector<8x32xf32>
    %81 = tpu.matmul %79, %80, %cst_31 {dimension_numbers = #tpu.dot_dimension_numbers<[1], [0], [0], [1], [0, 0, 1, 1], [], []>} : vector<8x8xbf16>, vector<8x32xbf16>, vector<8x32xf32> -> vector<8x32xf32>
    %c0_32 = arith.constant 0 : index
    %c32 = arith.constant 32 : index
    %82 = vector.load %arg18[%c0_32, %c32] : memref<8x128xf32, #tpu.memory_space<vmem>>, vector<8x32xf32>
    tpu.vector_store %arg18[%c0_32, %c32], %81 {strides = array<i32>} : memref<8x128xf32, #tpu.memory_space<vmem>>, vector<8x32xf32>,
    %83 = vector.extract_strided_slice %39 {offsets = [0, 64], sizes = [8, 32], strides = [1, 1]} : vector<8x128xbf16> to vector<8x32xbf16>
    %84 = vector.extract_strided_slice %43 {offsets = [0, 64], sizes = [8, 32], strides = [1, 1]} : vector<8x128xbf16> to vector<8x32xbf16>
    "tpu.trace_start"() <{level = 10 : i32, message = "qd,kd->qk"}> : () -> ()
    %cst_33 = arith.constant dense<0.000000e+00> : vector<8x8xf32>
    %85 = tpu.matmul %83, %84, %cst_33 {dimension_numbers = #tpu.dot_dimension_numbers<[1], [1], [0], [0], [0, 0, 1, 0], [], []>} : vector<8x32xbf16>, vector<8x32xbf16>, vector<8x8xf32> -> vector<8x8xf32>
    %cst_34 = arith.constant -1.000000e+09 : f32
    "tpu.trace_stop"() : () -> ()
    %86 = vector.broadcast %cst_34 : f32 to vector<8x8xf32>
    %87 = arith.select %42, %85, %86 : vector<8x8xi1>, vector<8x8xf32>
    %cst_35 = arith.constant dense<0xFF800000> : vector<8xf32>
    %88 = vector.multi_reduction <maximumf>, %87, %cst_35 [1] : vector<8x8xf32> to vector<8xf32>
    %89 = vector.shape_cast %88 : vector<8xf32> to vector<8x1xf32>
    %90 = vector.broadcast %89 : vector<8x1xf32> to vector<8x8xf32>
    %91 = arith.subf %87, %90 : vector<8x8xf32>
    %92 = math.exp %91 : vector<8x8xf32>
    %cst_36 = arith.constant dense<0.000000e+00> : vector<8xf32>
    %93 = vector.multi_reduction <add>, %92, %cst_36 [1] : vector<8x8xf32> to vector<8xf32>
    %94 = vector.shape_cast %93 : vector<8xf32> to vector<8x1xf32>
    %95 = tpu.reciprocal %94 {approx = true} : vector<8x1xf32> -> vector<8x1xf32>
    %96 = vector.broadcast %95 : vector<8x1xf32> to vector<8x8xf32>
    %97 = arith.mulf %92, %96 : vector<8x8xf32>
    %98 = arith.truncf %97 : vector<8x8xf32> to vector<8x8xbf16>
    %99 = vector.extract_strided_slice %44 {offsets = [0, 64], sizes = [8, 32], strides = [1, 1]} : vector<8x128xbf16> to vector<8x32xbf16>
    %cst_37 = arith.constant dense<0.000000e+00> : vector<8x32xf32>
    %100 = tpu.matmul %98, %99, %cst_37 {dimension_numbers = #tpu.dot_dimension_numbers<[1], [0], [0], [1], [0, 0, 1, 1], [], []>} : vector<8x8xbf16>, vector<8x32xbf16>, vector<8x32xf32> -> vector<8x32xf32>
    %c0_38 = arith.constant 0 : index
    %c64 = arith.constant 64 : index
    %101 = vector.load %arg18[%c0_38, %c64] : memref<8x128xf32, #tpu.memory_space<vmem>>, vector<8x32xf32>
    tpu.vector_store %arg18[%c0_38, %c64], %100 {strides = array<i32>} : memref<8x128xf32, #tpu.memory_space<vmem>>, vector<8x32xf32>,
    %102 = vector.extract_strided_slice %39 {offsets = [0, 96], sizes = [8, 32], strides = [1, 1]} : vector<8x128xbf16> to vector<8x32xbf16>
    %103 = vector.extract_strided_slice %43 {offsets = [0, 96], sizes = [8, 32], strides = [1, 1]} : vector<8x128xbf16> to vector<8x32xbf16>
    "tpu.trace_start"() <{level = 10 : i32, message = "qd,kd->qk"}> : () -> ()
    %cst_39 = arith.constant dense<0.000000e+00> : vector<8x8xf32>
    %104 = tpu.matmul %102, %103, %cst_39 {dimension_numbers = #tpu.dot_dimension_numbers<[1], [1], [0], [0], [0, 0, 1, 0], [], []>} : vector<8x32xbf16>, vector<8x32xbf16>, vector<8x8xf32> -> vector<8x8xf32>
    %cst_40 = arith.constant -1.000000e+09 : f32
    "tpu.trace_stop"() : () -> ()
    %105 = vector.broadcast %cst_40 : f32 to vector<8x8xf32>
    %106 = arith.select %42, %104, %105 : vector<8x8xi1>, vector<8x8xf32>
    %cst_41 = arith.constant dense<0xFF800000> : vector<8xf32>
    %107 = vector.multi_reduction <maximumf>, %106, %cst_41 [1] : vector<8x8xf32> to vector<8xf32>
    %108 = vector.shape_cast %107 : vector<8xf32> to vector<8x1xf32>
    %109 = vector.broadcast %108 : vector<8x1xf32> to vector<8x8xf32>
    %110 = arith.subf %106, %109 : vector<8x8xf32>
    %111 = math.exp %110 : vector<8x8xf32>
    %cst_42 = arith.constant dense<0.000000e+00> : vector<8xf32>
    %112 = vector.multi_reduction <add>, %111, %cst_42 [1] : vector<8x8xf32> to vector<8xf32>
    %113 = vector.shape_cast %112 : vector<8xf32> to vector<8x1xf32>
    %114 = tpu.reciprocal %113 {approx = true} : vector<8x1xf32> -> vector<8x1xf32>
    %115 = vector.broadcast %114 : vector<8x1xf32> to vector<8x8xf32>
    %116 = arith.mulf %111, %115 : vector<8x8xf32>
    %117 = arith.truncf %116 : vector<8x8xf32> to vector<8x8xbf16>
    %118 = vector.extract_strided_slice %44 {offsets = [0, 96], sizes = [8, 32], strides = [1, 1]} : vector<8x128xbf16> to vector<8x32xbf16>
    %cst_43 = arith.constant dense<0.000000e+00> : vector<8x32xf32>
    %119 = tpu.matmul %117, %118, %cst_43 {dimension_numbers = #tpu.dot_dimension_numbers<[1], [0], [0], [1], [0, 0, 1, 1], [], []>} : vector<8x8xbf16>, vector<8x32xbf16>, vector<8x32xf32> -> vector<8x32xf32>
    %c0_44 = arith.constant 0 : index
    %c96 = arith.constant 96 : index
    %120 = vector.load %arg18[%c0_44, %c96] : memref<8x128xf32, #tpu.memory_space<vmem>>, vector<8x32xf32>
    tpu.vector_store %arg18[%c0_44, %c96], %119 {strides = array<i32>} : memref<8x128xf32, #tpu.memory_space<vmem>>, vector<8x32xf32>,
    %c0_45 = arith.constant 0 : index
    %c0_46 = arith.constant 0 : index
    %121 = vector.load %arg18[%c0_45, %c0_46] : memref<8x128xf32, #tpu.memory_space<vmem>>, vector<8x128xf32>
    %122 = arith.truncf %121 : vector<8x128xf32> to vector<8x128xbf16>
    %c0_47 = arith.constant 0 : index
    %c0_48 = arith.constant 0 : index
    %123 = vector.load %arg13[%c0_47, %c0_48] : memref<128x128xbf16, #tpu.memory_space<vmem>>, vector<128x128xbf16>
    %cst_49 = arith.constant dense<0.000000e+00> : vector<8x128xf32>
    %124 = tpu.matmul %122, %123, %cst_49 {dimension_numbers = #tpu.dot_dimension_numbers<[1], [0], [0], [1], [0, 0, 1, 1], [], []>} : vector<8x128xbf16>, vector<128x128xbf16>, vector<8x128xf32> -> vector<8x128xf32>
    %c0_50 = arith.constant 0 : index
    %c0_51 = arith.constant 0 : index
    %125 = vector.load %arg14[%c0_50, %c0_51] : memref<1x128xf32, #tpu.memory_space<vmem>>, vector<1x128xf32>
    %126 = vector.broadcast %125 : vector<1x128xf32> to vector<8x128xf32>
    %127 = arith.addf %124, %126 : vector<8x128xf32>
    %128 = arith.addf %127, %7 : vector<8x128xf32>
    %129 = arith.truncf %128 : vector<8x128xf32> to vector<8x128xbf16>
    %c0_52 = arith.constant 0 : index
    %c0_53 = arith.constant 0 : index
    %c0_54 = arith.constant 0 : index
    %130 = vector.load %arg15[%c0_52, %c0_53, %c0_54] : memref<1x8x128xbf16, #tpu.memory_space<vmem>>, vector<1x8x128xbf16>
    %131 = vector.shape_cast %130 : vector<1x8x128xbf16> to vector<8x128xbf16>
    %132 = vector.shape_cast %129 : vector<8x128xbf16> to vector<1x8x128xbf16>
    tpu.vector_store %arg15[%c0_52, %c0_53, %c0_54], %132 {strides = array<i32>} : memref<1x8x128xbf16, #tpu.memory_space<vmem>>, vector<1x8x128xbf16>,
    return
  }
  func.func @transform_0(%arg0: i32, %arg1: i32, %arg2: memref<2xi32, #tpu.memory_space<smem>>) -> (i32, i32, i32) {
    %c0_i32 = arith.constant 0 : i32
    %c0_i32_0 = arith.constant 0 : i32
    return %arg0, %arg1, %c0_i32 : i32, i32, i32
  }
  func.func @transform_1(%arg0: i32, %arg1: i32, %arg2: memref<2xi32, #tpu.memory_space<smem>>) -> (i32, i32, i32) {
    %c0_i32 = arith.constant 0 : i32
    %c0_i32_0 = arith.constant 0 : i32
    %c0_i32_1 = arith.constant 0 : i32
    return %arg0, %c0_i32, %c0_i32_0 : i32, i32, i32
  }
  func.func @transform_2(%arg0: i32, %arg1: i32, %arg2: memref<2xi32, #tpu.memory_space<smem>>) -> (i32, i32) {
    %c0_i32 = arith.constant 0 : i32
    %c0_i32_0 = arith.constant 0 : i32
    %c0_i32_1 = arith.constant 0 : i32
    return %c0_i32, %c0_i32_0 : i32, i32
  }
  func.func @transform_3(%arg0: i32, %arg1: i32, %arg2: memref<2xi32, #tpu.memory_space<smem>>) -> (i32, i32) {
    %c0_i32 = arith.constant 0 : i32
    %c0_i32_0 = arith.constant 0 : i32
    %c0_i32_1 = arith.constant 0 : i32
    return %c0_i32, %c0_i32_0 : i32, i32
  }
  func.func @transform_4(%arg0: i32, %arg1: i32, %arg2: memref<2xi32, #tpu.memory_space<smem>>) -> (i32, i32) {
    %c0_i32 = arith.constant 0 : i32
    %c0_i32_0 = arith.constant 0 : i32
    %c0_i32_1 = arith.constant 0 : i32
    return %c0_i32, %c0_i32_0 : i32, i32
  }
  func.func @transform_5(%arg0: i32, %arg1: i32, %arg2: memref<2xi32, #tpu.memory_space<smem>>) -> (i32, i32) {
    %c0_i32 = arith.constant 0 : i32
    %c0_i32_0 = arith.constant 0 : i32
    %c0_i32_1 = arith.constant 0 : i32
    return %c0_i32, %c0_i32_0 : i32, i32
  }
  func.func @transform_6(%arg0: i32, %arg1: i32, %arg2: memref<2xi32, #tpu.memory_space<smem>>) -> (i32, i32) {
    %c0_i32 = arith.constant 0 : i32
    %c0_i32_0 = arith.constant 0 : i32
    %c0_i32_1 = arith.constant 0 : i32
    return %c0_i32, %c0_i32_0 : i32, i32
  }
  func.func @transform_7(%arg0: i32, %arg1: i32, %arg2: memref<2xi32, #tpu.memory_space<smem>>) -> (i32, i32) {
    %c0_i32 = arith.constant 0 : i32
    %c0_i32_0 = arith.constant 0 : i32
    %c0_i32_1 = arith.constant 0 : i32
    return %c0_i32, %c0_i32_0 : i32, i32
  }
  func.func @transform_8(%arg0: i32, %arg1: i32, %arg2: memref<2xi32, #tpu.memory_space<smem>>) -> (i32, i32) {
    %c0_i32 = arith.constant 0 : i32
    %c0_i32_0 = arith.constant 0 : i32
    %c0_i32_1 = arith.constant 0 : i32
    return %c0_i32, %c0_i32_0 : i32, i32
  }
  func.func @transform_9(%arg0: i32, %arg1: i32, %arg2: memref<2xi32, #tpu.memory_space<smem>>) -> (i32, i32) {
    %c0_i32 = arith.constant 0 : i32
    %c0_i32_0 = arith.constant 0 : i32
    %c0_i32_1 = arith.constant 0 : i32
    return %c0_i32, %c0_i32_0 : i32, i32
  }
  func.func @transform_10(%arg0: i32, %arg1: i32, %arg2: memref<2xi32, #tpu.memory_space<smem>>) -> (i32, i32) {
    %c0_i32 = arith.constant 0 : i32
    %c0_i32_0 = arith.constant 0 : i32
    %c0_i32_1 = arith.constant 0 : i32
    return %c0_i32, %c0_i32_0 : i32, i32
  }
  func.func @transform_11(%arg0: i32, %arg1: i32, %arg2: memref<2xi32, #tpu.memory_space<smem>>) -> (i32, i32) {
    %c0_i32 = arith.constant 0 : i32
    %c0_i32_0 = arith.constant 0 : i32
    %c0_i32_1 = arith.constant 0 : i32
    return %c0_i32, %c0_i32_0 : i32, i32
  }
  func.func @transform_12(%arg0: i32, %arg1: i32, %arg2: memref<2xi32, #tpu.memory_space<smem>>) -> (i32, i32, i32) {
    %c0_i32 = arith.constant 0 : i32
    %c0_i32_0 = arith.constant 0 : i32
    return %arg0, %arg1, %c0_i32 : i32, i32, i32
  }
}

module attributes {stable_mosaic.version = 11 : i64} {
  func.func @_proj_lse_kernel(%arg0: i32, %arg1: i32, %arg2: memref<16x128xbf16, #tpu.memory_space<vmem>>, %arg3: memref<1x128xf32, #tpu.memory_space<vmem>>, %arg4: memref<1x128xf32, #tpu.memory_space<vmem>>, %arg5: memref<128x64xbf16, #tpu.memory_space<vmem>>, %arg6: memref<1x64xf32, #tpu.memory_space<vmem>>, %arg7: memref<16x64xf32, #tpu.memory_space<vmem>>, %arg8: memref<16x1xf32, #tpu.memory_space<vmem>>, %arg9: memref<16x128xbf16, #tpu.memory_space<vmem>>, %arg10: memref<16x1xf32, #tpu.memory_space<vmem>>, %arg11: memref<16x1xf32, #tpu.memory_space<vmem>>) attributes {dimension_semantics = [#tpu.dimension_semantics<parallel>, #tpu.dimension_semantics<arbitrary>], iteration_bounds = array<i64: 1, 1>, scalar_prefetch = 0 : i64, scratch_operands = 3 : i64, tpu.core_type = #tpu.core_type<tc>, window_params = [{transform_indices = @transform_0, window_bounds = array<i64: 16, 128>}, {pipeline_mode = #tpu.pipeline_mode<synchronous>, transform_indices = @transform_1, window_bounds = array<i64: 1, 128>}, {pipeline_mode = #tpu.pipeline_mode<synchronous>, transform_indices = @transform_2, window_bounds = array<i64: 1, 128>}, {transform_indices = @transform_3, window_bounds = array<i64: 128, 64>}, {transform_indices = @transform_4, window_bounds = array<i64: 1, 64>}, {transform_indices = @transform_5, window_bounds = array<i64: 16, 64>}, {transform_indices = @transform_6, window_bounds = array<i64: 16, 1>}]} {
    %c0_i32 = arith.constant 0 : i32
    %0 = arith.cmpi eq, %arg1, %c0_i32 : i32
    %1 = arith.extui %0 : i1 to i32
    %c0_i32_0 = arith.constant 0 : i32
    %2 = arith.cmpi ne, %1, %c0_i32_0 : i32
    scf.if %2 {
      %c0_20 = arith.constant 0 : index
      %c0_21 = arith.constant 0 : index
      %29 = vector.load %arg2[%c0_20, %c0_21] : memref<16x128xbf16, #tpu.memory_space<vmem>>, vector<16x128xbf16>
      %30 = arith.extf %29 : vector<16x128xbf16> to vector<16x128xf32>
      %c0_22 = arith.constant 0 : index
      %c0_23 = arith.constant 0 : index
      %31 = vector.load %arg3[%c0_22, %c0_23] : memref<1x128xf32, #tpu.memory_space<vmem>>, vector<1x128xf32>
      %c0_24 = arith.constant 0 : index
      %c0_25 = arith.constant 0 : index
      %32 = vector.load %arg4[%c0_24, %c0_25] : memref<1x128xf32, #tpu.memory_space<vmem>>, vector<1x128xf32>
      %cst_26 = arith.constant dense<0.000000e+00> : vector<16xf32>
      %33 = vector.multi_reduction <add>, %30, %cst_26 [1] : vector<16x128xf32> to vector<16xf32>
      %34 = vector.shape_cast %33 : vector<16xf32> to vector<16x1xf32>
      %cst_27 = arith.constant 1.280000e+02 : f32
      %35 = vector.broadcast %cst_27 : f32 to vector<16x1xf32>
      %36 = arith.divf %34, %35 : vector<16x1xf32>
      %37 = vector.broadcast %36 : vector<16x1xf32> to vector<16x128xf32>
      %38 = arith.subf %30, %37 : vector<16x128xf32>
      %39 = arith.mulf %38, %38 : vector<16x128xf32>
      %cst_28 = arith.constant dense<0.000000e+00> : vector<16xf32>
      %40 = vector.multi_reduction <add>, %39, %cst_28 [1] : vector<16x128xf32> to vector<16xf32>
      %41 = vector.shape_cast %40 : vector<16xf32> to vector<16x1xf32>
      %cst_29 = arith.constant 0.00787401571 : f32
      %42 = vector.broadcast %cst_29 : f32 to vector<16x1xf32>
      %43 = arith.mulf %41, %42 : vector<16x1xf32>
      %44 = math.sqrt %43 : vector<16x1xf32>
      %cst_30 = arith.constant 9.99999997E-7 : f32
      %45 = vector.broadcast %cst_30 : f32 to vector<16x1xf32>
      %46 = arith.addf %44, %45 : vector<16x1xf32>
      %47 = tpu.reciprocal %46 : vector<16x1xf32> -> vector<16x1xf32>
      %48 = vector.broadcast %36 : vector<16x1xf32> to vector<16x128xf32>
      %49 = arith.subf %30, %48 : vector<16x128xf32>
      %50 = vector.broadcast %47 : vector<16x1xf32> to vector<16x128xf32>
      %51 = arith.mulf %49, %50 : vector<16x128xf32>
      %52 = vector.broadcast %31 : vector<1x128xf32> to vector<16x128xf32>
      %53 = arith.mulf %52, %51 : vector<16x128xf32>
      %54 = vector.broadcast %32 : vector<1x128xf32> to vector<16x128xf32>
      %55 = arith.addf %53, %54 : vector<16x128xf32>
      %56 = arith.truncf %55 : vector<16x128xf32> to vector<16x128xbf16>
      %c0_31 = arith.constant 0 : index
      %c0_32 = arith.constant 0 : index
      %57 = vector.load %arg9[%c0_31, %c0_32] : memref<16x128xbf16, #tpu.memory_space<vmem>>, vector<16x128xbf16>
      tpu.vector_store %arg9[%c0_31, %c0_32], %56 {strides = array<i32>} : memref<16x128xbf16, #tpu.memory_space<vmem>>, vector<16x128xbf16>,
      %cst_33 = arith.constant 0xFF800000 : f32
      %58 = vector.broadcast %cst_33 : f32 to vector<16x1xf32>
      %c0_34 = arith.constant 0 : index
      %c0_35 = arith.constant 0 : index
      %59 = vector.load %arg10[%c0_34, %c0_35] : memref<16x1xf32, #tpu.memory_space<vmem>>, vector<16x1xf32>
      tpu.vector_store %arg10[%c0_34, %c0_35], %58 {strides = array<i32>} : memref<16x1xf32, #tpu.memory_space<vmem>>, vector<16x1xf32>,
      %cst_36 = arith.constant 0.000000e+00 : f32
      %60 = vector.broadcast %cst_36 : f32 to vector<16x1xf32>
      %c0_37 = arith.constant 0 : index
      %c0_38 = arith.constant 0 : index
      %61 = vector.load %arg11[%c0_37, %c0_38] : memref<16x1xf32, #tpu.memory_space<vmem>>, vector<16x1xf32>
      tpu.vector_store %arg11[%c0_37, %c0_38], %60 {strides = array<i32>} : memref<16x1xf32, #tpu.memory_space<vmem>>, vector<16x1xf32>,
    } else {
    }
    %c0 = arith.constant 0 : index
    %c0_1 = arith.constant 0 : index
    %3 = vector.load %arg9[%c0, %c0_1] : memref<16x128xbf16, #tpu.memory_space<vmem>>, vector<16x128xbf16>
    %c0_2 = arith.constant 0 : index
    %c0_3 = arith.constant 0 : index
    %4 = vector.load %arg5[%c0_2, %c0_3] : memref<128x64xbf16, #tpu.memory_space<vmem>>, vector<128x64xbf16>
    %cst = arith.constant dense<0.000000e+00> : vector<16x64xf32>
    %5 = tpu.matmul %3, %4, %cst {dimension_numbers = #tpu.dot_dimension_numbers<[1], [0], [0], [1], [0, 0, 1, 1], [], []>} : vector<16x128xbf16>, vector<128x64xbf16>, vector<16x64xf32> -> vector<16x64xf32>
    %c0_4 = arith.constant 0 : index
    %c0_5 = arith.constant 0 : index
    %6 = vector.load %arg6[%c0_4, %c0_5] : memref<1x64xf32, #tpu.memory_space<vmem>>, vector<1x64xf32>
    %7 = vector.broadcast %6 : vector<1x64xf32> to vector<16x64xf32>
    %8 = arith.addf %5, %7 : vector<16x64xf32>
    %c0_6 = arith.constant 0 : index
    %c0_7 = arith.constant 0 : index
    %9 = vector.load %arg7[%c0_6, %c0_7] : memref<16x64xf32, #tpu.memory_space<vmem>>, vector<16x64xf32>
    tpu.vector_store %arg7[%c0_6, %c0_7], %8 {strides = array<i32>} : memref<16x64xf32, #tpu.memory_space<vmem>>, vector<16x64xf32>,
    %c0_8 = arith.constant 0 : index
    %c0_9 = arith.constant 0 : index
    %10 = vector.load %arg10[%c0_8, %c0_9] : memref<16x1xf32, #tpu.memory_space<vmem>>, vector<16x1xf32>
    %cst_10 = arith.constant dense<0xFF800000> : vector<16xf32>
    %11 = vector.multi_reduction <maximumf>, %8, %cst_10 [1] : vector<16x64xf32> to vector<16xf32>
    %12 = vector.shape_cast %11 : vector<16xf32> to vector<16x1xf32>
    %13 = arith.maximumf %10, %12 : vector<16x1xf32>
    %c0_11 = arith.constant 0 : index
    %c0_12 = arith.constant 0 : index
    %14 = vector.load %arg11[%c0_11, %c0_12] : memref<16x1xf32, #tpu.memory_space<vmem>>, vector<16x1xf32>
    %15 = arith.subf %10, %13 : vector<16x1xf32>
    %16 = math.exp %15 : vector<16x1xf32>
    %17 = arith.mulf %14, %16 : vector<16x1xf32>
    %18 = vector.broadcast %13 : vector<16x1xf32> to vector<16x64xf32>
    %19 = arith.subf %8, %18 : vector<16x64xf32>
    %20 = math.exp %19 : vector<16x64xf32>
    %cst_13 = arith.constant dense<0.000000e+00> : vector<16xf32>
    %21 = vector.multi_reduction <add>, %20, %cst_13 [1] : vector<16x64xf32> to vector<16xf32>
    %22 = vector.shape_cast %21 : vector<16xf32> to vector<16x1xf32>
    %23 = arith.addf %17, %22 : vector<16x1xf32>
    %c0_14 = arith.constant 0 : index
    %c0_15 = arith.constant 0 : index
    %24 = vector.load %arg11[%c0_14, %c0_15] : memref<16x1xf32, #tpu.memory_space<vmem>>, vector<16x1xf32>
    tpu.vector_store %arg11[%c0_14, %c0_15], %23 {strides = array<i32>} : memref<16x1xf32, #tpu.memory_space<vmem>>, vector<16x1xf32>,
    %c0_16 = arith.constant 0 : index
    %c0_17 = arith.constant 0 : index
    %25 = vector.load %arg10[%c0_16, %c0_17] : memref<16x1xf32, #tpu.memory_space<vmem>>, vector<16x1xf32>
    tpu.vector_store %arg10[%c0_16, %c0_17], %13 {strides = array<i32>} : memref<16x1xf32, #tpu.memory_space<vmem>>, vector<16x1xf32>,
    %c0_i32_18 = arith.constant 0 : i32
    %26 = arith.cmpi eq, %arg1, %c0_i32_18 : i32
    %27 = arith.extui %26 : i1 to i32
    %c0_i32_19 = arith.constant 0 : i32
    %28 = arith.cmpi ne, %27, %c0_i32_19 : i32
    scf.if %28 {
      %c0_20 = arith.constant 0 : index
      %c0_21 = arith.constant 0 : index
      %29 = vector.load %arg10[%c0_20, %c0_21] : memref<16x1xf32, #tpu.memory_space<vmem>>, vector<16x1xf32>
      %c0_22 = arith.constant 0 : index
      %c0_23 = arith.constant 0 : index
      %30 = vector.load %arg11[%c0_22, %c0_23] : memref<16x1xf32, #tpu.memory_space<vmem>>, vector<16x1xf32>
      %31 = math.log %30 : vector<16x1xf32>
      %32 = arith.addf %29, %31 : vector<16x1xf32>
      %c0_24 = arith.constant 0 : index
      %c0_25 = arith.constant 0 : index
      %33 = vector.load %arg8[%c0_24, %c0_25] : memref<16x1xf32, #tpu.memory_space<vmem>>, vector<16x1xf32>
      tpu.vector_store %arg8[%c0_24, %c0_25], %32 {strides = array<i32>} : memref<16x1xf32, #tpu.memory_space<vmem>>, vector<16x1xf32>,
    } else {
    }
    return
  }
  func.func @transform_0(%arg0: i32, %arg1: i32) -> (i32, i32) {
    %c0_i32 = arith.constant 0 : i32
    %c0_i32_0 = arith.constant 0 : i32
    return %arg0, %c0_i32 : i32, i32
  }
  func.func @transform_1(%arg0: i32, %arg1: i32) -> (i32, i32) {
    %c0_i32 = arith.constant 0 : i32
    %c0_i32_0 = arith.constant 0 : i32
    %c0_i32_1 = arith.constant 0 : i32
    return %c0_i32, %c0_i32_0 : i32, i32
  }
  func.func @transform_2(%arg0: i32, %arg1: i32) -> (i32, i32) {
    %c0_i32 = arith.constant 0 : i32
    %c0_i32_0 = arith.constant 0 : i32
    %c0_i32_1 = arith.constant 0 : i32
    return %c0_i32, %c0_i32_0 : i32, i32
  }
  func.func @transform_3(%arg0: i32, %arg1: i32) -> (i32, i32) {
    %c0_i32 = arith.constant 0 : i32
    %c0_i32_0 = arith.constant 0 : i32
    return %c0_i32, %arg1 : i32, i32
  }
  func.func @transform_4(%arg0: i32, %arg1: i32) -> (i32, i32) {
    %c0_i32 = arith.constant 0 : i32
    %c0_i32_0 = arith.constant 0 : i32
    return %c0_i32, %arg1 : i32, i32
  }
  func.func @transform_5(%arg0: i32, %arg1: i32) -> (i32, i32) {
    %c0_i32 = arith.constant 0 : i32
    return %arg0, %arg1 : i32, i32
  }
  func.func @transform_6(%arg0: i32, %arg1: i32) -> (i32, i32) {
    %c0_i32 = arith.constant 0 : i32
    %c0_i32_0 = arith.constant 0 : i32
    return %arg0, %c0_i32 : i32, i32
  }
}

module attributes {stable_mosaic.version = 11 : i64} {
  func.func @_sub_lse_kernel(%arg0: i32, %arg1: i32, %arg2: memref<16x64xf32, #tpu.memory_space<vmem>>, %arg3: memref<16x1xf32, #tpu.memory_space<vmem>>, %arg4: memref<16x64xf32, #tpu.memory_space<vmem>>) attributes {dimension_semantics = [#tpu.dimension_semantics<parallel>, #tpu.dimension_semantics<parallel>], iteration_bounds = array<i64: 1, 1>, scalar_prefetch = 0 : i64, scratch_operands = 0 : i64, tpu.core_type = #tpu.core_type<tc>, window_params = [{transform_indices = @transform_0, window_bounds = array<i64: 16, 64>}, {transform_indices = @transform_1, window_bounds = array<i64: 16, 1>}, {transform_indices = @transform_2, window_bounds = array<i64: 16, 64>}]} {
    %c0 = arith.constant 0 : index
    %c0_0 = arith.constant 0 : index
    %0 = vector.load %arg2[%c0, %c0_0] : memref<16x64xf32, #tpu.memory_space<vmem>>, vector<16x64xf32>
    %c0_1 = arith.constant 0 : index
    %c0_2 = arith.constant 0 : index
    %1 = vector.load %arg3[%c0_1, %c0_2] : memref<16x1xf32, #tpu.memory_space<vmem>>, vector<16x1xf32>
    %2 = vector.broadcast %1 : vector<16x1xf32> to vector<16x64xf32>
    %3 = arith.subf %0, %2 : vector<16x64xf32>
    %c0_3 = arith.constant 0 : index
    %c0_4 = arith.constant 0 : index
    %4 = vector.load %arg4[%c0_3, %c0_4] : memref<16x64xf32, #tpu.memory_space<vmem>>, vector<16x64xf32>
    tpu.vector_store %arg4[%c0_3, %c0_4], %3 {strides = array<i32>} : memref<16x64xf32, #tpu.memory_space<vmem>>, vector<16x64xf32>,
    return
  }
  func.func @transform_0(%arg0: i32, %arg1: i32) -> (i32, i32) {
    %c0_i32 = arith.constant 0 : i32
    return %arg0, %arg1 : i32, i32
  }
  func.func @transform_1(%arg0: i32, %arg1: i32) -> (i32, i32) {
    %c0_i32 = arith.constant 0 : i32
    %c0_i32_0 = arith.constant 0 : i32
    return %arg0, %c0_i32 : i32, i32
  }
  func.func @transform_2(%arg0: i32, %arg1: i32) -> (i32, i32) {
    %c0_i32 = arith.constant 0 : i32
    return %arg0, %arg1 : i32, i32
  }
}

</mosaic_0001>

<bundles_post_ra>
// kernel: transformer_forward.13
= control target key start
LH: loop header
LB: loop body
LE: loop exit
PB: predicated region body
PF: predicated region fallthrough
CT: control target
= control target key end

     0   :  { %v555_v22 = vmov 0   ;;  %s730_s0 = inlined_call_operand.vmem [shape: bf16[16,128], index: 0, kind: input, shape index: {}]   ;;  %s731_s3 = inlined_call_operand.vmem [shape: bf16[128,256], index: 3, kind: input, shape index: {}]   ;;  %s732_s5 = inlined_call_operand.vmem [shape: bf16[256,128], index: 5, kind: input, shape index: {}]   ;;  %s733_s1 = inlined_call_operand.vmem [shape: f32[1,128], index: 1, kind: input, shape index: {}]   ;;  %s734_s2 = inlined_call_operand.vmem [shape: f32[1,128], index: 2, kind: input, shape index: {}]   ;;  %s735_s4 = inlined_call_operand.vmem [shape: f32[1,256], index: 4, kind: input, shape index: {}]   ;;  %s736_s6 = inlined_call_operand.vmem [shape: f32[1,128], index: 6, kind: input, shape index: {}]   ;;  %s737_s7 = inlined_call_operand.vmem [shape: bf16[16,128], index: 7, kind: output, shape index: {}]  }
   0x1   :  { %v476_v0 = vld [vmem:[%s730_s0] sm:$0xff]   ;;  %v510_v13 = vld [vmem:[%s731_s3 + $0x14] ss:$8 sps:$4 sm:$0xff]   ;;  %v512_v14 = vld [vmem:[%s731_s3 + $0x10] ss:$8 sps:$4 sm:$0xff]   ;;  %227 = vmatprep.mubr.bf16.mxu0 %v555_v22 }
   0x2   :  { %v599_v1 = vunpack.c.l.bf16 %v476_v0  ;;  %v602_v2 = vunpack.c.h.bf16 %v476_v0  ;;  %v507_v11 = vld [vmem:[%s731_s3 + $0x4] ss:$8 sps:$4 sm:$0xff]   ;;  %v509_v12 = vld [vmem:[%s731_s3] ss:$8 sps:$4 sm:$0xff]   ;;  %v516_v17 = vld [vmem:[%s731_s3 + $0x34] ss:$8 sps:$4 sm:$0xff]  }
   0x3   :  { %195 = vmatprep.subr.bf16.mxu0 %v507_v11  ;;  %v513_v15 = vld [vmem:[%s731_s3 + $0x24] ss:$8 sps:$4 sm:$0xff]   ;;  %v515_v16 = vld [vmem:[%s731_s3 + $0x20] ss:$8 sps:$4 sm:$0xff]   ;;  %v518_v18 = vld [vmem:[%s731_s3 + $0x30] ss:$8 sps:$4 sm:$0xff]  }
   0x4   :  { %33 = vadd.xlane.f32.xlu0 %v599_v1  ;;  %196 = vmatpush1.bf16.msra.mxu0 %v509_v12  ;;  %v519_v19 = vld [vmem:[%s731_s3 + $0x44] ss:$8 sps:$4 sm:$0xff]   ;;  %v521_v20 = vld [vmem:[%s731_s3 + $0x40] ss:$8 sps:$4 sm:$0xff]   ;;  %v522_v21 = vld [vmem:[%s731_s3 + $0x54] ss:$8 sps:$4 sm:$0xff]  }
   0x5   :  { %197 = vmatprep.subr.bf16.mxu0 %v510_v13  ;;  %v524_v23 = vld [vmem:[%s731_s3 + $0x50] ss:$8 sps:$4 sm:$0xff]   ;;  %v525_v24 = vld [vmem:[%s731_s3 + $0x64] ss:$8 sps:$4 sm:$0xff]   ;;  %v527_v25 = vld [vmem:[%s731_s3 + $0x60] ss:$8 sps:$4 sm:$0xff]  }
   0x6   :  { %v528_v26 = vld [vmem:[%s731_s3 + $0x74] ss:$8 sps:$4 sm:$0xff]   ;;  %v530_v27 = vld [vmem:[%s731_s3 + $0x70] ss:$8 sps:$4 sm:$0xff]   ;;  %v531_v28 = vld [vmem:[%s732_s5 + $0x40] sm:$0xff]  }
   0x7   :  { %v532_v29 = vld [vmem:[%s732_s5] sm:$0xff]   ;;  %484 = vmatprep.subr.bf16.mxu1 %v531_v28  ;;  %v533_v30 = vld [vmem:[%s732_s5 + $0x48] sm:$0xff]   ;;  %v535_v32 = vld [vmem:[%s732_s5 + $0x50] sm:$0xff]  }
   0x8   :  { %35 = vadd.xlane.f32.xlu0 %v602_v2  ;;  %198 = vmatpush1.bf16.msra.mxu0 %v512_v14  ;;  %v534_v31 = vld [vmem:[%s732_s5 + $0x8] sm:$0xff]   ;;  %v536_v33 = vld [vmem:[%s732_s5 + $0x10] sm:$0xff]   ;;  %v537_v34 = vld [vmem:[%s732_s5 + $0x58] sm:$0xff]  }
   0x9   :  { %199 = vmatprep.subr.bf16.mxu0 %v513_v15  ;;  %485 = vmatpush3.bf16.msra.mxu1 %v532_v29  ;;  %v538_v35 = vld [vmem:[%s732_s5 + $0x18] sm:$0xff]   ;;  %v539_v36 = vld [vmem:[%s732_s5 + $0x60] sm:$0xff]   ;;  %v541_v38 = vld [vmem:[%s732_s5 + $0x68] sm:$0xff]  }
   0xa   :  { %486 = vmatprep.subr.bf16.mxu1 %v533_v30  ;;  %v540_v37 = vld [vmem:[%s732_s5 + $0x20] sm:$0xff]  }
   0xb   :  { %v436_v57 = vld [vmem:[%s733_s1] ss:$0 sm:$0xff] }
   0xc   :  { %200 = vmatpush1.bf16.msra.mxu0 %v515_v16  ;;  %v437_v61 = vld [vmem:[%s734_s2] ss:$0 sm:$0xff] }
   0xd   :  { %201 = vmatprep.subr.bf16.mxu0 %v516_v17  ;;  %487 = vmatpush3.bf16.msra.mxu1 %v534_v31  ;;  %v103_v12 = vld [vmem:[%s735_s4] sm:$0x3] }
   0xe   :  { %488 = vmatprep.subr.bf16.mxu1 %v535_v32  ;;  %v454_v31 = vld [vmem:[%s736_s6] ss:$0 sm:$0xff] }
  0x10   :  { %202 = vmatpush1.bf16.msra.mxu0 %v518_v18 }
  0x11   :  { %203 = vmatprep.subr.bf16.mxu0 %v519_v19  ;;  %489 = vmatpush3.bf16.msra.mxu1 %v536_v33 }
  0x12   :  { %490 = vmatprep.subr.bf16.mxu1 %v537_v34 }
  0x14   :  { %204 = vmatpush1.bf16.msra.mxu0 %v521_v20 }
  0x15   :  { %205 = vmatprep.subr.bf16.mxu0 %v522_v21  ;;  %491 = vmatpush3.bf16.msra.mxu1 %v538_v35 }
  0x16   :  { %492 = vmatprep.subr.bf16.mxu1 %v539_v36 }
  0x18   :  { %206 = vmatpush1.bf16.msra.mxu0 %v524_v23 }
  0x19   :  { %207 = vmatprep.subr.bf16.mxu0 %v525_v24  ;;  %493 = vmatpush3.bf16.msra.mxu1 %v540_v37 }
  0x1a   :  { %494 = vmatprep.subr.bf16.mxu1 %v541_v38 }
  0x1c   :  { %208 = vmatpush1.bf16.msra.mxu0 %v527_v25 }
  0x1d   :  { %209 = vmatprep.subr.bf16.mxu0 %v528_v26 }
  0x20   :  { %210 = vmatpush1.bf16.msra.mxu0 %v530_v27 }
  0x91   :  { %v34_v3 = vpop.xlane.xlu0 %33 }
  0x92   :  { %v38_v4 = vmul.f32 0.0078125, %v34_v3 }
  0x94   :  { %v606_v5 = vsub.f32 %v599_v1, %v38_v4  ;;  %v542_v4 = vld [vmem:[%s732_s5 + $0x28] sm:$0xff]  }
  0x95   :  { %v36_v6 = vpop.xlane.xlu0 %35  ;;  %495 = vmatpush3.bf16.msra.mxu1 %v542_v4 }
  0x96   :  { %v39_v7 = vmul.f32 0.0078125, %v36_v6  ;;  %v42_v8 = vmul.f32 %v606_v5, %v606_v5  ;;  %v544_v6 = vld [vmem:[%s732_s5 + $0x30] sm:$0xff]  }
  0x98   :  { %v611_v9 = vsub.f32 %v602_v2, %v39_v7  ;;  %44 = vadd.xlane.f32.xlu1 %v42_v8  ;;  %v545_v7 = vld [vmem:[%s732_s5 + $0x78] sm:$0xff]  }
  0x99   :  { %v546_v8 = vld [vmem:[%s732_s5 + $0x38] sm:$0xff]  }
  0x9a   :  { %v43_v10 = vmul.f32 %v611_v9, %v611_v9 }
  0x9c   :  { %46 = vadd.xlane.f32.xlu1 %v43_v10 }
 0x125   :  { %v45_v39 = vpop.xlane.xlu1 %44 }
 0x126   :  { %v48_v40 = vmul.f32 0.007874016, %v45_v39 }
 0x128   :  { %547 = vrsqrt.f32 %v48_v40  ;;  %vm52_vm0 = vcmp.eq.f32.partialorder %v48_v40, inf  ;;  %v55_v45 = vand.u32 2147483648, %v48_v40  ;;  %vm54_vm1 = vcmp.eq.f32.partialorder %v48_v40, 0.0 }
 0x129   :  { %v47_v41 = vpop.xlane.xlu1 %46 }
 0x12a   :  { %v49_v42 = vmul.f32 0.007874016, %v47_v41 }
 0x12c   :  { %549 = vrsqrt.f32 %v49_v42  ;;  %vm59_vm2 = vcmp.eq.f32.partialorder %v49_v42, inf  ;;  %v62_v51 = vand.u32 2147483648, %v49_v42  ;;  %vm61_vm3 = vcmp.eq.f32.partialorder %v49_v42, 0.0 }
 0x132   :  { %v548_v43 = vpop.eup %547 }
 0x133   :  { %v51_v44 = vmul.f32 %v548_v43, %v48_v40 }
 0x135   :  { %v53_v46 = vsel %vm52_vm0, %v48_v40, %v51_v44 }
 0x136   :  { %v550_v47 = vpop.eup %549  ;;  %v56_v48 = vsel %vm54_vm1, %v55_v45, %v53_v46 }
 0x137   :  { %v64_v49 = vadd.f32 1e-06, %v56_v48  ;;  %v58_v50 = vmul.f32 %v550_v47, %v49_v42 }
 0x139   :  { %v60_v52 = vsel %vm59_vm2, %v49_v42, %v58_v50  ;;  %551 = vrcp.f32 %v64_v49 }
 0x13a   :  { %v63_v53 = vsel %vm61_vm3, %v62_v51, %v60_v52 }
 0x13b   :  { %v65_v54 = vadd.f32 1e-06, %v63_v53 }
 0x13d   :  { %553 = vrcp.f32 %v65_v54 }
 0x143   :  { %v552_v55 = vpop.eup %551 }
 0x144   :  { %v68_v56 = vmul.f32 %v552_v55, %v606_v5  ;;  %v543_v5 = vld [vmem:[%s732_s5 + $0x70] sm:$0xff]  }
 0x145   :  { %496 = vmatprep.subr.bf16.mxu1 %v543_v5 }
 0x146   :  { %v76_v60 = vmul.f32 %v436_v57, %v68_v56  ;;  %497 = vmatpush3.bf16.msra.mxu1 %v544_v6 }
 0x147   :  { %v554_v58 = vpop.eup %553  ;;  %498 = vmatprep.subr.bf16.mxu1 %v545_v7 }
 0x148   :  { %v69_v59 = vmul.f32 %v554_v58, %v611_v9  ;;  %v84_v63 = vadd.f32 %v437_v61, %v76_v60  ;;  %v105_v9 = vlaneseq }
 0x14a   :  { %v77_v62 = vmul.f32 %v436_v57, %v69_v59  ;;  %499 = vmatpush3.bf16.msra.mxu1 %v546_v8  ;;  %v106_v10 = vshrl.u32 %v105_v9, 7 }
 0x14c   :  { %v85_v0 = vadd.f32 %v437_v61, %v77_v62  ;;  %v107_v11 = vsub.s32 0, %v106_v10  ;;  %v111_v13 = vsub.s32 1, %v106_v10 }
 0x14e   :  { %v86_v3 = vpack.c.bf16 %v85_v0, %v84_v63  ;;  %v108_v14 = vrot.slane %v103_v12, %v107_v11  ;;  %v112_v15 = vrot.slane %v103_v12, %v111_v13 }
 0x150   :  { %228 = vmatmul.mubr.bf16.vlgmr.msra.gmra.mrb[0].mxu0 %v86_v3 }
 0x223   :  { %v229_v16 = vpop.f32.mrb[0].mxu0 }
 0x224   :  { %v230_v17 = vadd.f32 %v229_v16, %v108_v14  ;;  %v231_v18 = vpop.f32.mrb[1].mxu0 }
 0x225   :  { %v232_v19 = vadd.f32 %v231_v18, %v112_v15  ;;  %v233_v20 = vpop.f32.mrb[2].mxu0 }
 0x226   :  { %v234_v21 = vadd.f32 %v233_v20, %v108_v14  ;;  %v235_v22 = vpop.f32.mrb[3].mxu0  ;;  %v238_v24 = vmax.f32 %v230_v17, 0.0 }
 0x227   :  { %v236_v23 = vadd.f32 %v235_v22, %v112_v15  ;;  %v239_v26 = vmax.f32 %v232_v19, 0.0 }
 0x228   :  { %v240_v25 = vmax.f32 %v234_v21, 0.0 }
 0x229   :  { %v241_v27 = vmax.f32 %v236_v23, 0.0 }
 0x22a   :  { %v242_v28 = vpack.c.bf16 %v240_v25, %v238_v24 }
 0x22b   :  { %v243_v29 = vpack.c.bf16 %v241_v27, %v239_v26 }
 0x22d   :  { %411 = vmatprep.mubr.bf16.mxu1 %v243_v29 }
 0x22e   :  { %412 = vmatmul.mubr.bf16.vlgmr.msra.gmra.mrb[0].mxu1 %v242_v28 }
 0x301   :  { %v500_v30 = vpop.f32.mrb[0].mxu1 }
 0x302   :  { %v501_v32 = vpop.f32.mrb[1].mxu1 }
 0x303   :  { %v502_v33 = vadd.f32 %v501_v32, %v500_v30  ;;  %v503_v34 = vpop.f32.mrb[2].mxu1 }
 0x304   :  { %v504_v35 = vpop.f32.mrb[3].mxu1 }
 0x305   :  { %v414_v36 = vadd.f32 %v502_v33, %v454_v31  ;;  %v505_v37 = vadd.f32 %v504_v35, %v503_v34 }
 0x307   :  { %v417_v38 = vadd.f32 %v505_v37, %v454_v31  ;;  %v420_v39 = vadd.f32 %v599_v1, %v414_v36 }
 0x309   :  { %v421_v40 = vadd.f32 %v602_v2, %v417_v38 }
 0x30b   :  { %v482_v41 = vpack.c.bf16 %v421_v40, %v420_v39 }
 0x30d   :  { %483 = vst [vmem:[%s737_s7] sm:$0xff] %v482_v41  }

// kernel: transformer_forward.15
= control target key start
LH: loop header
LB: loop body
LE: loop exit
PB: predicated region body
PF: predicated region fallthrough
CT: control target
= control target key end

     0   :  { %v625_v22 = vmov 0   ;;  %s816_s0 = inlined_call_operand.vmem [shape: bf16[16,128], index: 0, kind: input, shape index: {}]   ;;  %s817_s3 = inlined_call_operand.vmem [shape: bf16[128,256], index: 3, kind: input, shape index: {}]   ;;  %s818_s5 = inlined_call_operand.vmem [shape: bf16[256,128], index: 5, kind: input, shape index: {}]   ;;  %s819_s1 = inlined_call_operand.vmem [shape: f32[1,128], index: 1, kind: input, shape index: {}]   ;;  %s820_s2 = inlined_call_operand.vmem [shape: f32[1,128], index: 2, kind: input, shape index: {}]   ;;  %s821_s4 = inlined_call_operand.vmem [shape: f32[1,256], index: 4, kind: input, shape index: {}]   ;;  %s822_s6 = inlined_call_operand.vmem [shape: f32[1,128], index: 6, kind: input, shape index: {}]   ;;  %s823_s7 = inlined_call_operand.vmem [shape: f32[1,128], index: 7, kind: input, shape index: {}]   ;;  %s824_s8 = inlined_call_operand.vmem [shape: f32[1,128], index: 8, kind: input, shape index: {}]   ;;  %s825_s9 = inlined_call_operand.vmem [shape: bf16[16,128], index: 9, kind: output, shape index: {}]  }
   0x1   :  { %v538_v0 = vld [vmem:[%s816_s0] sm:$0xff]   ;;  %v572_v13 = vld [vmem:[%s817_s3 + $0x14] ss:$8 sps:$4 sm:$0xff]   ;;  %v574_v14 = vld [vmem:[%s817_s3 + $0x10] ss:$8 sps:$4 sm:$0xff]   ;;  %233 = vmatprep.mubr.bf16.mxu0 %v625_v22 }
   0x2   :  { %v679_v1 = vunpack.c.l.bf16 %v538_v0  ;;  %v682_v2 = vunpack.c.h.bf16 %v538_v0  ;;  %v569_v11 = vld [vmem:[%s817_s3 + $0x4] ss:$8 sps:$4 sm:$0xff]   ;;  %v571_v12 = vld [vmem:[%s817_s3] ss:$8 sps:$4 sm:$0xff]   ;;  %v578_v17 = vld [vmem:[%s817_s3 + $0x34] ss:$8 sps:$4 sm:$0xff]  }
   0x3   :  { %201 = vmatprep.subr.bf16.mxu0 %v569_v11  ;;  %v575_v15 = vld [vmem:[%s817_s3 + $0x24] ss:$8 sps:$4 sm:$0xff]   ;;  %v577_v16 = vld [vmem:[%s817_s3 + $0x20] ss:$8 sps:$4 sm:$0xff]   ;;  %v580_v18 = vld [vmem:[%s817_s3 + $0x30] ss:$8 sps:$4 sm:$0xff]  }
   0x4   :  { %39 = vadd.xlane.f32.xlu0 %v679_v1  ;;  %202 = vmatpush1.bf16.msra.mxu0 %v571_v12  ;;  %v581_v19 = vld [vmem:[%s817_s3 + $0x44] ss:$8 sps:$4 sm:$0xff]   ;;  %v583_v20 = vld [vmem:[%s817_s3 + $0x40] ss:$8 sps:$4 sm:$0xff]   ;;  %v584_v21 = vld [vmem:[%s817_s3 + $0x54] ss:$8 sps:$4 sm:$0xff]  }
   0x5   :  { %203 = vmatprep.subr.bf16.mxu0 %v572_v13  ;;  %v586_v23 = vld [vmem:[%s817_s3 + $0x50] ss:$8 sps:$4 sm:$0xff]   ;;  %v587_v24 = vld [vmem:[%s817_s3 + $0x64] ss:$8 sps:$4 sm:$0xff]   ;;  %v589_v25 = vld [vmem:[%s817_s3 + $0x60] ss:$8 sps:$4 sm:$0xff]  }
   0x6   :  { %v590_v26 = vld [vmem:[%s817_s3 + $0x74] ss:$8 sps:$4 sm:$0xff]   ;;  %v592_v27 = vld [vmem:[%s817_s3 + $0x70] ss:$8 sps:$4 sm:$0xff]   ;;  %v593_v28 = vld [vmem:[%s818_s5 + $0x40] sm:$0xff]  }
   0x7   :  { %v594_v29 = vld [vmem:[%s818_s5] sm:$0xff]   ;;  %546 = vmatprep.subr.bf16.mxu1 %v593_v28  ;;  %v595_v30 = vld [vmem:[%s818_s5 + $0x48] sm:$0xff]   ;;  %v597_v32 = vld [vmem:[%s818_s5 + $0x50] sm:$0xff]  }
   0x8   :  { %41 = vadd.xlane.f32.xlu0 %v682_v2  ;;  %204 = vmatpush1.bf16.msra.mxu0 %v574_v14  ;;  %v596_v31 = vld [vmem:[%s818_s5 + $0x8] sm:$0xff]   ;;  %v598_v33 = vld [vmem:[%s818_s5 + $0x10] sm:$0xff]   ;;  %v599_v34 = vld [vmem:[%s818_s5 + $0x58] sm:$0xff]  }
   0x9   :  { %205 = vmatprep.subr.bf16.mxu0 %v575_v15  ;;  %547 = vmatpush3.bf16.msra.mxu1 %v594_v29  ;;  %v600_v35 = vld [vmem:[%s818_s5 + $0x18] sm:$0xff]   ;;  %v601_v36 = vld [vmem:[%s818_s5 + $0x60] sm:$0xff]   ;;  %v603_v38 = vld [vmem:[%s818_s5 + $0x68] sm:$0xff]  }
   0xa   :  { %548 = vmatprep.subr.bf16.mxu1 %v595_v30  ;;  %v602_v37 = vld [vmem:[%s818_s5 + $0x20] sm:$0xff]  }
   0xb   :  { %v496_v57 = vld [vmem:[%s819_s1] ss:$0 sm:$0xff] }
   0xc   :  { %206 = vmatpush1.bf16.msra.mxu0 %v577_v16  ;;  %v497_v61 = vld [vmem:[%s820_s2] ss:$0 sm:$0xff] }
   0xd   :  { %207 = vmatprep.subr.bf16.mxu0 %v578_v17  ;;  %549 = vmatpush3.bf16.msra.mxu1 %v596_v31  ;;  %v109_v12 = vld [vmem:[%s821_s4] sm:$0x3] }
   0xe   :  { %550 = vmatprep.subr.bf16.mxu1 %v597_v32  ;;  %v514_v31 = vld [vmem:[%s822_s6] ss:$0 sm:$0xff] }
  0x10   :  { %208 = vmatpush1.bf16.msra.mxu0 %v580_v18 }
  0x11   :  { %209 = vmatprep.subr.bf16.mxu0 %v581_v19  ;;  %551 = vmatpush3.bf16.msra.mxu1 %v598_v33 }
  0x12   :  { %552 = vmatprep.subr.bf16.mxu1 %v599_v34 }
  0x14   :  { %210 = vmatpush1.bf16.msra.mxu0 %v583_v20 }
  0x15   :  { %211 = vmatprep.subr.bf16.mxu0 %v584_v21  ;;  %553 = vmatpush3.bf16.msra.mxu1 %v600_v35 }
  0x16   :  { %554 = vmatprep.subr.bf16.mxu1 %v601_v36 }
  0x18   :  { %212 = vmatpush1.bf16.msra.mxu0 %v586_v23 }
  0x19   :  { %213 = vmatprep.subr.bf16.mxu0 %v587_v24  ;;  %555 = vmatpush3.bf16.msra.mxu1 %v602_v37 }
  0x1a   :  { %556 = vmatprep.subr.bf16.mxu1 %v603_v38 }
  0x1c   :  { %214 = vmatpush1.bf16.msra.mxu0 %v589_v25 }
  0x1d   :  { %215 = vmatprep.subr.bf16.mxu0 %v590_v26 }
  0x20   :  { %216 = vmatpush1.bf16.msra.mxu0 %v592_v27 }
  0x91   :  { %v40_v3 = vpop.xlane.xlu0 %39 }
  0x92   :  { %v44_v4 = vmul.f32 0.0078125, %v40_v3 }
  0x94   :  { %v686_v5 = vsub.f32 %v679_v1, %v44_v4  ;;  %v604_v4 = vld [vmem:[%s818_s5 + $0x28] sm:$0xff]  }
  0x95   :  { %v42_v6 = vpop.xlane.xlu0 %41  ;;  %557 = vmatpush3.bf16.msra.mxu1 %v604_v4 }
  0x96   :  { %v45_v7 = vmul.f32 0.0078125, %v42_v6  ;;  %v48_v8 = vmul.f32 %v686_v5, %v686_v5  ;;  %v606_v6 = vld [vmem:[%s818_s5 + $0x30] sm:$0xff]  }
  0x98   :  { %v691_v9 = vsub.f32 %v682_v2, %v45_v7  ;;  %50 = vadd.xlane.f32.xlu1 %v48_v8  ;;  %v607_v7 = vld [vmem:[%s818_s5 + $0x78] sm:$0xff]  }
  0x99   :  { %v608_v8 = vld [vmem:[%s818_s5 + $0x38] sm:$0xff]  }
  0x9a   :  { %v49_v10 = vmul.f32 %v691_v9, %v691_v9 }
  0x9c   :  { %52 = vadd.xlane.f32.xlu1 %v49_v10 }
 0x125   :  { %v51_v39 = vpop.xlane.xlu1 %50 }
 0x126   :  { %v54_v40 = vmul.f32 0.007874016, %v51_v39 }
 0x128   :  { %609 = vrsqrt.f32 %v54_v40  ;;  %vm58_vm0 = vcmp.eq.f32.partialorder %v54_v40, inf  ;;  %v61_v45 = vand.u32 2147483648, %v54_v40  ;;  %vm60_vm1 = vcmp.eq.f32.partialorder %v54_v40, 0.0 }
 0x129   :  { %v53_v41 = vpop.xlane.xlu1 %52 }
 0x12a   :  { %v55_v42 = vmul.f32 0.007874016, %v53_v41 }
 0x12c   :  { %611 = vrsqrt.f32 %v55_v42  ;;  %vm65_vm2 = vcmp.eq.f32.partialorder %v55_v42, inf  ;;  %v68_v51 = vand.u32 2147483648, %v55_v42  ;;  %vm67_vm3 = vcmp.eq.f32.partialorder %v55_v42, 0.0 }
 0x132   :  { %v610_v43 = vpop.eup %609 }
 0x133   :  { %v57_v44 = vmul.f32 %v610_v43, %v54_v40 }
 0x135   :  { %v59_v46 = vsel %vm58_vm0, %v54_v40, %v57_v44 }
 0x136   :  { %v612_v47 = vpop.eup %611  ;;  %v62_v48 = vsel %vm60_vm1, %v61_v45, %v59_v46 }
 0x137   :  { %v70_v49 = vadd.f32 1e-06, %v62_v48  ;;  %v64_v50 = vmul.f32 %v612_v47, %v55_v42 }
 0x139   :  { %v66_v52 = vsel %vm65_vm2, %v55_v42, %v64_v50  ;;  %613 = vrcp.f32 %v70_v49 }
 0x13a   :  { %v69_v53 = vsel %vm67_vm3, %v68_v51, %v66_v52 }
 0x13b   :  { %v71_v54 = vadd.f32 1e-06, %v69_v53 }
 0x13d   :  { %615 = vrcp.f32 %v71_v54 }
 0x143   :  { %v614_v55 = vpop.eup %613 }
 0x144   :  { %v74_v56 = vmul.f32 %v614_v55, %v686_v5  ;;  %v605_v5 = vld [vmem:[%s818_s5 + $0x70] sm:$0xff]  }
 0x145   :  { %558 = vmatprep.subr.bf16.mxu1 %v605_v5 }
 0x146   :  { %v82_v60 = vmul.f32 %v496_v57, %v74_v56  ;;  %559 = vmatpush3.bf16.msra.mxu1 %v606_v6 }
 0x147   :  { %v616_v58 = vpop.eup %615  ;;  %560 = vmatprep.subr.bf16.mxu1 %v607_v7  ;;  %v532_v7 = vld [vmem:[%s824_s8] ss:$0 sm:$0xff] }
 0x148   :  { %v75_v59 = vmul.f32 %v616_v58, %v691_v9  ;;  %v90_v63 = vadd.f32 %v497_v61, %v82_v60  ;;  %v111_v9 = vlaneseq }
 0x14a   :  { %v83_v62 = vmul.f32 %v496_v57, %v75_v59  ;;  %561 = vmatpush3.bf16.msra.mxu1 %v608_v8  ;;  %v112_v10 = vshrl.u32 %v111_v9, 7 }
 0x14c   :  { %v91_v0 = vadd.f32 %v497_v61, %v83_v62  ;;  %v113_v11 = vsub.s32 0, %v112_v10  ;;  %v117_v13 = vsub.s32 1, %v112_v10 }
 0x14e   :  { %v92_v3 = vpack.c.bf16 %v91_v0, %v90_v63  ;;  %v114_v14 = vrot.slane %v109_v12, %v113_v11  ;;  %v118_v15 = vrot.slane %v109_v12, %v117_v13  ;;  %v531_v0 = vld [vmem:[%s823_s7] ss:$0 sm:$0xff] }
 0x150   :  { %234 = vmatmul.mubr.bf16.vlgmr.msra.gmra.mrb[0].mxu0 %v92_v3 }
 0x223   :  { %v235_v16 = vpop.f32.mrb[0].mxu0 }
 0x224   :  { %v236_v17 = vadd.f32 %v235_v16, %v114_v14  ;;  %v237_v18 = vpop.f32.mrb[1].mxu0 }
 0x225   :  { %v238_v19 = vadd.f32 %v237_v18, %v118_v15  ;;  %v239_v20 = vpop.f32.mrb[2].mxu0 }
 0x226   :  { %v240_v21 = vadd.f32 %v239_v20, %v114_v14  ;;  %v241_v22 = vpop.f32.mrb[3].mxu0  ;;  %v244_v24 = vmax.f32 %v236_v17, 0.0 }
 0x227   :  { %v242_v23 = vadd.f32 %v241_v22, %v118_v15  ;;  %v245_v26 = vmax.f32 %v238_v19, 0.0 }
 0x228   :  { %v246_v25 = vmax.f32 %v240_v21, 0.0 }
 0x229   :  { %v247_v27 = vmax.f32 %v242_v23, 0.0 }
 0x22a   :  { %v248_v28 = vpack.c.bf16 %v246_v25, %v244_v24 }
 0x22b   :  { %v249_v29 = vpack.c.bf16 %v247_v27, %v245_v26 }
 0x22d   :  { %417 = vmatprep.mubr.bf16.mxu1 %v249_v29 }
 0x22e   :  { %418 = vmatmul.mubr.bf16.vlgmr.msra.gmra.mrb[0].mxu1 %v248_v28 }
 0x301   :  { %v562_v30 = vpop.f32.mrb[0].mxu1 }
 0x302   :  { %v563_v32 = vpop.f32.mrb[1].mxu1 }
 0x303   :  { %v564_v33 = vadd.f32 %v563_v32, %v562_v30  ;;  %v565_v34 = vpop.f32.mrb[2].mxu1 }
 0x304   :  { %v566_v35 = vpop.f32.mrb[3].mxu1 }
 0x305   :  { %v420_v36 = vadd.f32 %v564_v33, %v514_v31  ;;  %v567_v37 = vadd.f32 %v566_v35, %v565_v34 }
 0x307   :  { %v423_v38 = vadd.f32 %v567_v37, %v514_v31  ;;  %v426_v39 = vadd.f32 %v679_v1, %v420_v36 }
 0x309   :  { %430 = vadd.xlane.f32.xlu0 %v426_v39  ;;  %v427_v40 = vadd.f32 %v682_v2, %v423_v38 }
 0x30b   :  { %432 = vadd.xlane.f32.xlu1 %v427_v40 }
 0x396   :  { %v431_v41 = vpop.xlane.xlu0 %430 }
 0x397   :  { %v434_v42 = vmul.f32 0.0078125, %v431_v41 }
 0x398   :  { %v433_v43 = vpop.xlane.xlu1 %432 }
 0x399   :  { %v436_v44 = vsub.f32 %v426_v39, %v434_v42  ;;  %v435_v45 = vmul.f32 0.0078125, %v433_v43 }
 0x39b   :  { %v437_v46 = vsub.f32 %v427_v40, %v435_v45  ;;  %v438_v47 = vmul.f32 %v436_v44, %v436_v44 }
 0x39d   :  { %440 = vadd.xlane.f32.xlu0 %v438_v47  ;;  %v439_v48 = vmul.f32 %v437_v46, %v437_v46 }
 0x39f   :  { %442 = vadd.xlane.f32.xlu1 %v439_v48 }
 0x42a   :  { %v441_v49 = vpop.xlane.xlu0 %440 }
 0x42b   :  { %v444_v50 = vmul.f32 0.007874016, %v441_v49 }
 0x42c   :  { %v443_v51 = vpop.xlane.xlu1 %442 }
 0x42d   :  { %617 = vrsqrt.f32 %v444_v50  ;;  %v445_v52 = vmul.f32 0.007874016, %v443_v51  ;;  %vm448_vm4 = vcmp.eq.f32.partialorder %v444_v50, inf  ;;  %v451_v2 = vand.u32 2147483648, %v444_v50 }
 0x42e   :  { %vm450_vm5 = vcmp.eq.f32.partialorder %v444_v50, 0.0 }
 0x42f   :  { %619 = vrsqrt.f32 %v445_v52  ;;  %vm455_vm6 = vcmp.eq.f32.partialorder %v445_v52, inf  ;;  %v458_v59 = vand.u32 2147483648, %v445_v52  ;;  %vm457_vm7 = vcmp.eq.f32.partialorder %v445_v52, 0.0 }
 0x437   :  { %v618_v1 = vpop.eup %617 }
 0x438   :  { %v447_v53 = vmul.f32 %v618_v1, %v444_v50 }
 0x439   :  { %v620_v54 = vpop.eup %619 }
 0x43a   :  { %v449_v55 = vsel %vm448_vm4, %v444_v50, %v447_v53  ;;  %v454_v57 = vmul.f32 %v620_v54, %v445_v52 }
 0x43b   :  { %v452_v56 = vsel %vm450_vm5, %v451_v2, %v449_v55 }
 0x43c   :  { %v460_v58 = vadd.f32 1e-06, %v452_v56  ;;  %v456_v60 = vsel %vm455_vm6, %v445_v52, %v454_v57 }
 0x43d   :  { %v459_v61 = vsel %vm457_vm7, %v458_v59, %v456_v60 }
 0x43e   :  { %621 = vrcp.f32 %v460_v58  ;;  %v461_v62 = vadd.f32 1e-06, %v459_v61 }
 0x440   :  { %623 = vrcp.f32 %v461_v62 }
 0x448   :  { %v622_v63 = vpop.eup %621 }
 0x449   :  { %v464_v3 = vmul.f32 %v622_v63, %v436_v44 }
 0x44a   :  { %v624_v4 = vpop.eup %623 }
 0x44b   :  { %v472_v5 = vmul.f32 %v531_v0, %v464_v3  ;;  %v465_v6 = vmul.f32 %v624_v4, %v437_v46 }
 0x44d   :  { %v473_v8 = vmul.f32 %v531_v0, %v465_v6  ;;  %v480_v9 = vadd.f32 %v532_v7, %v472_v5 }
 0x44f   :  { %v481_v10 = vadd.f32 %v532_v7, %v473_v8 }
 0x451   :  { %v544_v11 = vpack.c.bf16 %v481_v10, %v480_v9 }
 0x453   :  { %545 = vst [vmem:[%s825_s9] sm:$0xff] %v544_v11  }

// kernel: transformer_forward.12
= control target key start
LH: loop header
LB: loop body
LE: loop exit
PB: predicated region body
PF: predicated region fallthrough
CT: control target
= control target key end

     0   :  { %s2200_s0 = inlined_call_operand.vmem [shape: s32[2], index: 0, kind: input, shape index: {}]   ;;  %s2201_s1 = inlined_call_operand.vmem [shape: bf16[2,8,128], index: 1, kind: input, shape index: {}]   ;;  %s2202_s2 = inlined_call_operand.vmem [shape: f32[1,128], index: 2, kind: input, shape index: {}]   ;;  %s2203_s3 = inlined_call_operand.vmem [shape: f32[1,128], index: 3, kind: input, shape index: {}]   ;;  %s2204_s4 = inlined_call_operand.vmem [shape: bf16[128,128], index: 4, kind: input, shape index: {}]   ;;  %s2205_s5 = inlined_call_operand.vmem [shape: f32[1,128], index: 5, kind: input, shape index: {}]   ;;  %s2206_s6 = inlined_call_operand.vmem [shape: bf16[128,128], index: 6, kind: input, shape index: {}]   ;;  %s2207_s7 = inlined_call_operand.vmem [shape: f32[1,128], index: 7, kind: input, shape index: {}]   ;;  %s2208_s8 = inlined_call_operand.vmem [shape: bf16[128,128], index: 8, kind: input, shape index: {}]   ;;  %s2209_s9 = inlined_call_operand.vmem [shape: f32[1,128], index: 9, kind: input, shape index: {}]   ;;  %s2210_s10 = inlined_call_operand.vmem [shape: bf16[128,128], index: 10, kind: input, shape index: {}]   ;;  %s2211_s11 = inlined_call_operand.vmem [shape: f32[1,128], index: 11, kind: input, shape index: {}]   ;;  %s2212_s12 = inlined_call_operand.vmem [shape: bf16[2,8,128], index: 12, kind: output, shape index: {}]  }
   0x1   :  { %s17_s23 = sshll.u32 %s2200_s0, 4  ;;  %s18_s23 = int_to_ptr.vmem [resolvable:$true] %s17_s23 }
   0x2   :  { %s1786_s24 = scalar_lea.vmem %s18_s23, 16  ;;  %p1791_p1 = scmp.lt.s32.totalorder %s18_s23, %s18_s23 }
   0x3   :  { %p1787_p0 = scmp.ne.s32.totalorder %s18_s23, %s1786_s24  ;;  %p1792_p2 = scmp.lt.s32.totalorder %s1786_s24, %s1786_s24 }
   0x5   :  { %p1793_p3 = por %p1792_p2, %p1791_p1 }
   0x7   :  { %p1794_p4 = pnand %p1793_p3, %p1787_p0 }
   0x9   :  { %1797 = shalt.err (!%p1794_p4)  }
   0xa   :  { %s1824_s25 = smov [#allocation7]  }
   0xb   :  { %20 = dma.vmem_to_smem %s18_s23, 16, %s1824_s25, [#allocation6] }
   0xc   :  { %1810 = dma.done.wait [#allocation6], 16 }
   0xd   :  { %1811 = vsyncadd [#allocation6], 4294967280 }
   0xe   :  { %22 = sfence }
   0xf   :  { %s1898_s26 = smov 0   ;;  %s1900_s27 = smov 0  }
  0x10   :  { %s1902_s28 = smov 0  }
  0x11 LB: > { %s40_s0 = sadd.s32 1, %s1818_s27  ;;  %p1470_p5 = scmp.ge.s32.totalorder %s1822_s28, 1  ;;  %s1822_s28 = sphi %s1902_s28, %s28_s28   ;;  %s1818_s27 = sphi %s1900_s27, %s2216_s27   ;;  %s1814_s26 = sphi %s1898_s26, %s2215_s26  }
  0x12   : > { %p42_p6 = scmp.ge.s32.totalorder %s40_s0, 2  ;;  %p357_p7 = scmp.lt.s32.totalorder %s1822_s28, 3 }
  0x14   : > { %s2218_s0 = smov (%p42_p6, %s40_s0), 0  ;;  %p358_p8 = pnand %p1470_p5, %p357_p7 }
  0x15   : > { %p398_p9 = scmp.lt.s32.totalorder (!%p358_p8), %s1814_s26, 1  ;;  %v1733_v6 = vld [vmem:[%s2206_s6] sm:$0xff] (!%p358_p8)   ;;  %v1825_v7 = vmov (!%p358_p8), 0.0   ;;  %v1735_v9 = vld [vmem:[%s2206_s6 + $0x8] sm:$0xff] (!%p358_p8)   ;;  %v1737_v11 = vld [vmem:[%s2206_s6 + $0x10] sm:$0xff] (!%p358_p8)   ;;  %vm1826_vm0 = vmmov (!%p358_p8), 0  }
  0x16   : > { %361 = sbr.rel (%p358_p8) target bundleno = 3308 (0xcec), region = 64  ;;  %1575 = vmatprep.subr.bf16.mxu0 (!%p358_p8), %v1825_v7  ;;  %1595 = vmatprep.subr.bf16.mxu1 (!%p358_p8), %v1825_v7  ;;  %v1734_v8 = vld [vmem:[%s2208_s8] sm:$0xff] (!%p358_p8)   ;;  %v1736_v10 = vld [vmem:[%s2208_s8 + $0x8] sm:$0xff] (!%p358_p8)   ;;  %v1738_v12 = vld [vmem:[%s2208_s8 + $0x10] sm:$0xff] (!%p358_p8)   ;;  %vm808_vm3 = vcmask (!%p358_p8), 261120   ;;  %s1827_s24 = smov (!%p358_p8), 96  }
  0x17   : > { %1576 = vmatpush3.bf16.msra.mxu0 (!%p358_p8), %v1733_v6  ;;  %1596 = vmatpush3.bf16.msra.mxu1 (!%p358_p8), %v1734_v8  ;;  %v1739_v13 = vld [vmem:[%s2206_s6 + $0x18] sm:$0xff] (!%p358_p8)   ;;  %v1741_v15 = vld [vmem:[%s2206_s6 + $0x20] sm:$0xff] (!%p358_p8)   ;;  %v1743_v17 = vld [vmem:[%s2206_s6 + $0x28] sm:$0xff] (!%p358_p8)   ;;  %vm872_vm4 = vcmask (!%p358_p8), 1043456   ;;  %s410_s14 = sld [smem:[#allocation7 + %s1814_s26]] (!%p358_p8)  ;;  %vm856_vm6 = vcmask (!%p358_p8), 64512  }
  0x18   : > { %1577 = vmatprep.subr.bf16.mxu0 (!%p358_p8), %v1825_v7  ;;  %1597 = vmatprep.subr.bf16.mxu1 (!%p358_p8), %v1825_v7  ;;  %v1740_v14 = vld [vmem:[%s2208_s8 + $0x18] sm:$0xff] (!%p358_p8)   ;;  %v1742_v16 = vld [vmem:[%s2208_s8 + $0x20] sm:$0xff] (!%p358_p8)   ;;  %v1744_v18 = vld [vmem:[%s2208_s8 + $0x28] sm:$0xff] (!%p358_p8)   ;;  %s1829_s16 = smov (!%p358_p8), 32   ;;  %vm1039_vm7 = vcmask (!%p358_p8), 523520   ;;  %vm1156_vm8 = vcmask (!%p358_p8), 785920  }
  0x19   : > { %1591 = vmatprep.mubr.msk.bf16.mxu0 (!%p358_p8), %vm1826_vm0, %v1825_v7  ;;  %1611 = vmatprep.mubr.msk.bf16.mxu1 (!%p358_p8), %vm1826_vm0, %v1825_v7  ;;  %v1745_v19 = vld [vmem:[%s2206_s6 + $0x30] sm:$0xff] (!%p358_p8)   ;;  %v1747_v21 = vld [vmem:[%s2206_s6 + $0x38] sm:$0xff] (!%p358_p8)   ;;  %v1473_v32 = vld [vmem:[%s2202_s2] ss:$0 sm:$0xff] (!%p358_p8)  ;;  %vm1273_vm9 = vcmask (!%p358_p8), 1048320  }
  0x1a   : > { %v1746_v20 = vld [vmem:[%s2208_s8 + $0x30] sm:$0xff] (!%p358_p8)   ;;  %v1748_v22 = vld [vmem:[%s2208_s8 + $0x38] sm:$0xff] (!%p358_p8)   ;;  %v1474_v34 = vld [vmem:[%s2203_s3] ss:$0 sm:$0xff] (!%p358_p8) }
  0x1b   : > { %1578 = vmatpush3.bf16.msra.mxu0 (!%p358_p8), %v1735_v9  ;;  %1598 = vmatpush3.bf16.msra.mxu1 (!%p358_p8), %v1736_v10  ;;  %v1749_v37 = vld [vmem:[%s2204_s4] sm:$0xff] (!%p358_p8)   ;;  %v1750_v39 = vld [vmem:[%s2204_s4 + $0x8] sm:$0xff] (!%p358_p8)   ;;  %v1751_v40 = vld [vmem:[%s2204_s4 + $0x10] sm:$0xff] (!%p358_p8)   ;;  %v802_v10 = vlaneseq (!%p358_p8) }
  0x1c   : > { %1579 = vmatprep.subr.bf16.mxu0 (!%p358_p8), %v1825_v7  ;;  %1599 = vmatprep.subr.bf16.mxu1 (!%p358_p8), %v1825_v7  ;;  %v1752_v41 = vld [vmem:[%s2204_s4 + $0x18] sm:$0xff] (!%p358_p8)   ;;  %v1753_v42 = vld [vmem:[%s2204_s4 + $0x20] sm:$0xff] (!%p358_p8)   ;;  %v1754_v43 = vld [vmem:[%s2204_s4 + $0x28] sm:$0xff] (!%p358_p8)  }
  0x1d   : > { %s1920_s29 = scalar_select %p398_p9, %s1814_s26, 1  ;;  %v1755_v44 = vld [vmem:[%s2204_s4 + $0x30] sm:$0xff]   ;;  %v1756_v45 = vld [vmem:[%s2204_s4 + $0x38] sm:$0xff]   ;;  %v1475_v47 = vld [vmem:[%s2207_s7] ss:$0 sm:$0xff] }
  0x1e   : > { %v1484_v48 = vld [vmem:[%s2209_s9] ss:$0 sm:$0xff]  ;;  %s1828_s26 = smov 64  }
  0x1f   : > { %s1471_s30 = sshll.u32 %s1920_s29, 2  ;;  %1580 = vmatpush3.bf16.msra.mxu0 %v1737_v11  ;;  %1600 = vmatpush3.bf16.msra.mxu1 %v1738_v12  ;;  %v803_v11 = vand.u32 127, %v802_v10  ;;  %v804_v12 = vstv %s410_s14 }
  0x20   : > { %s1928_s15 = scalar_lea.vmem %s2201_s1, %s1471_s30  ;;  %1581 = vmatprep.subr.bf16.mxu0 %v1825_v7  ;;  %1601 = vmatprep.subr.bf16.mxu1 %v1825_v7  ;;  %s408_s25 = scalar_lea.vmem %s2212_s12, %s1471_s30 }
  0x21   : > { %v417_v0 = vld [vmem:[%s1928_s15] sm:$0xf]  ;;  %vm2077_vm5 = vcmp.lt.s32.totalorder %v803_v11, %v804_v12 }
  0x22   : > { %v418_v1 = vunpack.c.l.bf16 %v417_v0  ;;  %v1493_v0 = vld [vmem:[%s2205_s5] ss:$0 sm:$0xff] }
  0x23   : > { %1582 = vmatpush3.bf16.msra.mxu0 %v1739_v13  ;;  %1602 = vmatpush3.bf16.msra.mxu1 %v1740_v14 }
  0x24   : > { %419 = vadd.xlane.f32.xlu0 %v418_v1  ;;  %1583 = vmatprep.subr.bf16.mxu0 %v1825_v7 }
  0x25   : > { %1603 = vmatprep.subr.bf16.mxu1 %v1825_v7 }
  0x27   : > { %1584 = vmatpush3.bf16.msra.mxu0 %v1741_v15  ;;  %1604 = vmatpush3.bf16.msra.mxu1 %v1742_v16 }
  0x28   : > { %1585 = vmatprep.subr.bf16.mxu0 %v1825_v7  ;;  %1605 = vmatprep.subr.bf16.mxu1 %v1825_v7 }
  0x2b   : > { %1586 = vmatpush3.bf16.msra.mxu0 %v1743_v17  ;;  %1606 = vmatpush3.bf16.msra.mxu1 %v1744_v18 }
  0x2c   : > { %1587 = vmatprep.subr.bf16.mxu0 %v1825_v7  ;;  %1607 = vmatprep.subr.bf16.mxu1 %v1825_v7 }
  0x2f   : > { %1588 = vmatpush3.bf16.msra.mxu0 %v1745_v19  ;;  %1608 = vmatpush3.bf16.msra.mxu1 %v1746_v20 }
  0x30   : > { %1589 = vmatprep.subr.bf16.mxu0 %v1825_v7  ;;  %1609 = vmatprep.subr.bf16.mxu1 %v1825_v7 }
  0x33   : > { %1590 = vmatpush3.bf16.msra.mxu0 %v1747_v21  ;;  %1610 = vmatpush3.bf16.msra.mxu1 %v1748_v22 }
  0x34   : > { %1615 = vmatprep.subr.bf16.mxu0 %v1825_v7  ;;  %1635 = vmatprep.subr.bf16.mxu1 %v1825_v7 }
  0xb1   : > { %v420_v2 = vpop.xlane.xlu0 %419 }
  0xb2   : > { %v422_v3 = vmul.f32 0.0078125, %v420_v2 }
  0xb4   : > { %v1931_v4 = vsub.f32 %v418_v1, %v422_v3 }
  0xb6   : > { %v424_v5 = vmul.f32 %v1931_v4, %v1931_v4 }
  0xb8   : > { %425 = vadd.xlane.f32.xlu0 %v424_v5 }
 0x145   : > { %v426_v23 = vpop.xlane.xlu0 %425 }
 0x146   : > { %v427_v24 = vmul.f32 0.007874016, %v426_v23 }
 0x148   : > { %1766 = vrsqrt.f32 %v427_v24  ;;  %vm430_vm1 = vcmp.eq.f32.partialorder %v427_v24, inf  ;;  %v433_v27 = vand.u32 2147483648, %v427_v24  ;;  %vm432_vm2 = vcmp.eq.f32.partialorder %v427_v24, 0.0 }
 0x152   : > { %v1767_v25 = vpop.eup %1766 }
 0x153   : > { %v429_v26 = vmul.f32 %v1767_v25, %v427_v24 }
 0x155   : > { %v431_v28 = vsel %vm430_vm1, %v427_v24, %v429_v26 }
 0x156   : > { %v434_v29 = vsel %vm432_vm2, %v433_v27, %v431_v28 }
 0x157   : > { %v435_v30 = vadd.f32 1e-06, %v434_v29 }
 0x159   : > { %1768 = vrcp.f32 %v435_v30 }
 0x163   : > { %v1769_v31 = vpop.eup %1768 }
 0x164   : > { %v437_v33 = vmul.f32 %v1769_v31, %v1931_v4 }
 0x166   : > { %v444_v35 = vmul.f32 %v1473_v32, %v437_v33 }
 0x168   : > { %v451_v36 = vadd.f32 %v1474_v34, %v444_v35 }
 0x16a   : > { %v452_v38 = vpack.c.bf16 %v451_v36, %v451_v36 }
 0x16c   : > { %453 = vst [vmem:[#allocation2] sm:$0xf] %v452_v38  ;;  %1592 = vmatmul.mubr.bf16.vlgmr.msra.gmra.mrb[0].mxu0 %v452_v38  ;;  %1612 = vmatmul.mubr.bf16.vlgmr.msra.gmra.mrb[0].mxu1 %v452_v38 }
 0x16d   : > { %1616 = vmatpush3.bf16.msra.mxu0 %v1749_v37  ;;  %1631 = vmatprep.mubr.msk.bf16.mxu0 %vm1826_vm0, %v1825_v7 }
 0x16e   : > { %1617 = vmatprep.subr.bf16.mxu0 %v1825_v7  ;;  %1637 = vmatprep.mubr.msk.bf16.mxu1 %vm1826_vm0, %v1825_v7 }
 0x171   : > { %1618 = vmatpush3.bf16.msra.mxu0 %v1750_v39 }
 0x172   : > { %1619 = vmatprep.subr.bf16.mxu0 %v1825_v7 }
 0x173   : > { %v689_v46 = vld [vmem:[#allocation2] sm:$0xf] }
 0x175   : > { %1620 = vmatpush3.bf16.msra.mxu0 %v1751_v40 }
 0x176   : > { %1621 = vmatprep.subr.bf16.mxu0 %v1825_v7 }
 0x179   : > { %1622 = vmatpush3.bf16.msra.mxu0 %v1752_v41 }
 0x17a   : > { %1623 = vmatprep.subr.bf16.mxu0 %v1825_v7 }
 0x17d   : > { %1624 = vmatpush3.bf16.msra.mxu0 %v1753_v42 }
 0x17e   : > { %1625 = vmatprep.subr.bf16.mxu0 %v1825_v7 }
 0x181   : > { %1626 = vmatpush3.bf16.msra.mxu0 %v1754_v43 }
 0x182   : > { %1627 = vmatprep.subr.bf16.mxu0 %v1825_v7 }
 0x185   : > { %1628 = vmatpush3.bf16.msra.mxu0 %v1755_v44 }
 0x186   : > { %1629 = vmatprep.subr.bf16.mxu0 %v1825_v7 }
 0x189   : > { %1630 = vmatpush3.bf16.msra.mxu0 %v1756_v45 }
 0x18a   : > { %1683 = vmatprep.subr.bf16.mxu0 %v1825_v7 }
 0x18c   : > { %1632 = vmatmul.mubr.bf16.vlgmr.msra.gmra.mrb[4].mxu0 %v689_v46 }
 0x18d   : > { %1699 = vmatprep.mubr.msk.bf16.mxu0 %vm1826_vm0, %v1825_v7 }
 0x23f   : > { %v559_v49 = vpop.f32.mrb[0].mxu0  ;;  %v672_v50 = vpop.f32.mrb[0].mxu1 }
 0x240   : > { %v560_v51 = vadd.f32 %v1475_v47, %v559_v49  ;;  %v673_v52 = vadd.f32 %v1484_v48, %v672_v50  ;;  %v1593_v53 = vpop.f32.mrb[1].mxu0  ;;  %v1613_v54 = vpop.f32.mrb[1].mxu1 }
 0x241   : > { %v562_v55 = vpop.f32.mrb[2].mxu0  ;;  %v675_v56 = vpop.f32.mrb[2].mxu1 }
 0x242   : > { %v565_v57 = vpack.c.bf16 %v560_v51, %v560_v51  ;;  %v678_v58 = vpack.c.bf16 %v673_v52, %v673_v52  ;;  %v1594_v59 = vpop.f32.mrb[3].mxu0  ;;  %v1614_v60 = vpop.f32.mrb[3].mxu1 }
 0x244   : > { %566 = vst [vmem:[#allocation3] sm:$0xf] %v565_v57  ;;  %679 = vst [vmem:[#allocation4] sm:$0xf] %v678_v58 }
 0x24b   : > { %v806_v61 = vld [vmem:[#allocation3] sm:$0xf]  ;;  %v2065_v5 = vld [vmem:[#allocation4] sm:$0xf] }
 0x24c   : > { %v813_v62 = vsel %vm808_vm3, %v806_v61, 0  ;;  %v2057_v63 = vcombine.low %v806_v61, %v806_v61  ;;  %v874_v9 = vsel %vm872_vm4, %v2065_v5, 0  ;;  %v2106_v47 = vcombine.low %v2065_v5, %v2065_v5 }
 0x24d   : > { %1636 = vmatpush3.bf16.xpose.msra.mxu1 %v813_v62 }
 0x24e   : > { %923 = vrot.lane.b32.xlu0 %v2057_v63, %s1827_s24  ;;  %1641 = vmatprep.subr.bf16.mxu1 %v1825_v7 }
 0x25f   : > { %v795_v1 = vpop.f32.mrb[4].mxu0 }
 0x260   : > { %v796_v2 = vadd.f32 %v1493_v0, %v795_v1  ;;  %v1633_v3 = vpop.f32.mrb[5].mxu0 }
 0x261   : > { %v798_v4 = vpop.f32.mrb[6].mxu0 }
 0x262   : > { %v2067_v6 = vpack.c.bf16 %v796_v2, %v796_v2  ;;  %v1634_v8 = vpop.f32.mrb[7].mxu0 }
 0x264   : > { %1638 = vmatmul.mubr.msk.bf16.vlgmr.msra.gmra.mrb[4].mxu1 %vm808_vm3, %v2067_v6 }
 0x265   : > { %1642 = vmatpush3.bf16.msra.mxu1 %v874_v9  ;;  %1643 = vmatprep.mubr.msk.bf16.mxu1 %vm1826_vm0, %v1825_v7 }
 0x266   : > { %1647 = vmatprep.subr.bf16.mxu1 %v1825_v7 }
 0x2c0   : > { %v924_v28 = vpop.permute.xlu0 %923 }
 0x2c1   : > { %v929_v30 = vsel %vm808_vm3, %v924_v28, 0 }
 0x337   : > { %v849_v14 = vpop.f32.mrb[4].mxu1 }
 0x338   : > { %v855_v15 = vsel %vm2077_vm5, %v849_v14, -1e+09  ;;  %v1639_v16 = vpop.f32.mrb[5].mxu1 }
 0x339   : > { %v852_v17 = vpop.f32.mrb[6].mxu1  ;;  %v857_v18 = vsel %vm856_vm6, %v855_v15, -inf }
 0x33a   : > { %858 = vmax.xlane.f32.xlu1 %v857_v18  ;;  %v1640_v19 = vpop.f32.mrb[7].mxu1 }
 0x3c7   : > { %v859_v20 = vpop.xlane.xlu1 %858 }
 0x3c8   : > { %v860_v21 = vsub.f32 %v855_v15, %v859_v20 }
 0x3ca   : > { %v861_v22 = vmul.f32 1.442695, %v860_v21 }
 0x3cc   : > { %1770 = vpow2.f32 %v861_v22 }
 0x3d6   : > { %v1771_v23 = vpop.eup %1770 }
 0x3d7   : > { %v863_v24 = vsel %vm856_vm6, %v1771_v23, 0.0 }
 0x3d8   : > { %864 = vadd.xlane.f32.xlu1 %v863_v24 }
 0x3e9   : > { %918 = vrot.lane.b32.xlu1 %v2067_v6, %s1827_s24 }
 0x465   : > { %v865_v25 = vpop.xlane.xlu1 %864 }
 0x466   : > { %1772 = vrcp.f32 %v865_v25 }
 0x469   : > { %v919_v31 = vpop.permute.xlu1 %918 }
 0x470   : > { %v1773_v26 = vpop.eup %1772 }
 0x471   : > { %v867_v27 = vmul.f32 %v1773_v26, %v1771_v23 }
 0x473   : > { %v868_v29 = vpack.c.bf16 %v867_v27, %v867_v27 }
 0x475   : > { %1644 = vmatmul.mubr.msk.bf16.vlgmr.msra.gmra.mrb[8].mxu1 %vm856_vm6, %v868_v29 }
 0x476   : > { %1648 = vmatpush3.bf16.xpose.msra.mxu1 %v929_v30  ;;  %1649 = vmatprep.mubr.msk.bf16.mxu1 %vm1826_vm0, %v1825_v7 }
 0x477   : > { %1653 = vmatprep.subr.bf16.mxu1 %v1825_v7 }
 0x47d   : > { %1650 = vmatmul.mubr.msk.bf16.vlgmr.msra.gmra.mrb[12].mxu1 %vm808_vm3, %v919_v31 }
 0x47e   : > { %1655 = vmatprep.mubr.msk.bf16.mxu1 %vm1826_vm0, %v1825_v7 }
 0x548   : > { %v910_v32 = vpop.f32.mrb[8].mxu1 }
 0x549   : > { %916 = vst.msk [vmem:[#allocation5] sm:$0xff] %vm808_vm3, %v910_v32  ;;  %v1645_v33 = vpop.f32.mrb[9].mxu1 }
 0x54a   : > { %v913_v34 = vpop.f32.mrb[10].mxu1 }
 0x54b   : > { %v1646_v35 = vpop.f32.mrb[11].mxu1 }
 0x550   : > { %v965_v36 = vpop.f32.mrb[12].mxu1 }
 0x551   : > { %v971_v37 = vsel %vm2077_vm5, %v965_v36, -1e+09  ;;  %v1651_v38 = vpop.f32.mrb[13].mxu1 }
 0x552   : > { %v968_v39 = vpop.f32.mrb[14].mxu1  ;;  %v972_v40 = vsel %vm856_vm6, %v971_v37, -inf }
 0x553   : > { %973 = vmax.xlane.f32.xlu1 %v972_v40  ;;  %v1652_v41 = vpop.f32.mrb[15].mxu1 }
 0x554   : > { %v1758_v41 = vld [vmem:[%s2210_s10] sm:$0xff]  }
 0x555   : > { %1684 = vmatpush3.bf16.msra.mxu0 %v1758_v41 }
 0x556   : > { %1685 = vmatprep.subr.bf16.mxu0 %v1825_v7 }
 0x564   : > { %1043 = vrot.lane.b32.xlu1 %v2057_v63, %s1828_s26 }
 0x568   : > { %1041 = vrot.lane.b32.xlu1 %v2067_v6, %s1828_s26 }
 0x5e0   : > { %v974_v42 = vpop.xlane.xlu1 %973 }
 0x5e1   : > { %v975_v43 = vsub.f32 %v971_v37, %v974_v42  ;;  %v1759_v42 = vld [vmem:[%s2210_s10 + $0x8] sm:$0xff]  }
 0x5e2   : > { %1686 = vmatpush3.bf16.msra.mxu0 %v1759_v42 }
 0x5e3   : > { %v976_v44 = vmul.f32 1.442695, %v975_v43  ;;  %v1760_v43 = vld [vmem:[%s2210_s10 + $0x10] sm:$0xff]   ;;  %1687 = vmatprep.subr.bf16.mxu0 %v1825_v7 }
 0x5e4   : > { %v1044_v53 = vpop.permute.xlu1 %1043 }
 0x5e5   : > { %1774 = vpow2.f32 %v976_v44  ;;  %v1049_v55 = vsel %vm808_vm3, %v1044_v53, 0  ;;  %v1761_v44 = vld [vmem:[%s2210_s10 + $0x18] sm:$0xff]  }
 0x5e6   : > { %1688 = vmatpush3.bf16.msra.mxu0 %v1760_v43 }
 0x5e7   : > { %1689 = vmatprep.subr.bf16.mxu0 %v1825_v7 }
 0x5e8   : > { %v1042_v56 = vpop.permute.xlu1 %1041 }
 0x5ea   : > { %1690 = vmatpush3.bf16.msra.mxu0 %v1761_v44 }
 0x5eb   : > { %1691 = vmatprep.subr.bf16.mxu0 %v1825_v7 }
 0x5ef   : > { %v1775_v45 = vpop.eup %1774 }
 0x5f0   : > { %v978_v46 = vsel %vm856_vm6, %v1775_v45, 0.0 }
 0x5f1   : > { %979 = vadd.xlane.f32.xlu0 %v978_v46  ;;  %v1763_v46 = vld [vmem:[%s2210_s10 + $0x28] sm:$0xff]  }
 0x607   : > { %987 = vrot.lane.b32.xlu0 %v2106_v47, %s1827_s24 }
 0x67e   : > { %v980_v48 = vpop.xlane.xlu0 %979 }
 0x67f   : > { %1776 = vrcp.f32 %v980_v48  ;;  %v1765_v48 = vld [vmem:[%s2210_s10 + $0x38] sm:$0xff]  }
 0x682   : > { %v988_v49 = vpop.permute.xlu0 %987 }
 0x683   : > { %v993_v50 = vsel %vm872_vm4, %v988_v49, 0 }
 0x684   : > { %1654 = vmatpush3.bf16.msra.mxu1 %v993_v50 }
 0x685   : > { %1659 = vmatprep.subr.bf16.mxu1 %v1825_v7 }
 0x689   : > { %v1777_v51 = vpop.eup %1776 }
 0x68a   : > { %v982_v52 = vmul.f32 %v1777_v51, %v1775_v45  ;;  %v1762_v45 = vld [vmem:[%s2210_s10 + $0x20] sm:$0xff]  }
 0x68b   : > { %1692 = vmatpush3.bf16.msra.mxu0 %v1762_v45 }
 0x68c   : > { %v983_v54 = vpack.c.bf16 %v982_v52, %v982_v52  ;;  %1693 = vmatprep.subr.bf16.mxu0 %v1825_v7 }
 0x68e   : > { %1656 = vmatmul.mubr.msk.bf16.vlgmr.msra.gmra.mrb[16].mxu1 %vm856_vm6, %v983_v54 }
 0x68f   : > { %1660 = vmatpush3.bf16.xpose.msra.mxu1 %v1049_v55  ;;  %1661 = vmatprep.mubr.msk.bf16.mxu1 %vm1826_vm0, %v1825_v7 }
 0x690   : > { %1665 = vmatprep.subr.bf16.mxu1 %v1825_v7  ;;  %1694 = vmatpush3.bf16.msra.mxu0 %v1763_v46 }
 0x691   : > { %1695 = vmatprep.subr.bf16.mxu0 %v1825_v7 }
 0x696   : > { %1662 = vmatmul.mubr.msk.bf16.vlgmr.msra.gmra.mrb[20].mxu1 %vm808_vm3, %v1042_v56  ;;  %v685_v56 = vld [vmem:[%s1928_s15] sm:$0xf] }
 0x697   : > { %1667 = vmatprep.mubr.msk.bf16.mxu1 %vm1826_vm0, %v1825_v7 }
 0x761   : > { %v1029_v57 = vpop.f32.mrb[16].mxu1 }
 0x762   : > { %v1657_v58 = vpop.f32.mrb[17].mxu1 }
 0x763   : > { %v1032_v59 = vpop.f32.mrb[18].mxu1 }
 0x764   : > { %v1658_v60 = vpop.f32.mrb[19].mxu1 }
 0x769   : > { %v1085_v61 = vpop.f32.mrb[20].mxu1 }
 0x76a   : > { %v1091_v62 = vsel %vm2077_vm5, %v1085_v61, -1e+09  ;;  %v1663_v0 = vpop.f32.mrb[21].mxu1 }
 0x76b   : > { %v1088_v1 = vpop.f32.mrb[22].mxu1  ;;  %v1092_v2 = vsel %vm856_vm6, %v1091_v62, -inf }
 0x76c   : > { %1093 = vmax.xlane.f32.xlu1 %v1092_v2  ;;  %v1664_v3 = vpop.f32.mrb[23].mxu1 }
 0x77d   : > { %1160 = vrot.lane.b32.xlu1 %v2057_v63, %s1829_s16 }
 0x781   : > { %1158 = vrot.lane.b32.xlu1 %v2067_v6, %s1829_s16 }
 0x7f9   : > { %v1094_v4 = vpop.xlane.xlu1 %1093 }
 0x7fa   : > { %v1095_v5 = vsub.f32 %v1091_v62, %v1094_v4 }
 0x7fc   : > { %v1096_v8 = vmul.f32 1.442695, %v1095_v5 }
 0x7fd   : > { %v1161_v15 = vpop.permute.xlu1 %1160 }
 0x7fe   : > { %1778 = vpow2.f32 %v1096_v8  ;;  %v1166_v17 = vsel %vm808_vm3, %v1161_v15, 0 }
 0x801   : > { %v1159_v18 = vpop.permute.xlu1 %1158 }
 0x808   : > { %v1779_v9 = vpop.eup %1778 }
 0x809   : > { %v1098_v10 = vsel %vm856_vm6, %v1779_v9, 0.0 }
 0x80a   : > { %1099 = vadd.xlane.f32.xlu0 %v1098_v10 }
 0x820   : > { %1104 = vrot.lane.b32.xlu0 %v2106_v47, %s1828_s26 }
 0x897   : > { %v1100_v11 = vpop.xlane.xlu0 %1099 }
 0x898   : > { %1780 = vrcp.f32 %v1100_v11 }
 0x89b   : > { %v1105_v12 = vpop.permute.xlu0 %1104 }
 0x89c   : > { %v1110_v14 = vsel %vm872_vm4, %v1105_v12, 0 }
 0x89d   : > { %1666 = vmatpush3.bf16.msra.mxu1 %v1110_v14 }
 0x89e   : > { %1671 = vmatprep.subr.bf16.mxu1 %v1825_v7 }
 0x8a2   : > { %v1781_v63 = vpop.eup %1780 }
 0x8a3   : > { %v1102_v6 = vmul.f32 %v1781_v63, %v1779_v9 }
 0x8a5   : > { %v1103_v16 = vpack.c.bf16 %v1102_v6, %v1102_v6 }
 0x8a7   : > { %1668 = vmatmul.mubr.msk.bf16.vlgmr.msra.gmra.mrb[24].mxu1 %vm856_vm6, %v1103_v16 }
 0x8a8   : > { %1672 = vmatpush3.bf16.xpose.msra.mxu1 %v1166_v17  ;;  %1673 = vmatprep.mubr.msk.bf16.mxu1 %vm1826_vm0, %v1825_v7 }
 0x8a9   : > { %1677 = vmatprep.subr.bf16.mxu1 %v1825_v7 }
 0x8af   : > { %1674 = vmatmul.mubr.msk.bf16.vlgmr.msra.gmra.mrb[28].mxu1 %vm808_vm3, %v1159_v18 }
 0x8b0   : > { %1679 = vmatprep.mubr.msk.bf16.mxu1 %vm1826_vm0, %v1825_v7 }
 0x97a   : > { %v1146_v19 = vpop.f32.mrb[24].mxu1 }
 0x97b   : > { %v1669_v20 = vpop.f32.mrb[25].mxu1 }
 0x97c   : > { %v1149_v21 = vpop.f32.mrb[26].mxu1 }
 0x97d   : > { %v1670_v22 = vpop.f32.mrb[27].mxu1 }
 0x982   : > { %v1202_v23 = vpop.f32.mrb[28].mxu1 }
 0x983   : > { %v1208_v24 = vsel %vm2077_vm5, %v1202_v23, -1e+09  ;;  %v1675_v25 = vpop.f32.mrb[29].mxu1 }
 0x984   : > { %v1205_v26 = vpop.f32.mrb[30].mxu1  ;;  %v1209_v27 = vsel %vm856_vm6, %v1208_v24, -inf }
 0x985   : > { %1210 = vmax.xlane.f32.xlu0 %v1209_v27  ;;  %v1676_v28 = vpop.f32.mrb[31].mxu1 }
 0x99b   : > { %1221 = vrot.lane.b32.xlu0 %v2106_v47, %s1829_s16  ;;  %v1764_v47 = vld [vmem:[%s2210_s10 + $0x30] sm:$0xff]  }
 0x99c   : > { %1696 = vmatpush3.bf16.msra.mxu0 %v1764_v47 }
 0x99d   : > { %1697 = vmatprep.subr.bf16.mxu0 %v1825_v7  ;;  %v686_v7 = vunpack.c.l.bf16 %v685_v56 }
 0x99f   : > { %1153 = vrot.lane.b32.xlu0 %v1146_v19, %s1828_s26 }
 0x9a0   : > { %1698 = vmatpush3.bf16.msra.mxu0 %v1765_v48 }
 0xa12   : > { %v1211_v29 = vpop.xlane.xlu0 %1210 }
 0xa13   : > { %v1212_v30 = vsub.f32 %v1208_v24, %v1211_v29 }
 0xa15   : > { %v1213_v31 = vmul.f32 1.442695, %v1212_v30 }
 0xa16   : > { %v1222_v32 = vpop.permute.xlu0 %1221 }
 0xa17   : > { %1782 = vpow2.f32 %v1213_v31  ;;  %v1227_v33 = vsel %vm872_vm4, %v1222_v32, 0 }
 0xa18   : > { %1678 = vmatpush3.bf16.msra.mxu1 %v1227_v33 }
 0xa1a   : > { %v1154_v37 = vpop.permute.xlu0 %1153 }
 0xa21   : > { %v1783_v13 = vpop.eup %1782 }
 0xa22   : > { %v1215_v34 = vsel %vm856_vm6, %v1783_v13, 0.0 }
 0xa23   : > { %1216 = vadd.xlane.f32.xlu1 %v1215_v34 }
 0xa34   : > { %1036 = vrot.lane.b32.xlu1 %v1029_v57, %s1829_s16  ;;  %v1512_v57 = vld [vmem:[%s2211_s11] ss:$0 sm:$0xff] }
 0xab0   : > { %v1217_v35 = vpop.xlane.xlu1 %1216 }
 0xab1   : > { %1784 = vrcp.f32 %v1217_v35 }
 0xab4   : > { %v1037_v36 = vpop.permute.xlu1 %1036 }
 0xab5   : > { %1040 = vst.msk [vmem:[#allocation5] sm:$0xff] %vm1039_vm7, %v1037_v36 }
 0xab6   : > { %1157 = vst.msk [vmem:[#allocation5] sm:$0xff] %vm1156_vm8, %v1154_v37 }
 0xabb   : > { %v1785_v38 = vpop.eup %1784 }
 0xabc   : > { %v1219_v39 = vmul.f32 %v1785_v38, %v1783_v13 }
 0xabe   : > { %v1220_v40 = vpack.c.bf16 %v1219_v39, %v1219_v39 }
 0xac0   : > { %1680 = vmatmul.mubr.msk.bf16.vlgmr.msra.gmra.mrb[32].mxu1 %vm856_vm6, %v1220_v40 }
 0xb93   : > { %v1263_v49 = vpop.f32.mrb[32].mxu1 }
 0xb94   : > { %1270 = vrot.lane.b32.xlu1 %v1263_v49, %s1827_s24  ;;  %v1681_v50 = vpop.f32.mrb[33].mxu1 }
 0xb95   : > { %v1266_v51 = vpop.f32.mrb[34].mxu1 }
 0xb96   : > { %v1682_v52 = vpop.f32.mrb[35].mxu1 }
 0xc06   : > { %v1271_v53 = vpop.permute.xlu1 %1270 }
 0xc07   : > { %1274 = vst.msk [vmem:[#allocation5] sm:$0xff] %vm1273_vm9, %v1271_v53 }
 0xc0e   : > { %v1275_v54 = vld [vmem:[#allocation5] sm:$0xff] }
 0xc0f   : > { %v1276_v55 = vpack.c.bf16 %v1275_v54, %v1275_v54 }
 0xc11   : > { %1700 = vmatmul.mubr.bf16.vlgmr.msra.gmra.mrb[8].mxu0 %v1276_v55 }
 0xce4   : > { %v1382_v58 = vpop.f32.mrb[8].mxu0 }
 0xce5   : > { %v1383_v59 = vadd.f32 %v1512_v57, %v1382_v58  ;;  %v1701_v60 = vpop.f32.mrb[9].mxu0 }
 0xce6   : > { %v1385_v61 = vpop.f32.mrb[10].mxu0 }
 0xce7   : > { %v1388_v62 = vadd.f32 %v1383_v59, %v686_v7  ;;  %v1702_v0 = vpop.f32.mrb[11].mxu0 }
 0xce9   : > { %v1389_v1 = vpack.c.bf16 %v1388_v62, %v1388_v62 }
 0xceb   : > { %1390 = vst [vmem:[%s408_s25] sm:$0xf] %v1389_v1 }
 0xcec PF: > { %s28_s28 = sadd.s32 1, %s1822_s28   ;;  %s2215_s26 = smov %s1818_s27 }
 0xced   : > { %p25_p10 = scmp.ge.s32.totalorder %s28_s28, 4   ;;  %s2216_s27 = smov %s2218_s0 }
 0xcef   :  { %27 = sbr.rel (!%p25_p10) target bundleno = 17 (0x11), region = 100 }

// kernel: transformer_forward.16
= control target key start
LH: loop header
LB: loop body
LE: loop exit
PB: predicated region body
PF: predicated region fallthrough
CT: control target
= control target key end

     0   :  { %s2206_s0 = inlined_call_operand.vmem [shape: s32[2], index: 0, kind: input, shape index: {}]   ;;  %s2207_s1 = inlined_call_operand.vmem [shape: bf16[2,8,128], index: 1, kind: input, shape index: {}]   ;;  %s2208_s2 = inlined_call_operand.vmem [shape: f32[1,128], index: 2, kind: input, shape index: {}]   ;;  %s2209_s3 = inlined_call_operand.vmem [shape: f32[1,128], index: 3, kind: input, shape index: {}]   ;;  %s2210_s4 = inlined_call_operand.vmem [shape: bf16[128,128], index: 4, kind: input, shape index: {}]   ;;  %s2211_s5 = inlined_call_operand.vmem [shape: f32[1,128], index: 5, kind: input, shape index: {}]   ;;  %s2212_s6 = inlined_call_operand.vmem [shape: bf16[128,128], index: 6, kind: input, shape index: {}]   ;;  %s2213_s7 = inlined_call_operand.vmem [shape: f32[1,128], index: 7, kind: input, shape index: {}]   ;;  %s2214_s8 = inlined_call_operand.vmem [shape: bf16[128,128], index: 8, kind: input, shape index: {}]   ;;  %s2215_s9 = inlined_call_operand.vmem [shape: f32[1,128], index: 9, kind: input, shape index: {}]   ;;  %s2216_s10 = inlined_call_operand.vmem [shape: bf16[128,128], index: 10, kind: input, shape index: {}]   ;;  %s2217_s11 = inlined_call_operand.vmem [shape: f32[1,128], index: 11, kind: input, shape index: {}]   ;;  %s2218_s12 = inlined_call_operand.vmem [shape: bf16[2,8,128], index: 12, kind: output, shape index: {}]  }
   0x1   :  { %s17_s23 = sshll.u32 %s2206_s0, 4  ;;  %s18_s23 = int_to_ptr.vmem [resolvable:$true] %s17_s23 }
   0x2   :  { %s1792_s24 = scalar_lea.vmem %s18_s23, 16  ;;  %p1797_p1 = scmp.lt.s32.totalorder %s18_s23, %s18_s23 }
   0x3   :  { %p1793_p0 = scmp.ne.s32.totalorder %s18_s23, %s1792_s24  ;;  %p1798_p2 = scmp.lt.s32.totalorder %s1792_s24, %s1792_s24 }
   0x5   :  { %p1799_p3 = por %p1798_p2, %p1797_p1 }
   0x7   :  { %p1800_p4 = pnand %p1799_p3, %p1793_p0 }
   0x9   :  { %1803 = shalt.err (!%p1800_p4)  }
   0xa   :  { %s1830_s25 = smov [#allocation7]  }
   0xb   :  { %20 = dma.vmem_to_smem %s18_s23, 16, %s1830_s25, [#allocation6] }
   0xc   :  { %1816 = dma.done.wait [#allocation6], 16 }
   0xd   :  { %1817 = vsyncadd [#allocation6], 4294967280 }
   0xe   :  { %22 = sfence }
   0xf   :  { %s1904_s26 = smov 0   ;;  %s1906_s27 = smov 0  }
  0x10   :  { %s1908_s28 = smov 0  }
  0x11 LB: > { %s40_s0 = sadd.s32 1, %s1824_s27  ;;  %p1476_p5 = scmp.ge.s32.totalorder %s1828_s28, 1  ;;  %s1828_s28 = sphi %s1908_s28, %s28_s28   ;;  %s1824_s27 = sphi %s1906_s27, %s2222_s27   ;;  %s1820_s26 = sphi %s1904_s26, %s2221_s26  }
  0x12   : > { %p42_p6 = scmp.ge.s32.totalorder %s40_s0, 2  ;;  %p357_p7 = scmp.lt.s32.totalorder %s1828_s28, 3 }
  0x14   : > { %s2224_s0 = smov (%p42_p6, %s40_s0), 0  ;;  %p358_p8 = pnand %p1476_p5, %p357_p7 }
  0x15   : > { %p398_p9 = scmp.lt.s32.totalorder (!%p358_p8), %s1820_s26, 1  ;;  %v1739_v6 = vld [vmem:[%s2212_s6] sm:$0xff] (!%p358_p8)   ;;  %v1831_v7 = vmov (!%p358_p8), 0.0   ;;  %v1741_v9 = vld [vmem:[%s2212_s6 + $0x8] sm:$0xff] (!%p358_p8)   ;;  %v1743_v11 = vld [vmem:[%s2212_s6 + $0x10] sm:$0xff] (!%p358_p8)   ;;  %vm1832_vm0 = vmmov (!%p358_p8), 0  }
  0x16   : > { %361 = sbr.rel (%p358_p8) target bundleno = 3308 (0xcec), region = 64  ;;  %1581 = vmatprep.subr.bf16.mxu0 (!%p358_p8), %v1831_v7  ;;  %1601 = vmatprep.subr.bf16.mxu1 (!%p358_p8), %v1831_v7  ;;  %v1740_v8 = vld [vmem:[%s2214_s8] sm:$0xff] (!%p358_p8)   ;;  %v1742_v10 = vld [vmem:[%s2214_s8 + $0x8] sm:$0xff] (!%p358_p8)   ;;  %v1744_v12 = vld [vmem:[%s2214_s8 + $0x10] sm:$0xff] (!%p358_p8)   ;;  %vm814_vm3 = vcmask (!%p358_p8), 261120   ;;  %s1833_s24 = smov (!%p358_p8), 96  }
  0x17   : > { %1582 = vmatpush3.bf16.msra.mxu0 (!%p358_p8), %v1739_v6  ;;  %1602 = vmatpush3.bf16.msra.mxu1 (!%p358_p8), %v1740_v8  ;;  %v1745_v13 = vld [vmem:[%s2212_s6 + $0x18] sm:$0xff] (!%p358_p8)   ;;  %v1747_v15 = vld [vmem:[%s2212_s6 + $0x20] sm:$0xff] (!%p358_p8)   ;;  %v1749_v17 = vld [vmem:[%s2212_s6 + $0x28] sm:$0xff] (!%p358_p8)   ;;  %vm878_vm4 = vcmask (!%p358_p8), 1043456   ;;  %s410_s14 = sld [smem:[#allocation7 + %s1820_s26]] (!%p358_p8)  ;;  %vm862_vm8 = vcmask (!%p358_p8), 64512  }
  0x18   : > { %1583 = vmatprep.subr.bf16.mxu0 (!%p358_p8), %v1831_v7  ;;  %1603 = vmatprep.subr.bf16.mxu1 (!%p358_p8), %v1831_v7  ;;  %v1746_v14 = vld [vmem:[%s2214_s8 + $0x18] sm:$0xff] (!%p358_p8)   ;;  %v1748_v16 = vld [vmem:[%s2214_s8 + $0x20] sm:$0xff] (!%p358_p8)   ;;  %v1750_v18 = vld [vmem:[%s2214_s8 + $0x28] sm:$0xff] (!%p358_p8)   ;;  %s1835_s16 = smov (!%p358_p8), 32   ;;  %vm1045_vm9 = vcmask (!%p358_p8), 523520   ;;  %vm1162_vm10 = vcmask (!%p358_p8), 785920  }
  0x19   : > { %1597 = vmatprep.mubr.msk.bf16.mxu0 (!%p358_p8), %vm1832_vm0, %v1831_v7  ;;  %1617 = vmatprep.mubr.msk.bf16.mxu1 (!%p358_p8), %vm1832_vm0, %v1831_v7  ;;  %v1751_v19 = vld [vmem:[%s2212_s6 + $0x30] sm:$0xff] (!%p358_p8)   ;;  %v1753_v21 = vld [vmem:[%s2212_s6 + $0x38] sm:$0xff] (!%p358_p8)   ;;  %v1479_v32 = vld [vmem:[%s2208_s2] ss:$0 sm:$0xff] (!%p358_p8)  ;;  %vm1279_vm11 = vcmask (!%p358_p8), 1048320  }
  0x1a   : > { %v1752_v20 = vld [vmem:[%s2214_s8 + $0x30] sm:$0xff] (!%p358_p8)   ;;  %v1754_v22 = vld [vmem:[%s2214_s8 + $0x38] sm:$0xff] (!%p358_p8)   ;;  %v1480_v34 = vld [vmem:[%s2209_s3] ss:$0 sm:$0xff] (!%p358_p8) }
  0x1b   : > { %1584 = vmatpush3.bf16.msra.mxu0 (!%p358_p8), %v1741_v9  ;;  %1604 = vmatpush3.bf16.msra.mxu1 (!%p358_p8), %v1742_v10  ;;  %v1755_v37 = vld [vmem:[%s2210_s4] sm:$0xff] (!%p358_p8)   ;;  %v1756_v39 = vld [vmem:[%s2210_s4 + $0x8] sm:$0xff] (!%p358_p8)   ;;  %v1757_v40 = vld [vmem:[%s2210_s4 + $0x10] sm:$0xff] (!%p358_p8)   ;;  %v802_v10 = vlaneseq (!%p358_p8) }
  0x1c   : > { %1585 = vmatprep.subr.bf16.mxu0 (!%p358_p8), %v1831_v7  ;;  %1605 = vmatprep.subr.bf16.mxu1 (!%p358_p8), %v1831_v7  ;;  %v1758_v41 = vld [vmem:[%s2210_s4 + $0x18] sm:$0xff] (!%p358_p8)   ;;  %v1759_v42 = vld [vmem:[%s2210_s4 + $0x20] sm:$0xff] (!%p358_p8)   ;;  %v1760_v43 = vld [vmem:[%s2210_s4 + $0x28] sm:$0xff] (!%p358_p8)  }
  0x1d   : > { %s1926_s29 = scalar_select %p398_p9, %s1820_s26, 1  ;;  %v1761_v44 = vld [vmem:[%s2210_s4 + $0x30] sm:$0xff]   ;;  %v1762_v45 = vld [vmem:[%s2210_s4 + $0x38] sm:$0xff]   ;;  %v1481_v47 = vld [vmem:[%s2213_s7] ss:$0 sm:$0xff] }
  0x1e   : > { %v1490_v48 = vld [vmem:[%s2215_s9] ss:$0 sm:$0xff]  ;;  %s1834_s26 = smov 64  }
  0x1f   : > { %s1477_s30 = sshll.u32 %s1926_s29, 2  ;;  %1586 = vmatpush3.bf16.msra.mxu0 %v1743_v11  ;;  %1606 = vmatpush3.bf16.msra.mxu1 %v1744_v12  ;;  %v803_v11 = vand.u32 127, %v802_v10  ;;  %v807_v12 = vshrl.u32 %v802_v10, 7 }
  0x20   : > { %s1934_s15 = scalar_lea.vmem %s2207_s1, %s1477_s30  ;;  %1587 = vmatprep.subr.bf16.mxu0 %v1831_v7  ;;  %1607 = vmatprep.subr.bf16.mxu1 %v1831_v7  ;;  %s408_s25 = scalar_lea.vmem %s2218_s12, %s1477_s30 }
  0x21   : > { %v417_v0 = vld [vmem:[%s1934_s15] sm:$0xf]  ;;  %vm810_vm6 = vcmp.le.s32.totalorder %v803_v11, %v807_v12 }
  0x22   : > { %v418_v1 = vunpack.c.l.bf16 %v417_v0  ;;  %v1499_v0 = vld [vmem:[%s2211_s5] ss:$0 sm:$0xff] }
  0x23   : > { %1588 = vmatpush3.bf16.msra.mxu0 %v1745_v13  ;;  %1608 = vmatpush3.bf16.msra.mxu1 %v1746_v14  ;;  %v804_v13 = vstv %s410_s14 }
  0x24   : > { %419 = vadd.xlane.f32.xlu0 %v418_v1  ;;  %1589 = vmatprep.subr.bf16.mxu0 %v1831_v7  ;;  %vm805_vm5 = vcmp.lt.s32.totalorder %v803_v11, %v804_v13 }
  0x25   : > { %1609 = vmatprep.subr.bf16.mxu1 %v1831_v7  ;;  %vm2083_vm7 = vmand %vm805_vm5, %vm810_vm6 }
  0x27   : > { %1590 = vmatpush3.bf16.msra.mxu0 %v1747_v15  ;;  %1610 = vmatpush3.bf16.msra.mxu1 %v1748_v16 }
  0x28   : > { %1591 = vmatprep.subr.bf16.mxu0 %v1831_v7  ;;  %1611 = vmatprep.subr.bf16.mxu1 %v1831_v7 }
  0x2b   : > { %1592 = vmatpush3.bf16.msra.mxu0 %v1749_v17  ;;  %1612 = vmatpush3.bf16.msra.mxu1 %v1750_v18 }
  0x2c   : > { %1593 = vmatprep.subr.bf16.mxu0 %v1831_v7  ;;  %1613 = vmatprep.subr.bf16.mxu1 %v1831_v7 }
  0x2f   : > { %1594 = vmatpush3.bf16.msra.mxu0 %v1751_v19  ;;  %1614 = vmatpush3.bf16.msra.mxu1 %v1752_v20 }
  0x30   : > { %1595 = vmatprep.subr.bf16.mxu0 %v1831_v7  ;;  %1615 = vmatprep.subr.bf16.mxu1 %v1831_v7 }
  0x33   : > { %1596 = vmatpush3.bf16.msra.mxu0 %v1753_v21  ;;  %1616 = vmatpush3.bf16.msra.mxu1 %v1754_v22 }
  0x34   : > { %1621 = vmatprep.subr.bf16.mxu0 %v1831_v7  ;;  %1641 = vmatprep.subr.bf16.mxu1 %v1831_v7 }
  0xb1   : > { %v420_v2 = vpop.xlane.xlu0 %419 }
  0xb2   : > { %v422_v3 = vmul.f32 0.0078125, %v420_v2 }
  0xb4   : > { %v1937_v4 = vsub.f32 %v418_v1, %v422_v3 }
  0xb6   : > { %v424_v5 = vmul.f32 %v1937_v4, %v1937_v4 }
  0xb8   : > { %425 = vadd.xlane.f32.xlu0 %v424_v5 }
 0x145   : > { %v426_v23 = vpop.xlane.xlu0 %425 }
 0x146   : > { %v427_v24 = vmul.f32 0.007874016, %v426_v23 }
 0x148   : > { %1772 = vrsqrt.f32 %v427_v24  ;;  %vm430_vm1 = vcmp.eq.f32.partialorder %v427_v24, inf  ;;  %v433_v27 = vand.u32 2147483648, %v427_v24  ;;  %vm432_vm2 = vcmp.eq.f32.partialorder %v427_v24, 0.0 }
 0x152   : > { %v1773_v25 = vpop.eup %1772 }
 0x153   : > { %v429_v26 = vmul.f32 %v1773_v25, %v427_v24 }
 0x155   : > { %v431_v28 = vsel %vm430_vm1, %v427_v24, %v429_v26 }
 0x156   : > { %v434_v29 = vsel %vm432_vm2, %v433_v27, %v431_v28 }
 0x157   : > { %v435_v30 = vadd.f32 1e-06, %v434_v29 }
 0x159   : > { %1774 = vrcp.f32 %v435_v30 }
 0x163   : > { %v1775_v31 = vpop.eup %1774 }
 0x164   : > { %v437_v33 = vmul.f32 %v1775_v31, %v1937_v4 }
 0x166   : > { %v444_v35 = vmul.f32 %v1479_v32, %v437_v33 }
 0x168   : > { %v451_v36 = vadd.f32 %v1480_v34, %v444_v35 }
 0x16a   : > { %v452_v38 = vpack.c.bf16 %v451_v36, %v451_v36 }
 0x16c   : > { %453 = vst [vmem:[#allocation2] sm:$0xf] %v452_v38  ;;  %1598 = vmatmul.mubr.bf16.vlgmr.msra.gmra.mrb[0].mxu0 %v452_v38  ;;  %1618 = vmatmul.mubr.bf16.vlgmr.msra.gmra.mrb[0].mxu1 %v452_v38 }
 0x16d   : > { %1622 = vmatpush3.bf16.msra.mxu0 %v1755_v37  ;;  %1637 = vmatprep.mubr.msk.bf16.mxu0 %vm1832_vm0, %v1831_v7 }
 0x16e   : > { %1623 = vmatprep.subr.bf16.mxu0 %v1831_v7  ;;  %1643 = vmatprep.mubr.msk.bf16.mxu1 %vm1832_vm0, %v1831_v7 }
 0x171   : > { %1624 = vmatpush3.bf16.msra.mxu0 %v1756_v39 }
 0x172   : > { %1625 = vmatprep.subr.bf16.mxu0 %v1831_v7 }
 0x173   : > { %v689_v46 = vld [vmem:[#allocation2] sm:$0xf] }
 0x175   : > { %1626 = vmatpush3.bf16.msra.mxu0 %v1757_v40 }
 0x176   : > { %1627 = vmatprep.subr.bf16.mxu0 %v1831_v7 }
 0x179   : > { %1628 = vmatpush3.bf16.msra.mxu0 %v1758_v41 }
 0x17a   : > { %1629 = vmatprep.subr.bf16.mxu0 %v1831_v7 }
 0x17d   : > { %1630 = vmatpush3.bf16.msra.mxu0 %v1759_v42 }
 0x17e   : > { %1631 = vmatprep.subr.bf16.mxu0 %v1831_v7 }
 0x181   : > { %1632 = vmatpush3.bf16.msra.mxu0 %v1760_v43 }
 0x182   : > { %1633 = vmatprep.subr.bf16.mxu0 %v1831_v7 }
 0x185   : > { %1634 = vmatpush3.bf16.msra.mxu0 %v1761_v44 }
 0x186   : > { %1635 = vmatprep.subr.bf16.mxu0 %v1831_v7 }
 0x189   : > { %1636 = vmatpush3.bf16.msra.mxu0 %v1762_v45 }
 0x18a   : > { %1689 = vmatprep.subr.bf16.mxu0 %v1831_v7 }
 0x18c   : > { %1638 = vmatmul.mubr.bf16.vlgmr.msra.gmra.mrb[4].mxu0 %v689_v46 }
 0x18d   : > { %1705 = vmatprep.mubr.msk.bf16.mxu0 %vm1832_vm0, %v1831_v7 }
 0x23f   : > { %v559_v49 = vpop.f32.mrb[0].mxu0  ;;  %v672_v50 = vpop.f32.mrb[0].mxu1 }
 0x240   : > { %v560_v51 = vadd.f32 %v1481_v47, %v559_v49  ;;  %v673_v52 = vadd.f32 %v1490_v48, %v672_v50  ;;  %v1599_v53 = vpop.f32.mrb[1].mxu0  ;;  %v1619_v54 = vpop.f32.mrb[1].mxu1 }
 0x241   : > { %v562_v55 = vpop.f32.mrb[2].mxu0  ;;  %v675_v56 = vpop.f32.mrb[2].mxu1 }
 0x242   : > { %v565_v57 = vpack.c.bf16 %v560_v51, %v560_v51  ;;  %v678_v58 = vpack.c.bf16 %v673_v52, %v673_v52  ;;  %v1600_v59 = vpop.f32.mrb[3].mxu0  ;;  %v1620_v60 = vpop.f32.mrb[3].mxu1 }
 0x244   : > { %566 = vst [vmem:[#allocation3] sm:$0xf] %v565_v57  ;;  %679 = vst [vmem:[#allocation4] sm:$0xf] %v678_v58 }
 0x24b   : > { %v812_v61 = vld [vmem:[#allocation3] sm:$0xf]  ;;  %v2071_v5 = vld [vmem:[#allocation4] sm:$0xf] }
 0x24c   : > { %v819_v62 = vsel %vm814_vm3, %v812_v61, 0  ;;  %v2063_v63 = vcombine.low %v812_v61, %v812_v61  ;;  %v880_v9 = vsel %vm878_vm4, %v2071_v5, 0  ;;  %v2112_v48 = vcombine.low %v2071_v5, %v2071_v5 }
 0x24d   : > { %1642 = vmatpush3.bf16.xpose.msra.mxu1 %v819_v62 }
 0x24e   : > { %929 = vrot.lane.b32.xlu0 %v2063_v63, %s1833_s24  ;;  %1647 = vmatprep.subr.bf16.mxu1 %v1831_v7 }
 0x25f   : > { %v795_v1 = vpop.f32.mrb[4].mxu0 }
 0x260   : > { %v796_v2 = vadd.f32 %v1499_v0, %v795_v1  ;;  %v1639_v3 = vpop.f32.mrb[5].mxu0 }
 0x261   : > { %v798_v4 = vpop.f32.mrb[6].mxu0 }
 0x262   : > { %v2073_v6 = vpack.c.bf16 %v796_v2, %v796_v2  ;;  %v1640_v8 = vpop.f32.mrb[7].mxu0 }
 0x264   : > { %1644 = vmatmul.mubr.msk.bf16.vlgmr.msra.gmra.mrb[4].mxu1 %vm814_vm3, %v2073_v6 }
 0x265   : > { %1648 = vmatpush3.bf16.msra.mxu1 %v880_v9  ;;  %1649 = vmatprep.mubr.msk.bf16.mxu1 %vm1832_vm0, %v1831_v7 }
 0x266   : > { %1653 = vmatprep.subr.bf16.mxu1 %v1831_v7 }
 0x2c0   : > { %v930_v29 = vpop.permute.xlu0 %929 }
 0x2c1   : > { %v935_v31 = vsel %vm814_vm3, %v930_v29, 0 }
 0x337   : > { %v855_v15 = vpop.f32.mrb[4].mxu1 }
 0x338   : > { %v861_v16 = vsel %vm2083_vm7, %v855_v15, -1e+09  ;;  %v1645_v17 = vpop.f32.mrb[5].mxu1 }
 0x339   : > { %v858_v18 = vpop.f32.mrb[6].mxu1  ;;  %v863_v19 = vsel %vm862_vm8, %v861_v16, -inf }
 0x33a   : > { %864 = vmax.xlane.f32.xlu1 %v863_v19  ;;  %v1646_v20 = vpop.f32.mrb[7].mxu1 }
 0x3c7   : > { %v865_v21 = vpop.xlane.xlu1 %864 }
 0x3c8   : > { %v866_v22 = vsub.f32 %v861_v16, %v865_v21 }
 0x3ca   : > { %v867_v23 = vmul.f32 1.442695, %v866_v22 }
 0x3cc   : > { %1776 = vpow2.f32 %v867_v23 }
 0x3d6   : > { %v1777_v24 = vpop.eup %1776 }
 0x3d7   : > { %v869_v25 = vsel %vm862_vm8, %v1777_v24, 0.0 }
 0x3d8   : > { %870 = vadd.xlane.f32.xlu1 %v869_v25 }
 0x3e9   : > { %924 = vrot.lane.b32.xlu1 %v2073_v6, %s1833_s24 }
 0x465   : > { %v871_v26 = vpop.xlane.xlu1 %870 }
 0x466   : > { %1778 = vrcp.f32 %v871_v26 }
 0x469   : > { %v925_v32 = vpop.permute.xlu1 %924 }
 0x470   : > { %v1779_v27 = vpop.eup %1778 }
 0x471   : > { %v873_v28 = vmul.f32 %v1779_v27, %v1777_v24 }
 0x473   : > { %v874_v30 = vpack.c.bf16 %v873_v28, %v873_v28 }
 0x475   : > { %1650 = vmatmul.mubr.msk.bf16.vlgmr.msra.gmra.mrb[8].mxu1 %vm862_vm8, %v874_v30 }
 0x476   : > { %1654 = vmatpush3.bf16.xpose.msra.mxu1 %v935_v31  ;;  %1655 = vmatprep.mubr.msk.bf16.mxu1 %vm1832_vm0, %v1831_v7 }
 0x477   : > { %1659 = vmatprep.subr.bf16.mxu1 %v1831_v7 }
 0x47d   : > { %1656 = vmatmul.mubr.msk.bf16.vlgmr.msra.gmra.mrb[12].mxu1 %vm814_vm3, %v925_v32 }
 0x47e   : > { %1661 = vmatprep.mubr.msk.bf16.mxu1 %vm1832_vm0, %v1831_v7 }
 0x548   : > { %v916_v33 = vpop.f32.mrb[8].mxu1 }
 0x549   : > { %922 = vst.msk [vmem:[#allocation5] sm:$0xff] %vm814_vm3, %v916_v33  ;;  %v1651_v34 = vpop.f32.mrb[9].mxu1 }
 0x54a   : > { %v919_v35 = vpop.f32.mrb[10].mxu1 }
 0x54b   : > { %v1652_v36 = vpop.f32.mrb[11].mxu1 }
 0x550   : > { %v971_v37 = vpop.f32.mrb[12].mxu1 }
 0x551   : > { %v977_v38 = vsel %vm2083_vm7, %v971_v37, -1e+09  ;;  %v1657_v39 = vpop.f32.mrb[13].mxu1 }
 0x552   : > { %v974_v40 = vpop.f32.mrb[14].mxu1  ;;  %v978_v41 = vsel %vm862_vm8, %v977_v38, -inf }
 0x553   : > { %979 = vmax.xlane.f32.xlu1 %v978_v41  ;;  %v1658_v42 = vpop.f32.mrb[15].mxu1 }
 0x554   : > { %v1764_v42 = vld [vmem:[%s2216_s10] sm:$0xff]  }
 0x555   : > { %1690 = vmatpush3.bf16.msra.mxu0 %v1764_v42 }
 0x556   : > { %1691 = vmatprep.subr.bf16.mxu0 %v1831_v7 }
 0x564   : > { %1049 = vrot.lane.b32.xlu1 %v2063_v63, %s1834_s26 }
 0x568   : > { %1047 = vrot.lane.b32.xlu1 %v2073_v6, %s1834_s26 }
 0x5e0   : > { %v980_v43 = vpop.xlane.xlu1 %979 }
 0x5e1   : > { %v981_v44 = vsub.f32 %v977_v38, %v980_v43  ;;  %v1765_v43 = vld [vmem:[%s2216_s10 + $0x8] sm:$0xff]  }
 0x5e2   : > { %1692 = vmatpush3.bf16.msra.mxu0 %v1765_v43 }
 0x5e3   : > { %v982_v45 = vmul.f32 1.442695, %v981_v44  ;;  %v1766_v44 = vld [vmem:[%s2216_s10 + $0x10] sm:$0xff]   ;;  %1693 = vmatprep.subr.bf16.mxu0 %v1831_v7 }
 0x5e4   : > { %v1050_v54 = vpop.permute.xlu1 %1049 }
 0x5e5   : > { %1780 = vpow2.f32 %v982_v45  ;;  %v1055_v56 = vsel %vm814_vm3, %v1050_v54, 0  ;;  %v1767_v45 = vld [vmem:[%s2216_s10 + $0x18] sm:$0xff]  }
 0x5e6   : > { %1694 = vmatpush3.bf16.msra.mxu0 %v1766_v44 }
 0x5e7   : > { %1695 = vmatprep.subr.bf16.mxu0 %v1831_v7 }
 0x5e8   : > { %v1048_v57 = vpop.permute.xlu1 %1047 }
 0x5ea   : > { %1696 = vmatpush3.bf16.msra.mxu0 %v1767_v45 }
 0x5eb   : > { %1697 = vmatprep.subr.bf16.mxu0 %v1831_v7 }
 0x5ef   : > { %v1781_v46 = vpop.eup %1780 }
 0x5f0   : > { %v984_v47 = vsel %vm862_vm8, %v1781_v46, 0.0 }
 0x5f1   : > { %985 = vadd.xlane.f32.xlu0 %v984_v47  ;;  %v1769_v47 = vld [vmem:[%s2216_s10 + $0x28] sm:$0xff]  }
 0x607   : > { %993 = vrot.lane.b32.xlu0 %v2112_v48, %s1833_s24 }
 0x67e   : > { %v986_v49 = vpop.xlane.xlu0 %985 }
 0x67f   : > { %1782 = vrcp.f32 %v986_v49  ;;  %v1771_v49 = vld [vmem:[%s2216_s10 + $0x38] sm:$0xff]  }
 0x682   : > { %v994_v50 = vpop.permute.xlu0 %993 }
 0x683   : > { %v999_v51 = vsel %vm878_vm4, %v994_v50, 0 }
 0x684   : > { %1660 = vmatpush3.bf16.msra.mxu1 %v999_v51 }
 0x685   : > { %1665 = vmatprep.subr.bf16.mxu1 %v1831_v7 }
 0x689   : > { %v1783_v52 = vpop.eup %1782 }
 0x68a   : > { %v988_v53 = vmul.f32 %v1783_v52, %v1781_v46  ;;  %v1768_v46 = vld [vmem:[%s2216_s10 + $0x20] sm:$0xff]  }
 0x68b   : > { %1698 = vmatpush3.bf16.msra.mxu0 %v1768_v46 }
 0x68c   : > { %v989_v55 = vpack.c.bf16 %v988_v53, %v988_v53  ;;  %1699 = vmatprep.subr.bf16.mxu0 %v1831_v7 }
 0x68e   : > { %1662 = vmatmul.mubr.msk.bf16.vlgmr.msra.gmra.mrb[16].mxu1 %vm862_vm8, %v989_v55 }
 0x68f   : > { %1666 = vmatpush3.bf16.xpose.msra.mxu1 %v1055_v56  ;;  %1667 = vmatprep.mubr.msk.bf16.mxu1 %vm1832_vm0, %v1831_v7 }
 0x690   : > { %1671 = vmatprep.subr.bf16.mxu1 %v1831_v7  ;;  %1700 = vmatpush3.bf16.msra.mxu0 %v1769_v47 }
 0x691   : > { %1701 = vmatprep.subr.bf16.mxu0 %v1831_v7 }
 0x696   : > { %1668 = vmatmul.mubr.msk.bf16.vlgmr.msra.gmra.mrb[20].mxu1 %vm814_vm3, %v1048_v57  ;;  %v685_v57 = vld [vmem:[%s1934_s15] sm:$0xf] }
 0x697   : > { %1673 = vmatprep.mubr.msk.bf16.mxu1 %vm1832_vm0, %v1831_v7 }
 0x761   : > { %v1035_v58 = vpop.f32.mrb[16].mxu1 }
 0x762   : > { %v1663_v59 = vpop.f32.mrb[17].mxu1 }
 0x763   : > { %v1038_v60 = vpop.f32.mrb[18].mxu1 }
 0x764   : > { %v1664_v61 = vpop.f32.mrb[19].mxu1 }
 0x769   : > { %v1091_v62 = vpop.f32.mrb[20].mxu1 }
 0x76a   : > { %v1097_v0 = vsel %vm2083_vm7, %v1091_v62, -1e+09  ;;  %v1669_v1 = vpop.f32.mrb[21].mxu1 }
 0x76b   : > { %v1094_v2 = vpop.f32.mrb[22].mxu1  ;;  %v1098_v3 = vsel %vm862_vm8, %v1097_v0, -inf }
 0x76c   : > { %1099 = vmax.xlane.f32.xlu1 %v1098_v3  ;;  %v1670_v4 = vpop.f32.mrb[23].mxu1 }
 0x77d   : > { %1166 = vrot.lane.b32.xlu1 %v2063_v63, %s1835_s16 }
 0x781   : > { %1164 = vrot.lane.b32.xlu1 %v2073_v6, %s1835_s16 }
 0x7f9   : > { %v1100_v5 = vpop.xlane.xlu1 %1099 }
 0x7fa   : > { %v1101_v8 = vsub.f32 %v1097_v0, %v1100_v5 }
 0x7fc   : > { %v1102_v9 = vmul.f32 1.442695, %v1101_v8 }
 0x7fd   : > { %v1167_v16 = vpop.permute.xlu1 %1166 }
 0x7fe   : > { %1784 = vpow2.f32 %v1102_v9  ;;  %v1172_v18 = vsel %vm814_vm3, %v1167_v16, 0 }
 0x801   : > { %v1165_v19 = vpop.permute.xlu1 %1164 }
 0x808   : > { %v1785_v10 = vpop.eup %1784 }
 0x809   : > { %v1104_v11 = vsel %vm862_vm8, %v1785_v10, 0.0 }
 0x80a   : > { %1105 = vadd.xlane.f32.xlu0 %v1104_v11 }
 0x820   : > { %1110 = vrot.lane.b32.xlu0 %v2112_v48, %s1834_s26 }
 0x897   : > { %v1106_v12 = vpop.xlane.xlu0 %1105 }
 0x898   : > { %1786 = vrcp.f32 %v1106_v12 }
 0x89b   : > { %v1111_v13 = vpop.permute.xlu0 %1110 }
 0x89c   : > { %v1116_v15 = vsel %vm878_vm4, %v1111_v13, 0 }
 0x89d   : > { %1672 = vmatpush3.bf16.msra.mxu1 %v1116_v15 }
 0x89e   : > { %1677 = vmatprep.subr.bf16.mxu1 %v1831_v7 }
 0x8a2   : > { %v1787_v63 = vpop.eup %1786 }
 0x8a3   : > { %v1108_v6 = vmul.f32 %v1787_v63, %v1785_v10 }
 0x8a5   : > { %v1109_v17 = vpack.c.bf16 %v1108_v6, %v1108_v6 }
 0x8a7   : > { %1674 = vmatmul.mubr.msk.bf16.vlgmr.msra.gmra.mrb[24].mxu1 %vm862_vm8, %v1109_v17 }
 0x8a8   : > { %1678 = vmatpush3.bf16.xpose.msra.mxu1 %v1172_v18  ;;  %1679 = vmatprep.mubr.msk.bf16.mxu1 %vm1832_vm0, %v1831_v7 }
 0x8a9   : > { %1683 = vmatprep.subr.bf16.mxu1 %v1831_v7 }
 0x8af   : > { %1680 = vmatmul.mubr.msk.bf16.vlgmr.msra.gmra.mrb[28].mxu1 %vm814_vm3, %v1165_v19 }
 0x8b0   : > { %1685 = vmatprep.mubr.msk.bf16.mxu1 %vm1832_vm0, %v1831_v7 }
 0x97a   : > { %v1152_v20 = vpop.f32.mrb[24].mxu1 }
 0x97b   : > { %v1675_v21 = vpop.f32.mrb[25].mxu1 }
 0x97c   : > { %v1155_v22 = vpop.f32.mrb[26].mxu1 }
 0x97d   : > { %v1676_v23 = vpop.f32.mrb[27].mxu1 }
 0x982   : > { %v1208_v24 = vpop.f32.mrb[28].mxu1 }
 0x983   : > { %v1214_v25 = vsel %vm2083_vm7, %v1208_v24, -1e+09  ;;  %v1681_v26 = vpop.f32.mrb[29].mxu1 }
 0x984   : > { %v1211_v27 = vpop.f32.mrb[30].mxu1  ;;  %v1215_v28 = vsel %vm862_vm8, %v1214_v25, -inf }
 0x985   : > { %1216 = vmax.xlane.f32.xlu0 %v1215_v28  ;;  %v1682_v29 = vpop.f32.mrb[31].mxu1 }
 0x99b   : > { %1227 = vrot.lane.b32.xlu0 %v2112_v48, %s1835_s16  ;;  %v1770_v48 = vld [vmem:[%s2216_s10 + $0x30] sm:$0xff]  }
 0x99c   : > { %1702 = vmatpush3.bf16.msra.mxu0 %v1770_v48 }
 0x99d   : > { %1703 = vmatprep.subr.bf16.mxu0 %v1831_v7  ;;  %v686_v7 = vunpack.c.l.bf16 %v685_v57 }
 0x99f   : > { %1159 = vrot.lane.b32.xlu0 %v1152_v20, %s1834_s26 }
 0x9a0   : > { %1704 = vmatpush3.bf16.msra.mxu0 %v1771_v49 }
 0xa12   : > { %v1217_v30 = vpop.xlane.xlu0 %1216 }
 0xa13   : > { %v1218_v31 = vsub.f32 %v1214_v25, %v1217_v30 }
 0xa15   : > { %v1219_v32 = vmul.f32 1.442695, %v1218_v31 }
 0xa16   : > { %v1228_v33 = vpop.permute.xlu0 %1227 }
 0xa17   : > { %1788 = vpow2.f32 %v1219_v32  ;;  %v1233_v34 = vsel %vm878_vm4, %v1228_v33, 0 }
 0xa18   : > { %1684 = vmatpush3.bf16.msra.mxu1 %v1233_v34 }
 0xa1a   : > { %v1160_v38 = vpop.permute.xlu0 %1159 }
 0xa21   : > { %v1789_v14 = vpop.eup %1788 }
 0xa22   : > { %v1221_v35 = vsel %vm862_vm8, %v1789_v14, 0.0 }
 0xa23   : > { %1222 = vadd.xlane.f32.xlu1 %v1221_v35 }
 0xa34   : > { %1042 = vrot.lane.b32.xlu1 %v1035_v58, %s1835_s16  ;;  %v1518_v58 = vld [vmem:[%s2217_s11] ss:$0 sm:$0xff] }
 0xab0   : > { %v1223_v36 = vpop.xlane.xlu1 %1222 }
 0xab1   : > { %1790 = vrcp.f32 %v1223_v36 }
 0xab4   : > { %v1043_v37 = vpop.permute.xlu1 %1042 }
 0xab5   : > { %1046 = vst.msk [vmem:[#allocation5] sm:$0xff] %vm1045_vm9, %v1043_v37 }
 0xab6   : > { %1163 = vst.msk [vmem:[#allocation5] sm:$0xff] %vm1162_vm10, %v1160_v38 }
 0xabb   : > { %v1791_v39 = vpop.eup %1790 }
 0xabc   : > { %v1225_v40 = vmul.f32 %v1791_v39, %v1789_v14 }
 0xabe   : > { %v1226_v41 = vpack.c.bf16 %v1225_v40, %v1225_v40 }
 0xac0   : > { %1686 = vmatmul.mubr.msk.bf16.vlgmr.msra.gmra.mrb[32].mxu1 %vm862_vm8, %v1226_v41 }
 0xb93   : > { %v1269_v50 = vpop.f32.mrb[32].mxu1 }
 0xb94   : > { %1276 = vrot.lane.b32.xlu1 %v1269_v50, %s1833_s24  ;;  %v1687_v51 = vpop.f32.mrb[33].mxu1 }
 0xb95   : > { %v1272_v52 = vpop.f32.mrb[34].mxu1 }
 0xb96   : > { %v1688_v53 = vpop.f32.mrb[35].mxu1 }
 0xc06   : > { %v1277_v54 = vpop.permute.xlu1 %1276 }
 0xc07   : > { %1280 = vst.msk [vmem:[#allocation5] sm:$0xff] %vm1279_vm11, %v1277_v54 }
 0xc0e   : > { %v1281_v55 = vld [vmem:[#allocation5] sm:$0xff] }
 0xc0f   : > { %v1282_v56 = vpack.c.bf16 %v1281_v55, %v1281_v55 }
 0xc11   : > { %1706 = vmatmul.mubr.bf16.vlgmr.msra.gmra.mrb[8].mxu0 %v1282_v56 }
 0xce4   : > { %v1388_v59 = vpop.f32.mrb[8].mxu0 }
 0xce5   : > { %v1389_v60 = vadd.f32 %v1518_v58, %v1388_v59  ;;  %v1707_v61 = vpop.f32.mrb[9].mxu0 }
 0xce6   : > { %v1391_v62 = vpop.f32.mrb[10].mxu0 }
 0xce7   : > { %v1394_v0 = vadd.f32 %v1389_v60, %v686_v7  ;;  %v1708_v1 = vpop.f32.mrb[11].mxu0 }
 0xce9   : > { %v1395_v2 = vpack.c.bf16 %v1394_v0, %v1394_v0 }
 0xceb   : > { %1396 = vst [vmem:[%s408_s25] sm:$0xf] %v1395_v2 }
 0xcec PF: > { %s28_s28 = sadd.s32 1, %s1828_s28   ;;  %s2221_s26 = smov %s1824_s27 }
 0xced   : > { %p25_p10 = scmp.ge.s32.totalorder %s28_s28, 4   ;;  %s2222_s27 = smov %s2224_s0 }
 0xcef   :  { %27 = sbr.rel (!%p25_p10) target bundleno = 17 (0x11), region = 100 }

// kernel: transformer_forward.22
= control target key start
LH: loop header
LB: loop body
LE: loop exit
PB: predicated region body
PF: predicated region fallthrough
CT: control target
= control target key end

     0   :  { %v359_v12 = vmov 0.0   ;;  %vm360_vm0 = vmmov 0   ;;  %vm88_vm5 = vcmask 7168   ;;  %v361_v47 = vmov -inf   ;;  %s473_s0 = inlined_call_operand.vmem [shape: bf16[16,128], index: 0, kind: input, shape index: {}]   ;;  %s474_s3 = inlined_call_operand.vmem [shape: bf16[128,64], index: 3, kind: input, shape index: {}]   ;;  %s475_s1 = inlined_call_operand.vmem [shape: f32[1,128], index: 1, kind: input, shape index: {}]   ;;  %s476_s2 = inlined_call_operand.vmem [shape: f32[1,128], index: 2, kind: input, shape index: {}]   ;;  %s477_s4 = inlined_call_operand.vmem [shape: f32[1,64], index: 4, kind: input, shape index: {}]   ;;  %s478_s5 = inlined_call_operand.vmem [shape: f32[16,64], index: 5, kind: output, shape index: {0}]   ;;  %s479_s6 = inlined_call_operand.vmem [shape: f32[16,1], index: 6, kind: output, shape index: {1}]  }
   0x1   :  { %v293_v0 = vld [vmem:[%s473_s0] sm:$0xff]   ;;  %305 = vmatprep.subr.bf16.mxu0 %v359_v12  ;;  %v332_v13 = vld [vmem:[%s474_s3 + $0x8] sm:$0xff]   ;;  %v333_v14 = vld [vmem:[%s474_s3 + $0x10] sm:$0xff]   ;;  %321 = vmatprep.mubr.msk.bf16.mxu0 %vm360_vm0, %v359_v12  ;;  %89 = vst.msk [vmem:[#allocation3] sm:$0xff] %vm88_vm5, %v361_v47  ;;  %vm206_vm6 = vcmask 523264   ;;  %v362_v57 = vmov 0  }
   0x2   :  { %v294_v1 = vunpack.c.l.bf16 %v293_v0  ;;  %v295_v2 = vunpack.c.h.bf16 %v293_v0  ;;  %v331_v11 = vld [vmem:[%s474_s3] sm:$0xff]   ;;  %v334_v15 = vld [vmem:[%s474_s3 + $0x18] sm:$0xff]   ;;  %v336_v17 = vld [vmem:[%s474_s3 + $0x28] sm:$0xff]   ;;  %90 = vst.msk [vmem:[#allocation3 + $0x8] sm:$0xff] %vm88_vm5, %v361_v47  ;;  %329 = vset.pattern.permute.xlu0 %v362_v57  ;;  %330 = vset.pattern.permute.xlu1 %v362_v57 }
   0x3   :  { %306 = vmatpush3.bf16.msra.mxu0 %v331_v11  ;;  %v335_v16 = vld [vmem:[%s474_s3 + $0x20] sm:$0xff]   ;;  %v337_v18 = vld [vmem:[%s474_s3 + $0x30] sm:$0xff]   ;;  %v338_v19 = vld [vmem:[%s474_s3 + $0x38] sm:$0xff]   ;;  %91 = vst.msk [vmem:[#allocation4] sm:$0xff] %vm88_vm5, %v359_v12 }
   0x4   :  { %33 = vadd.xlane.f32.xlu0 %v294_v1  ;;  %307 = vmatprep.subr.bf16.mxu0 %v359_v12  ;;  %v281_v38 = vld [vmem:[%s475_s1] ss:$0 sm:$0xff]  ;;  %92 = vst.msk [vmem:[#allocation4 + $0x8] sm:$0xff] %vm88_vm5, %v359_v12 }
   0x5   :  { %v282_v42 = vld [vmem:[%s476_s2] ss:$0 sm:$0xff] }
   0x6   :  { %v283_v48 = vld [vmem:[%s477_s4] ss:$0 sm:$0xff] }
   0x7   :  { %308 = vmatpush3.bf16.msra.mxu0 %v332_v13 }
   0x8   :  { %35 = vadd.xlane.f32.xlu0 %v295_v2  ;;  %309 = vmatprep.subr.bf16.mxu0 %v359_v12  ;;  %v209_v58 = vld [vmem:[#allocation3] sm:$0xff] }
   0x9   :  { %v210_v60 = vld [vmem:[#allocation3 + $0x8] sm:$0xff] }
   0xb   :  { %310 = vmatpush3.bf16.msra.mxu0 %v333_v14 }
   0xc   :  { %311 = vmatprep.subr.bf16.mxu0 %v359_v12 }
   0xf   :  { %312 = vmatpush3.bf16.msra.mxu0 %v334_v15  ;;  %v219_v15 = vld [vmem:[#allocation4] sm:$0xff] }
  0x10   :  { %313 = vmatprep.subr.bf16.mxu0 %v359_v12 }
  0x13   :  { %314 = vmatpush3.bf16.msra.mxu0 %v335_v16 }
  0x14   :  { %315 = vmatprep.subr.bf16.mxu0 %v359_v12 }
  0x17   :  { %316 = vmatpush3.bf16.msra.mxu0 %v336_v17  ;;  %v220_v17 = vld [vmem:[#allocation4 + $0x8] sm:$0xff] }
  0x18   :  { %317 = vmatprep.subr.bf16.mxu0 %v359_v12 }
  0x1b   :  { %318 = vmatpush3.bf16.msra.mxu0 %v337_v18 }
  0x1c   :  { %319 = vmatprep.subr.bf16.mxu0 %v359_v12 }
  0x1f   :  { %320 = vmatpush3.bf16.msra.mxu0 %v338_v19 }
  0x91   :  { %v34_v3 = vpop.xlane.xlu0 %33 }
  0x92   :  { %v38_v4 = vmul.f32 0.0078125, %v34_v3 }
  0x94   :  { %v40_v5 = vsub.f32 %v294_v1, %v38_v4 }
  0x95   :  { %v36_v6 = vpop.xlane.xlu0 %35 }
  0x96   :  { %v39_v7 = vmul.f32 0.0078125, %v36_v6  ;;  %v42_v8 = vmul.f32 %v40_v5, %v40_v5 }
  0x98   :  { %v41_v9 = vsub.f32 %v295_v2, %v39_v7  ;;  %44 = vadd.xlane.f32.xlu1 %v42_v8 }
  0x9a   :  { %v43_v10 = vmul.f32 %v41_v9, %v41_v9 }
  0x9c   :  { %46 = vadd.xlane.f32.xlu1 %v43_v10 }
 0x125   :  { %v45_v20 = vpop.xlane.xlu1 %44 }
 0x126   :  { %v48_v21 = vmul.f32 0.007874016, %v45_v20 }
 0x128   :  { %339 = vrsqrt.f32 %v48_v21  ;;  %vm52_vm1 = vcmp.eq.f32.partialorder %v48_v21, inf  ;;  %v55_v26 = vand.u32 2147483648, %v48_v21  ;;  %vm54_vm2 = vcmp.eq.f32.partialorder %v48_v21, 0.0 }
 0x129   :  { %v47_v22 = vpop.xlane.xlu1 %46 }
 0x12a   :  { %v49_v23 = vmul.f32 0.007874016, %v47_v22 }
 0x12c   :  { %341 = vrsqrt.f32 %v49_v23  ;;  %vm59_vm3 = vcmp.eq.f32.partialorder %v49_v23, inf  ;;  %v62_v32 = vand.u32 2147483648, %v49_v23  ;;  %vm61_vm4 = vcmp.eq.f32.partialorder %v49_v23, 0.0 }
 0x132   :  { %v340_v24 = vpop.eup %339 }
 0x133   :  { %v51_v25 = vmul.f32 %v340_v24, %v48_v21 }
 0x135   :  { %v53_v27 = vsel %vm52_vm1, %v48_v21, %v51_v25 }
 0x136   :  { %v342_v28 = vpop.eup %341  ;;  %v56_v29 = vsel %vm54_vm2, %v55_v26, %v53_v27 }
 0x137   :  { %v64_v30 = vadd.f32 1e-06, %v56_v29  ;;  %v58_v31 = vmul.f32 %v342_v28, %v49_v23 }
 0x139   :  { %v60_v33 = vsel %vm59_vm3, %v49_v23, %v58_v31  ;;  %343 = vrcp.f32 %v64_v30 }
 0x13a   :  { %v63_v34 = vsel %vm61_vm4, %v62_v32, %v60_v33 }
 0x13b   :  { %v65_v35 = vadd.f32 1e-06, %v63_v34 }
 0x13d   :  { %345 = vrcp.f32 %v65_v35 }
 0x143   :  { %v344_v36 = vpop.eup %343 }
 0x144   :  { %v68_v37 = vmul.f32 %v344_v36, %v40_v5 }
 0x146   :  { %v76_v41 = vmul.f32 %v281_v38, %v68_v37 }
 0x147   :  { %v346_v39 = vpop.eup %345 }
 0x148   :  { %v69_v40 = vmul.f32 %v346_v39, %v41_v9  ;;  %v84_v44 = vadd.f32 %v282_v42, %v76_v41 }
 0x14a   :  { %v77_v43 = vmul.f32 %v281_v38, %v69_v40 }
 0x14c   :  { %v85_v45 = vadd.f32 %v282_v42, %v77_v43 }
 0x14e   :  { %v86_v46 = vpack.c.bf16 %v85_v45, %v84_v44 }
 0x150   :  { %322 = vmatmul.mubr.bf16.vlgmr.msra.gmra.mrb[0].mxu0 %v86_v46 }
 0x223   :  { %v199_v49 = vpop.f32.mrb[0].mxu0 }
 0x224   :  { %v200_v50 = vadd.f32 %v283_v48, %v199_v49  ;;  %v323_v51 = vpop.f32.mrb[1].mxu0 }
 0x225   :  { %v202_v52 = vpop.f32.mrb[2].mxu0 }
 0x226   :  { %207 = vst.msk [vmem:[%s478_s5] sm:$0xff] %vm206_vm6, %v200_v50  ;;  %v203_v53 = vadd.f32 %v283_v48, %v202_v52  ;;  %v324_v54 = vpop.f32.mrb[3].mxu0  ;;  %v211_v55 = vsel %vm206_vm6, %v200_v50, -inf }
 0x227   :  { %212 = vmax.xlane.f32.xlu0 %v211_v55 }
 0x228   :  { %208 = vst.msk [vmem:[%s478_s5 + $0x8] sm:$0xff] %vm206_vm6, %v203_v53  ;;  %v214_v56 = vsel %vm206_vm6, %v203_v53, -inf }
 0x229   :  { %215 = vmax.xlane.f32.xlu1 %v214_v56 }
 0x2b4   :  { %v213_v59 = vpop.xlane.xlu0 %212 }
 0x2b5   :  { %v217_v61 = vmax.f32 %v209_v58, %v213_v59 }
 0x2b6   :  { %v216_v62 = vpop.xlane.xlu1 %215 }
 0x2b7   :  { %v221_v63 = vsub.f32 %v209_v58, %v217_v61  ;;  %256 = vst.msk [vmem:[#allocation3] sm:$0xff] %vm88_vm5, %v217_v61  ;;  %v218_v0 = vmax.f32 %v210_v60, %v216_v62  ;;  %231 = vperm.xlu0 %329, %v217_v61  }
 0x2b9   :  { %v222_v1 = vsub.f32 %v210_v60, %v218_v0  ;;  %257 = vst.msk [vmem:[#allocation3 + $0x8] sm:$0xff] %vm88_vm5, %v218_v0  ;;  %236 = vperm.xlu1 %330, %v218_v0   ;;  %v223_v12 = vmul.f32 1.442695, %v221_v63 }
 0x2bb   :  { %v225_v13 = vmul.f32 1.442695, %v222_v1 }
 0x2be   :  { %v261_v29 = vld [vmem:[#allocation3] sm:$0xff] }
 0x2c0   :  { %v262_v32 = vld [vmem:[#allocation3 + $0x8] sm:$0xff] }
 0x336   :  { %v232_v2 = vpop.permute.xlu0 %231 }
 0x337   :  { %v239_v3 = vsub.f32 %v200_v50, %v232_v2 }
 0x338   :  { %v237_v4 = vpop.permute.xlu1 %236 }
 0x339   :  { %v241_v5 = vmul.f32 1.442695, %v239_v3  ;;  %v240_v6 = vsub.f32 %v203_v53, %v237_v4 }
 0x33b   :  { %347 = vpow2.f32 %v241_v5  ;;  %v243_v7 = vmul.f32 1.442695, %v240_v6 }
 0x33d   :  { %349 = vpow2.f32 %v243_v7 }
 0x33e   :  { %351 = vpow2.f32 %v223_v12 }
 0x33f   :  { %353 = vpow2.f32 %v225_v13 }
 0x345   :  { %v348_v8 = vpop.eup %347 }
 0x346   :  { %v245_v9 = vsel %vm206_vm6, %v348_v8, 0.0 }
 0x347   :  { %v350_v10 = vpop.eup %349  ;;  %246 = vadd.xlane.f32.xlu1 %v245_v9 }
 0x348   :  { %v248_v11 = vsel %vm206_vm6, %v350_v10, 0.0  ;;  %v352_v14 = vpop.eup %351 }
 0x349   :  { %249 = vadd.xlane.f32.xlu0 %v248_v11  ;;  %v354_v16 = vpop.eup %353  ;;  %v227_v18 = vmul.f32 %v352_v14, %v219_v15 }
 0x34a   :  { %v228_v21 = vmul.f32 %v354_v16, %v220_v17 }
 0x3d4   :  { %v247_v19 = vpop.xlane.xlu1 %246 }
 0x3d5   :  { %v251_v20 = vadd.f32 %v247_v19, %v227_v18 }
 0x3d6   :  { %v250_v22 = vpop.xlane.xlu0 %249 }
 0x3d7   :  { %254 = vst.msk [vmem:[#allocation4] sm:$0xff] %vm88_vm5, %v251_v20  ;;  %v252_v23 = vadd.f32 %v250_v22, %v228_v21 }
 0x3d9   :  { %255 = vst.msk [vmem:[#allocation4 + $0x8] sm:$0xff] %vm88_vm5, %v252_v23 }
 0x3de   :  { %v263_v24 = vld [vmem:[#allocation4] sm:$0xff] }
 0x3df   :  { %355 = vlog2.f32 %v263_v24 }
 0x3e0   :  { %v264_v25 = vld [vmem:[#allocation4 + $0x8] sm:$0xff] }
 0x3e1   :  { %357 = vlog2.f32 %v264_v25 }
 0x3e9   :  { %v356_v26 = vpop.eup %355 }
 0x3ea   :  { %v266_v27 = vmul.f32 0.6931472, %v356_v26 }
 0x3eb   :  { %v358_v28 = vpop.eup %357 }
 0x3ec   :  { %v269_v30 = vadd.f32 %v266_v27, %v261_v29  ;;  %v268_v31 = vmul.f32 0.6931472, %v358_v28 }
 0x3ee   :  { %271 = vst.msk [vmem:[%s479_s6] sm:$0xff] %vm88_vm5, %v269_v30  ;;  %v270_v33 = vadd.f32 %v268_v31, %v262_v32 }
 0x3f0   :  { %272 = vst.msk [vmem:[%s479_s6 + $0x8] sm:$0xff] %vm88_vm5, %v270_v33 }

// kernel: transformer_forward.23
= control target key start
LH: loop header
LB: loop body
LE: loop exit
PB: predicated region body
PF: predicated region fallthrough
CT: control target
= control target key end

     0   :  { %s119_s0 = inlined_call_operand.vmem [shape: f32[16,64], index: 0, kind: input, shape index: {}]   ;;  %s120_s1 = inlined_call_operand.vmem [shape: f32[16,1], index: 1, kind: input, shape index: {}]   ;;  %s121_s2 = inlined_call_operand.hbm [shape: f32[16,64], index: 2, kind: output, shape index: {}]  }
   0x1   :  { %v14_v0 = vld [vmem:[%s120_s1] sm:$0xff] }
   0x2   :  { %7 = vsyncpa [#allocation3], 0  ;;  %v76_v1 = vmov 0   ;;  %v15_v2 = vld [vmem:[%s120_s1 + $0x8] sm:$0xff]  ;;  %v12_v3 = vld [vmem:[%s119_s0] sm:$0xff]  ;;  %vm28_vm0 = vcmask 523264  }
   0x3   :  { %51 = vset.pattern.permute.xlu0 %v76_v1  ;;  %s77_s15 = smov [#allocation2]   ;;  %v13_v6 = vld [vmem:[%s119_s0 + $0x8] sm:$0xff] }
   0x4   :  { %18 = vperm.xlu0 %51, %v14_v0   ;;  %s36_s16 = sshll.u32 %s77_s15, 4  ;;  %s37_s16 = int_to_ptr.vmem [resolvable:$true] %s36_s16 }
   0x5   :  { %s52_s1 = scalar_lea.vmem %s37_s16, 256  ;;  %p57_p1 = scmp.lt.s32.totalorder %s37_s16, %s37_s16 }
   0x6   :  { %p53_p0 = scmp.ne.s32.totalorder %s37_s16, %s52_s1  ;;  %p58_p2 = scmp.lt.s32.totalorder %s52_s1, %s52_s1 }
   0x8   :  { %23 = vperm.xlu0 %51, %v15_v2   ;;  %p59_p3 = por %p58_p2, %p57_p1 }
   0xa   :  { %p60_p4 = pnand %p59_p3, %p53_p0 }
  0x83   :  { %v19_v4 = vpop.permute.xlu0 %18 }
  0x84   :  { %v26_v5 = vsub.f32 %v12_v3, %v19_v4 }
  0x86   :  { %29 = vst.msk [vmem:[#allocation2] sm:$0xff] %vm28_vm0, %v26_v5 }
  0x87   :  { %v24_v7 = vpop.permute.xlu0 %23 }
  0x88   :  { %v27_v8 = vsub.f32 %v13_v6, %v24_v7 }
  0x8a   :  { %30 = vst.msk [vmem:[#allocation2 + $0x8] sm:$0xff] %vm28_vm0, %v27_v8 }
  0x8b   :  { %63 = shalt.err (!%p60_p4)
}
  0x8c   :  { %s64_s21 = scalar_lea.hbm %s121_s2, 256 }
  0x8d   :  { %p65_p5 = scmp.ne.s32.totalorder %s121_s2, %s64_s21  ;;  %p68_p6 = scmp.lt.u32.totalorder %s64_s21, %s121_s2 }
  0x8f   :  { %p70_p7 = pnand %p68_p6, %p65_p5 }
  0x91   :  { %73 = shalt.err (!%p70_p7)
}
  0x92   :  { %s78_s25 = smov 128   ;;  %s79_s26 = smov 8  }
  0x93   :  { %42 = dma.vmem_to_hbm [thread:$0]  %s37_s16, 256, %s121_s2, [#allocation3], %s78_s25, %s78_s25, %s79_s26  }
  0x94   :  { %74 = dma.done.wait [#allocation3], 256  }
  0x95   :  { %75 = vsyncadd [#allocation3], 4294967040 }
  0x96   :  { %46 = vsyncpa [#allocation3], 1 }

// kernel: transformer_forward.17
= control target key start
LH: loop header
LB: loop body
LE: loop exit
PB: predicated region body
PF: predicated region fallthrough
CT: control target
= control target key end

     0   :  { %s2259_s0 = inlined_call_operand.vmem [shape: s32[2], index: 0, kind: input, shape index: {}]   ;;  %s2260_s1 = inlined_call_operand.vmem [shape: bf16[2,8,128], index: 1, kind: input, shape index: {}]   ;;  %s2261_s2 = inlined_call_operand.vmem [shape: bf16[2,8,128], index: 2, kind: input, shape index: {}]   ;;  %s2262_s3 = inlined_call_operand.vmem [shape: f32[1,128], index: 3, kind: input, shape index: {}]   ;;  %s2263_s4 = inlined_call_operand.vmem [shape: f32[1,128], index: 4, kind: input, shape index: {}]   ;;  %s2264_s5 = inlined_call_operand.vmem [shape: bf16[128,128], index: 5, kind: input, shape index: {}]   ;;  %s2265_s6 = inlined_call_operand.vmem [shape: f32[1,128], index: 6, kind: input, shape index: {}]   ;;  %s2266_s7 = inlined_call_operand.vmem [shape: bf16[128,128], index: 7, kind: input, shape index: {}]   ;;  %s2267_s8 = inlined_call_operand.vmem [shape: f32[1,128], index: 8, kind: input, shape index: {}]   ;;  %s2268_s9 = inlined_call_operand.vmem [shape: bf16[128,128], index: 9, kind: input, shape index: {}]   ;;  %s2269_s10 = inlined_call_operand.vmem [shape: f32[1,128], index: 10, kind: input, shape index: {}]   ;;  %s2270_s11 = inlined_call_operand.vmem [shape: bf16[128,128], index: 11, kind: input, shape index: {}]   ;;  %s2271_s12 = inlined_call_operand.vmem [shape: f32[1,128], index: 12, kind: input, shape index: {}]   ;;  %s2272_s13 = inlined_call_operand.vmem [shape: bf16[2,8,128], index: 13, kind: output, shape index: {}]  }
   0x1   :  { %s18_s27 = sshll.u32 %s2259_s0, 4  ;;  %s19_s27 = int_to_ptr.vmem [resolvable:$true] %s18_s27 }
   0x2   :  { %s1843_s28 = scalar_lea.vmem %s19_s27, 16  ;;  %p1848_p1 = scmp.lt.s32.totalorder %s19_s27, %s19_s27 }
   0x3   :  { %p1844_p0 = scmp.ne.s32.totalorder %s19_s27, %s1843_s28  ;;  %p1849_p2 = scmp.lt.s32.totalorder %s1843_s28, %s1843_s28 }
   0x5   :  { %p1850_p3 = por %p1849_p2, %p1848_p1 }
   0x7   :  { %p1851_p4 = pnand %p1850_p3, %p1844_p0 }
   0x9   :  { %1854 = shalt.err (!%p1851_p4)  }
   0xa   :  { %s1881_s29 = smov [#allocation6]  }
   0xb   :  { %21 = dma.vmem_to_smem %s19_s27, 16, %s1881_s29, [#allocation5] }
   0xc   :  { %1867 = dma.done.wait [#allocation5], 16 }
   0xd   :  { %1868 = vsyncadd [#allocation5], 4294967280 }
   0xe   :  { %23 = sfence }
   0xf   :  { %s1960_s30 = smov 0   ;;  %s1962_s14 = smov 0  }
  0x10   :  { %s1964_s15 = smov 0  }
  0x11 LB: > { %s41_s0 = sadd.s32 1, %s1875_s14  ;;  %p1526_p5 = scmp.ge.s32.totalorder %s1879_s15, 1  ;;  %s1879_s15 = sphi %s1964_s15, %s29_s15   ;;  %s1875_s14 = sphi %s1962_s14, %s2276_s14   ;;  %s1871_s30 = sphi %s1960_s30, %s2275_s30  }
  0x12   : > { %p43_p6 = scmp.ge.s32.totalorder %s41_s0, 2  ;;  %p396_p7 = scmp.lt.s32.totalorder %s1879_s15, 3 }
  0x14   : > { %s2278_s0 = smov (%p43_p6, %s41_s0), 0  ;;  %p397_p8 = pnand %p1526_p5, %p396_p7 }
  0x15   : > { %p446_p9 = scmp.lt.s32.totalorder (!%p397_p8), %s1871_s30, 1  ;;  %v1790_v2 = vld [vmem:[%s2266_s7] sm:$0xff] (!%p397_p8)   ;;  %v1882_v3 = vmov (!%p397_p8), 0.0   ;;  %v1791_v4 = vld [vmem:[%s2266_s7 + $0x8] sm:$0xff] (!%p397_p8)   ;;  %v1792_v5 = vld [vmem:[%s2266_s7 + $0x10] sm:$0xff] (!%p397_p8)   ;;  %vm1883_vm0 = vmmov (!%p397_p8), 0  }
  0x16   : > { %400 = sbr.rel (%p397_p8) target bundleno = 3276 (0xccc), region = 68  ;;  %1632 = vmatprep.subr.bf16.mxu0 (!%p397_p8), %v1882_v3  ;;  %1652 = vmatprep.subr.bf16.mxu1 (!%p397_p8), %v1882_v3  ;;  %v1793_v6 = vld [vmem:[%s2266_s7 + $0x18] sm:$0xff] (!%p397_p8)   ;;  %v1794_v7 = vld [vmem:[%s2266_s7 + $0x20] sm:$0xff] (!%p397_p8)   ;;  %v1795_v8 = vld [vmem:[%s2266_s7 + $0x28] sm:$0xff] (!%p397_p8)   ;;  %vm853_vm3 = vcmask (!%p397_p8), 261120   ;;  %vm917_vm4 = vcmask (!%p397_p8), 1043456  }
  0x17   : > { %1633 = vmatpush3.bf16.msra.mxu0 (!%p397_p8), %v1790_v2  ;;  %v1796_v9 = vld [vmem:[%s2266_s7 + $0x30] sm:$0xff] (!%p397_p8)   ;;  %v1797_v14 = vld [vmem:[%s2266_s7 + $0x38] sm:$0xff] (!%p397_p8)   ;;  %1648 = vmatprep.mubr.msk.bf16.mxu0 (!%p397_p8), %vm1883_vm0, %v1882_v3  ;;  %v1798_v16 = vld [vmem:[%s2264_s5] sm:$0xff] (!%p397_p8)   ;;  %s465_s18 = sld [smem:[#allocation6 + %s1871_s30]] (!%p397_p8)  ;;  %vm901_vm6 = vcmask (!%p397_p8), 64512   ;;  %s1886_s19 = smov (!%p397_p8), 32  }
  0x18   : > { %1634 = vmatprep.subr.bf16.mxu0 (!%p397_p8), %v1882_v3  ;;  %1668 = vmatprep.mubr.msk.bf16.mxu1 (!%p397_p8), %vm1883_vm0, %v1882_v3  ;;  %v1799_v17 = vld [vmem:[%s2264_s5 + $0x8] sm:$0xff] (!%p397_p8)   ;;  %v1800_v18 = vld [vmem:[%s2264_s5 + $0x10] sm:$0xff] (!%p397_p8)   ;;  %v1801_v19 = vld [vmem:[%s2264_s5 + $0x18] sm:$0xff] (!%p397_p8)   ;;  %vm1084_vm7 = vcmask (!%p397_p8), 523520   ;;  %vm1201_vm8 = vcmask (!%p397_p8), 785920   ;;  %vm1318_vm9 = vcmask (!%p397_p8), 1048320  }
  0x19   : > { %v1802_v20 = vld [vmem:[%s2264_s5 + $0x20] sm:$0xff] (!%p397_p8)   ;;  %v1803_v21 = vld [vmem:[%s2264_s5 + $0x28] sm:$0xff] (!%p397_p8)   ;;  %v1804_v22 = vld [vmem:[%s2264_s5 + $0x30] sm:$0xff] (!%p397_p8)  }
  0x1a   : > { %v1805_v23 = vld [vmem:[%s2264_s5 + $0x38] sm:$0xff] (!%p397_p8)   ;;  %v1806_v24 = vld [vmem:[%s2268_s9] sm:$0xff] (!%p397_p8)   ;;  %v1807_v25 = vld [vmem:[%s2268_s9 + $0x8] sm:$0xff] (!%p397_p8)  }
  0x1b   : > { %1635 = vmatpush3.bf16.msra.mxu0 (!%p397_p8), %v1791_v4  ;;  %1653 = vmatpush3.bf16.msra.mxu1 (!%p397_p8), %v1806_v24  ;;  %v1808_v26 = vld [vmem:[%s2268_s9 + $0x10] sm:$0xff] (!%p397_p8)   ;;  %v1809_v27 = vld [vmem:[%s2268_s9 + $0x18] sm:$0xff] (!%p397_p8)   ;;  %v1810_v28 = vld [vmem:[%s2268_s9 + $0x20] sm:$0xff] (!%p397_p8)  }
  0x1c   : > { %1636 = vmatprep.subr.bf16.mxu0 (!%p397_p8), %v1882_v3  ;;  %1654 = vmatprep.subr.bf16.mxu1 (!%p397_p8), %v1882_v3  ;;  %v1811_v29 = vld [vmem:[%s2268_s9 + $0x28] sm:$0xff] (!%p397_p8)   ;;  %v1812_v30 = vld [vmem:[%s2268_s9 + $0x30] sm:$0xff] (!%p397_p8)   ;;  %v1813_v31 = vld [vmem:[%s2268_s9 + $0x38] sm:$0xff] (!%p397_p8)  }
  0x1d   : > { %s447_s16 = scalar_select %p446_p9, %s1871_s30, 1  ;;  %v1548_v41 = vld [vmem:[%s2262_s3] ss:$0 sm:$0xff] }
  0x1e   : > { %v1549_v43 = vld [vmem:[%s2263_s4] ss:$0 sm:$0xff]  ;;  %s1885_s30 = smov 64  }
  0x1f   : > { %s1982_s17 = sshll.u32 %s447_s16, 2  ;;  %1637 = vmatpush3.bf16.msra.mxu0 %v1792_v5  ;;  %1655 = vmatpush3.bf16.msra.mxu1 %v1807_v25  ;;  %v1530_v47 = vld [vmem:[%s2267_s8] ss:$0 sm:$0xff] }
  0x20   : > { %s452_s20 = scalar_lea.vmem %s2260_s1, %s1982_s17  ;;  %1638 = vmatprep.subr.bf16.mxu0 %v1882_v3  ;;  %s456_s26 = scalar_lea.vmem %s2261_s2, %s1982_s17  ;;  %1656 = vmatprep.subr.bf16.mxu1 %v1882_v3  ;;  %v1539_v57 = vld [vmem:[%s2269_s10] ss:$0 sm:$0xff] }
  0x21   : > { %v697_v0 = vld [vmem:[%s452_s20] sm:$0xf]  ;;  %s463_s27 = scalar_lea.vmem %s2272_s13, %s1982_s17 }
  0x22   : > { %v1988_v1 = vunpack.c.l.bf16 %v697_v0  ;;  %v470_v15 = vld [vmem:[%s456_s26] sm:$0xf]  ;;  %s1884_s26 = smov 96  }
  0x23   : > { %1639 = vmatpush3.bf16.msra.mxu0 %v1793_v6  ;;  %1657 = vmatpush3.bf16.msra.mxu1 %v1808_v26  ;;  %v1550_v0 = vld [vmem:[%s2265_s6] ss:$0 sm:$0xff] }
  0x24   : > { %701 = vadd.xlane.f32.xlu0 %v1988_v1  ;;  %1640 = vmatprep.subr.bf16.mxu0 %v1882_v3 }
  0x25   : > { %1658 = vmatprep.subr.bf16.mxu1 %v1882_v3 }
  0x27   : > { %1641 = vmatpush3.bf16.msra.mxu0 %v1794_v7  ;;  %1659 = vmatpush3.bf16.msra.mxu1 %v1809_v27 }
  0x28   : > { %1642 = vmatprep.subr.bf16.mxu0 %v1882_v3  ;;  %1660 = vmatprep.subr.bf16.mxu1 %v1882_v3 }
  0x2b   : > { %1643 = vmatpush3.bf16.msra.mxu0 %v1795_v8  ;;  %1661 = vmatpush3.bf16.msra.mxu1 %v1810_v28 }
  0x2c   : > { %1644 = vmatprep.subr.bf16.mxu0 %v1882_v3  ;;  %1662 = vmatprep.subr.bf16.mxu1 %v1882_v3 }
  0x2f   : > { %1645 = vmatpush3.bf16.msra.mxu0 %v1796_v9  ;;  %1663 = vmatpush3.bf16.msra.mxu1 %v1811_v29 }
  0x30   : > { %1646 = vmatprep.subr.bf16.mxu0 %v1882_v3  ;;  %1664 = vmatprep.subr.bf16.mxu1 %v1882_v3 }
  0x33   : > { %1647 = vmatpush3.bf16.msra.mxu0 %v1797_v14  ;;  %1665 = vmatpush3.bf16.msra.mxu1 %v1812_v30 }
  0x34   : > { %1672 = vmatprep.subr.bf16.mxu0 %v1882_v3  ;;  %1666 = vmatprep.subr.bf16.mxu1 %v1882_v3 }
  0x36   : > { %1649 = vmatmul.mubr.bf16.vlgmr.msra.gmra.mrb[0].mxu0 %v470_v15 }
  0x37   : > { %1688 = vmatprep.mubr.msk.bf16.mxu0 %vm1883_vm0, %v1882_v3  ;;  %1673 = vmatpush3.bf16.msra.mxu0 %v1798_v16 }
  0x38   : > { %1674 = vmatprep.subr.bf16.mxu0 %v1882_v3  ;;  %1667 = vmatpush3.bf16.msra.mxu1 %v1813_v31 }
  0x39   : > { %1692 = vmatprep.subr.bf16.mxu1 %v1882_v3 }
  0x3b   : > { %1675 = vmatpush3.bf16.msra.mxu0 %v1799_v17  ;;  %1669 = vmatmul.mubr.bf16.vlgmr.msra.gmra.mrb[0].mxu1 %v470_v15 }
  0x3c   : > { %1676 = vmatprep.subr.bf16.mxu0 %v1882_v3  ;;  %1694 = vmatprep.mubr.msk.bf16.mxu1 %vm1883_vm0, %v1882_v3 }
  0x3f   : > { %1677 = vmatpush3.bf16.msra.mxu0 %v1800_v18 }
  0x40   : > { %1678 = vmatprep.subr.bf16.mxu0 %v1882_v3 }
  0x43   : > { %1679 = vmatpush3.bf16.msra.mxu0 %v1801_v19 }
  0x44   : > { %1680 = vmatprep.subr.bf16.mxu0 %v1882_v3 }
  0x47   : > { %1681 = vmatpush3.bf16.msra.mxu0 %v1802_v20 }
  0x48   : > { %1682 = vmatprep.subr.bf16.mxu0 %v1882_v3 }
  0x4b   : > { %1683 = vmatpush3.bf16.msra.mxu0 %v1803_v21 }
  0x4c   : > { %1684 = vmatprep.subr.bf16.mxu0 %v1882_v3 }
  0x4f   : > { %1685 = vmatpush3.bf16.msra.mxu0 %v1804_v22 }
  0x50   : > { %1686 = vmatprep.subr.bf16.mxu0 %v1882_v3 }
  0x53   : > { %1687 = vmatpush3.bf16.msra.mxu0 %v1805_v23 }
  0x54   : > { %1740 = vmatprep.subr.bf16.mxu0 %v1882_v3 }
  0xb1   : > { %v702_v10 = vpop.xlane.xlu0 %701 }
  0xb2   : > { %v704_v11 = vmul.f32 0.0078125, %v702_v10 }
  0xb4   : > { %v2022_v12 = vsub.f32 %v1988_v1, %v704_v11  ;;  %v847_v11 = vlaneseq }
  0xb6   : > { %v706_v13 = vmul.f32 %v2022_v12, %v2022_v12 }
  0xb8   : > { %707 = vadd.xlane.f32.xlu0 %v706_v13  ;;  %v849_v13 = vstv %s465_s18 }
 0x109   : > { %v576_v48 = vpop.f32.mrb[0].mxu0 }
 0x10a   : > { %v577_v49 = vadd.f32 %v1530_v47, %v576_v48  ;;  %v1650_v50 = vpop.f32.mrb[1].mxu0 }
 0x10b   : > { %v579_v51 = vpop.f32.mrb[2].mxu0 }
 0x10c   : > { %v582_v52 = vpack.c.bf16 %v577_v49, %v577_v49  ;;  %v1651_v53 = vpop.f32.mrb[3].mxu0 }
 0x10e   : > { %583 = vst [vmem:[#allocation2] sm:$0xf] %v582_v52  ;;  %v689_v58 = vpop.f32.mrb[0].mxu1 }
 0x10f   : > { %v690_v59 = vadd.f32 %v1539_v57, %v689_v58  ;;  %v1670_v60 = vpop.f32.mrb[1].mxu1 }
 0x110   : > { %v692_v61 = vpop.f32.mrb[2].mxu1 }
 0x111   : > { %v695_v62 = vpack.c.bf16 %v690_v59, %v690_v59  ;;  %v1671_v63 = vpop.f32.mrb[3].mxu1 }
 0x113   : > { %696 = vst [vmem:[#allocation3] sm:$0xf] %v695_v62 }
 0x115   : > { %v851_v54 = vld [vmem:[#allocation2] sm:$0xf] }
 0x116   : > { %v858_v55 = vsel %vm853_vm3, %v851_v54, 0  ;;  %v2119_v56 = vcombine.low %v851_v54, %v851_v54 }
 0x117   : > { %1693 = vmatpush3.bf16.xpose.msra.mxu1 %v858_v55 }
 0x118   : > { %968 = vrot.lane.b32.xlu0 %v2119_v56, %s1884_s26  ;;  %1698 = vmatprep.subr.bf16.mxu1 %v1882_v3 }
 0x11a   : > { %v852_v9 = vld [vmem:[#allocation3] sm:$0xf] }
 0x11b   : > { %v919_v10 = vsel %vm917_vm4, %v852_v9, 0  ;;  %v2166_v48 = vcombine.low %v852_v9, %v852_v9 }
 0x145   : > { %v708_v32 = vpop.xlane.xlu0 %707 }
 0x146   : > { %v709_v33 = vmul.f32 0.007874016, %v708_v32 }
 0x148   : > { %1823 = vrsqrt.f32 %v709_v33  ;;  %vm712_vm1 = vcmp.eq.f32.partialorder %v709_v33, inf  ;;  %v715_v36 = vand.u32 2147483648, %v709_v33  ;;  %vm714_vm2 = vcmp.eq.f32.partialorder %v709_v33, 0.0 }
 0x152   : > { %v1824_v34 = vpop.eup %1823 }
 0x153   : > { %v711_v35 = vmul.f32 %v1824_v34, %v709_v33 }
 0x155   : > { %v713_v37 = vsel %vm712_vm1, %v709_v33, %v711_v35 }
 0x156   : > { %v716_v38 = vsel %vm714_vm2, %v715_v36, %v713_v37 }
 0x157   : > { %v717_v39 = vadd.f32 1e-06, %v716_v38 }
 0x159   : > { %1825 = vrcp.f32 %v717_v39 }
 0x163   : > { %v1826_v40 = vpop.eup %1825 }
 0x164   : > { %v719_v42 = vmul.f32 %v1826_v40, %v2022_v12  ;;  %v848_v12 = vand.u32 127, %v847_v11 }
 0x166   : > { %v726_v44 = vmul.f32 %v1548_v41, %v719_v42  ;;  %vm2139_vm5 = vcmp.lt.s32.totalorder %v848_v12, %v849_v13 }
 0x168   : > { %v733_v45 = vadd.f32 %v1549_v43, %v726_v44 }
 0x16a   : > { %v734_v46 = vpack.c.bf16 %v733_v45, %v733_v45 }
 0x16c   : > { %1689 = vmatmul.mubr.bf16.vlgmr.msra.gmra.mrb[4].mxu0 %v734_v46 }
 0x16d   : > { %1756 = vmatprep.mubr.msk.bf16.mxu0 %vm1883_vm0, %v1882_v3 }
 0x18a   : > { %v969_v29 = vpop.permute.xlu0 %968 }
 0x18b   : > { %v974_v31 = vsel %vm853_vm3, %v969_v29, 0 }
 0x23f   : > { %v840_v2 = vpop.f32.mrb[4].mxu0 }
 0x240   : > { %v841_v4 = vadd.f32 %v1550_v0, %v840_v2  ;;  %v1690_v5 = vpop.f32.mrb[5].mxu0 }
 0x241   : > { %v843_v6 = vpop.f32.mrb[6].mxu0 }
 0x242   : > { %v2130_v7 = vpack.c.bf16 %v841_v4, %v841_v4  ;;  %v1691_v8 = vpop.f32.mrb[7].mxu0 }
 0x244   : > { %1695 = vmatmul.mubr.msk.bf16.vlgmr.msra.gmra.mrb[4].mxu1 %vm853_vm3, %v2130_v7 }
 0x245   : > { %1700 = vmatprep.mubr.msk.bf16.mxu1 %vm1883_vm0, %v1882_v3  ;;  %1699 = vmatpush3.bf16.msra.mxu1 %v919_v10 }
 0x246   : > { %1704 = vmatprep.subr.bf16.mxu1 %v1882_v3 }
 0x317   : > { %v894_v15 = vpop.f32.mrb[4].mxu1 }
 0x318   : > { %v900_v16 = vsel %vm2139_vm5, %v894_v15, -1e+09  ;;  %v1696_v17 = vpop.f32.mrb[5].mxu1 }
 0x319   : > { %v897_v18 = vpop.f32.mrb[6].mxu1  ;;  %v902_v19 = vsel %vm901_vm6, %v900_v16, -inf }
 0x31a   : > { %903 = vmax.xlane.f32.xlu1 %v902_v19  ;;  %v1697_v20 = vpop.f32.mrb[7].mxu1 }
 0x3a7   : > { %v904_v21 = vpop.xlane.xlu1 %903 }
 0x3a8   : > { %v905_v22 = vsub.f32 %v900_v16, %v904_v21 }
 0x3aa   : > { %v906_v23 = vmul.f32 1.442695, %v905_v22 }
 0x3ac   : > { %1827 = vpow2.f32 %v906_v23 }
 0x3b6   : > { %v1828_v24 = vpop.eup %1827 }
 0x3b7   : > { %v908_v25 = vsel %vm901_vm6, %v1828_v24, 0.0 }
 0x3b8   : > { %909 = vadd.xlane.f32.xlu1 %v908_v25 }
 0x3c9   : > { %963 = vrot.lane.b32.xlu1 %v2130_v7, %s1884_s26 }
 0x445   : > { %v910_v26 = vpop.xlane.xlu1 %909 }
 0x446   : > { %1829 = vrcp.f32 %v910_v26 }
 0x449   : > { %v964_v32 = vpop.permute.xlu1 %963 }
 0x450   : > { %v1830_v27 = vpop.eup %1829 }
 0x451   : > { %v912_v28 = vmul.f32 %v1830_v27, %v1828_v24 }
 0x453   : > { %v913_v30 = vpack.c.bf16 %v912_v28, %v912_v28 }
 0x455   : > { %1701 = vmatmul.mubr.msk.bf16.vlgmr.msra.gmra.mrb[8].mxu1 %vm901_vm6, %v913_v30 }
 0x456   : > { %1705 = vmatpush3.bf16.xpose.msra.mxu1 %v974_v31  ;;  %1706 = vmatprep.mubr.msk.bf16.mxu1 %vm1883_vm0, %v1882_v3 }
 0x457   : > { %1710 = vmatprep.subr.bf16.mxu1 %v1882_v3 }
 0x45d   : > { %1707 = vmatmul.mubr.msk.bf16.vlgmr.msra.gmra.mrb[12].mxu1 %vm853_vm3, %v964_v32 }
 0x45e   : > { %1712 = vmatprep.mubr.msk.bf16.mxu1 %vm1883_vm0, %v1882_v3 }
 0x528   : > { %v955_v33 = vpop.f32.mrb[8].mxu1 }
 0x529   : > { %961 = vst.msk [vmem:[#allocation4] sm:$0xff] %vm853_vm3, %v955_v33  ;;  %v1702_v34 = vpop.f32.mrb[9].mxu1 }
 0x52a   : > { %v958_v35 = vpop.f32.mrb[10].mxu1 }
 0x52b   : > { %v1703_v36 = vpop.f32.mrb[11].mxu1 }
 0x530   : > { %v1010_v37 = vpop.f32.mrb[12].mxu1 }
 0x531   : > { %v1016_v38 = vsel %vm2139_vm5, %v1010_v37, -1e+09  ;;  %v1708_v39 = vpop.f32.mrb[13].mxu1 }
 0x532   : > { %v1013_v40 = vpop.f32.mrb[14].mxu1  ;;  %v1017_v41 = vsel %vm901_vm6, %v1016_v38, -inf }
 0x533   : > { %1018 = vmax.xlane.f32.xlu1 %v1017_v41  ;;  %v1709_v42 = vpop.f32.mrb[15].mxu1 }
 0x544   : > { %1088 = vrot.lane.b32.xlu1 %v2119_v56, %s1885_s30 }
 0x548   : > { %1086 = vrot.lane.b32.xlu1 %v2130_v7, %s1885_s30 }
 0x5c0   : > { %v1019_v43 = vpop.xlane.xlu1 %1018 }
 0x5c1   : > { %v1020_v44 = vsub.f32 %v1016_v38, %v1019_v43  ;;  %v1815_v43 = vld [vmem:[%s2270_s11] sm:$0xff]  }
 0x5c2   : > { %1741 = vmatpush3.bf16.msra.mxu0 %v1815_v43 }
 0x5c3   : > { %v1021_v45 = vmul.f32 1.442695, %v1020_v44  ;;  %v1816_v44 = vld [vmem:[%s2270_s11 + $0x8] sm:$0xff]   ;;  %1742 = vmatprep.subr.bf16.mxu0 %v1882_v3 }
 0x5c4   : > { %v1089_v54 = vpop.permute.xlu1 %1088 }
 0x5c5   : > { %1831 = vpow2.f32 %v1021_v45  ;;  %v1094_v57 = vsel %vm853_vm3, %v1089_v54, 0  ;;  %v1817_v45 = vld [vmem:[%s2270_s11 + $0x10] sm:$0xff]  }
 0x5c6   : > { %1743 = vmatpush3.bf16.msra.mxu0 %v1816_v44 }
 0x5c7   : > { %1744 = vmatprep.subr.bf16.mxu0 %v1882_v3 }
 0x5c8   : > { %v1087_v58 = vpop.permute.xlu1 %1086 }
 0x5ca   : > { %1745 = vmatpush3.bf16.msra.mxu0 %v1817_v45 }
 0x5cb   : > { %1746 = vmatprep.subr.bf16.mxu0 %v1882_v3 }
 0x5cf   : > { %v1832_v46 = vpop.eup %1831 }
 0x5d0   : > { %v1023_v47 = vsel %vm901_vm6, %v1832_v46, 0.0 }
 0x5d1   : > { %1024 = vadd.xlane.f32.xlu0 %v1023_v47  ;;  %v1819_v47 = vld [vmem:[%s2270_s11 + $0x20] sm:$0xff]  }
 0x5e7   : > { %1032 = vrot.lane.b32.xlu0 %v2166_v48, %s1884_s26 }
 0x65e   : > { %v1025_v49 = vpop.xlane.xlu0 %1024 }
 0x65f   : > { %1833 = vrcp.f32 %v1025_v49  ;;  %v1821_v49 = vld [vmem:[%s2270_s11 + $0x30] sm:$0xff]  }
 0x662   : > { %v1033_v50 = vpop.permute.xlu0 %1032 }
 0x663   : > { %v1038_v51 = vsel %vm917_vm4, %v1033_v50, 0  ;;  %v1822_v50 = vld [vmem:[%s2270_s11 + $0x38] sm:$0xff]  }
 0x664   : > { %1711 = vmatpush3.bf16.msra.mxu1 %v1038_v51 }
 0x665   : > { %1716 = vmatprep.subr.bf16.mxu1 %v1882_v3 }
 0x669   : > { %v1834_v52 = vpop.eup %1833 }
 0x66a   : > { %v1027_v53 = vmul.f32 %v1834_v52, %v1832_v46  ;;  %v1818_v46 = vld [vmem:[%s2270_s11 + $0x18] sm:$0xff]  }
 0x66b   : > { %1747 = vmatpush3.bf16.msra.mxu0 %v1818_v46 }
 0x66c   : > { %v1028_v55 = vpack.c.bf16 %v1027_v53, %v1027_v53  ;;  %1748 = vmatprep.subr.bf16.mxu0 %v1882_v3 }
 0x66e   : > { %1713 = vmatmul.mubr.msk.bf16.vlgmr.msra.gmra.mrb[16].mxu1 %vm901_vm6, %v1028_v55 }
 0x66f   : > { %1717 = vmatpush3.bf16.xpose.msra.mxu1 %v1094_v57  ;;  %1718 = vmatprep.mubr.msk.bf16.mxu1 %vm1883_vm0, %v1882_v3 }
 0x670   : > { %1722 = vmatprep.subr.bf16.mxu1 %v1882_v3  ;;  %1749 = vmatpush3.bf16.msra.mxu0 %v1819_v47 }
 0x671   : > { %1750 = vmatprep.subr.bf16.mxu0 %v1882_v3 }
 0x676   : > { %1719 = vmatmul.mubr.msk.bf16.vlgmr.msra.gmra.mrb[20].mxu1 %vm853_vm3, %v1087_v58 }
 0x677   : > { %1724 = vmatprep.mubr.msk.bf16.mxu1 %vm1883_vm0, %v1882_v3 }
 0x741   : > { %v1074_v59 = vpop.f32.mrb[16].mxu1 }
 0x742   : > { %v1714_v60 = vpop.f32.mrb[17].mxu1 }
 0x743   : > { %v1077_v61 = vpop.f32.mrb[18].mxu1 }
 0x744   : > { %v1715_v62 = vpop.f32.mrb[19].mxu1 }
 0x749   : > { %v1130_v63 = vpop.f32.mrb[20].mxu1 }
 0x74a   : > { %v1136_v0 = vsel %vm2139_vm5, %v1130_v63, -1e+09  ;;  %v1720_v2 = vpop.f32.mrb[21].mxu1 }
 0x74b   : > { %v1133_v4 = vpop.f32.mrb[22].mxu1  ;;  %v1137_v5 = vsel %vm901_vm6, %v1136_v0, -inf }
 0x74c   : > { %1138 = vmax.xlane.f32.xlu1 %v1137_v5  ;;  %v1721_v6 = vpop.f32.mrb[23].mxu1 }
 0x75d   : > { %1205 = vrot.lane.b32.xlu1 %v2119_v56, %s1886_s19 }
 0x761   : > { %1203 = vrot.lane.b32.xlu1 %v2130_v7, %s1886_s19 }
 0x7d9   : > { %v1139_v8 = vpop.xlane.xlu1 %1138 }
 0x7da   : > { %v1140_v9 = vsub.f32 %v1136_v0, %v1139_v8 }
 0x7dc   : > { %v1141_v10 = vmul.f32 1.442695, %v1140_v9 }
 0x7dd   : > { %v1206_v17 = vpop.permute.xlu1 %1205 }
 0x7de   : > { %1835 = vpow2.f32 %v1141_v10  ;;  %v1211_v19 = vsel %vm853_vm3, %v1206_v17, 0 }
 0x7e1   : > { %v1204_v20 = vpop.permute.xlu1 %1203 }
 0x7e8   : > { %v1836_v11 = vpop.eup %1835 }
 0x7e9   : > { %v1143_v12 = vsel %vm901_vm6, %v1836_v11, 0.0 }
 0x7ea   : > { %1144 = vadd.xlane.f32.xlu0 %v1143_v12 }
 0x800   : > { %1149 = vrot.lane.b32.xlu0 %v2166_v48, %s1885_s30 }
 0x877   : > { %v1145_v13 = vpop.xlane.xlu0 %1144 }
 0x878   : > { %1837 = vrcp.f32 %v1145_v13 }
 0x87b   : > { %v1150_v15 = vpop.permute.xlu0 %1149 }
 0x87c   : > { %v1155_v16 = vsel %vm917_vm4, %v1150_v15, 0 }
 0x87d   : > { %1723 = vmatpush3.bf16.msra.mxu1 %v1155_v16 }
 0x87e   : > { %1728 = vmatprep.subr.bf16.mxu1 %v1882_v3 }
 0x882   : > { %v1838_v56 = vpop.eup %1837 }
 0x883   : > { %v1147_v7 = vmul.f32 %v1838_v56, %v1836_v11 }
 0x885   : > { %v1148_v18 = vpack.c.bf16 %v1147_v7, %v1147_v7 }
 0x887   : > { %1725 = vmatmul.mubr.msk.bf16.vlgmr.msra.gmra.mrb[24].mxu1 %vm901_vm6, %v1148_v18 }
 0x888   : > { %1729 = vmatpush3.bf16.xpose.msra.mxu1 %v1211_v19  ;;  %1730 = vmatprep.mubr.msk.bf16.mxu1 %vm1883_vm0, %v1882_v3 }
 0x889   : > { %1734 = vmatprep.subr.bf16.mxu1 %v1882_v3 }
 0x88f   : > { %1731 = vmatmul.mubr.msk.bf16.vlgmr.msra.gmra.mrb[28].mxu1 %vm853_vm3, %v1204_v20 }
 0x890   : > { %1736 = vmatprep.mubr.msk.bf16.mxu1 %vm1883_vm0, %v1882_v3 }
 0x95a   : > { %v1191_v21 = vpop.f32.mrb[24].mxu1 }
 0x95b   : > { %v1726_v22 = vpop.f32.mrb[25].mxu1 }
 0x95c   : > { %v1194_v23 = vpop.f32.mrb[26].mxu1 }
 0x95d   : > { %v1727_v24 = vpop.f32.mrb[27].mxu1 }
 0x962   : > { %v1247_v25 = vpop.f32.mrb[28].mxu1 }
 0x963   : > { %v1253_v26 = vsel %vm2139_vm5, %v1247_v25, -1e+09  ;;  %v1732_v27 = vpop.f32.mrb[29].mxu1 }
 0x964   : > { %v1250_v28 = vpop.f32.mrb[30].mxu1  ;;  %v1254_v29 = vsel %vm901_vm6, %v1253_v26, -inf }
 0x965   : > { %1255 = vmax.xlane.f32.xlu0 %v1254_v29  ;;  %v1733_v30 = vpop.f32.mrb[31].mxu1 }
 0x97b   : > { %1266 = vrot.lane.b32.xlu0 %v2166_v48, %s1886_s19  ;;  %v1820_v48 = vld [vmem:[%s2270_s11 + $0x28] sm:$0xff]  }
 0x97c   : > { %1751 = vmatpush3.bf16.msra.mxu0 %v1820_v48 }
 0x97d   : > { %1752 = vmatprep.subr.bf16.mxu0 %v1882_v3 }
 0x97f   : > { %1198 = vrot.lane.b32.xlu0 %v1191_v21, %s1885_s30 }
 0x980   : > { %1753 = vmatpush3.bf16.msra.mxu0 %v1821_v49 }
 0x981   : > { %1754 = vmatprep.subr.bf16.mxu0 %v1882_v3 }
 0x984   : > { %1755 = vmatpush3.bf16.msra.mxu0 %v1822_v50 }
 0x9f2   : > { %v1256_v31 = vpop.xlane.xlu0 %1255 }
 0x9f3   : > { %v1257_v32 = vsub.f32 %v1253_v26, %v1256_v31 }
 0x9f5   : > { %v1258_v33 = vmul.f32 1.442695, %v1257_v32 }
 0x9f6   : > { %v1267_v34 = vpop.permute.xlu0 %1266 }
 0x9f7   : > { %1839 = vpow2.f32 %v1258_v33  ;;  %v1272_v35 = vsel %vm917_vm4, %v1267_v34, 0 }
 0x9f8   : > { %1735 = vmatpush3.bf16.msra.mxu1 %v1272_v35 }
 0x9fa   : > { %v1199_v39 = vpop.permute.xlu0 %1198 }
 0xa01   : > { %v1840_v14 = vpop.eup %1839 }
 0xa02   : > { %v1260_v36 = vsel %vm901_vm6, %v1840_v14, 0.0 }
 0xa03   : > { %1261 = vadd.xlane.f32.xlu1 %v1260_v36 }
 0xa14   : > { %1081 = vrot.lane.b32.xlu1 %v1074_v59, %s1886_s19  ;;  %v1569_v59 = vld [vmem:[%s2271_s12] ss:$0 sm:$0xff] }
 0xa90   : > { %v1262_v37 = vpop.xlane.xlu1 %1261 }
 0xa91   : > { %1841 = vrcp.f32 %v1262_v37 }
 0xa94   : > { %v1082_v38 = vpop.permute.xlu1 %1081 }
 0xa95   : > { %1085 = vst.msk [vmem:[#allocation4] sm:$0xff] %vm1084_vm7, %v1082_v38 }
 0xa96   : > { %1202 = vst.msk [vmem:[#allocation4] sm:$0xff] %vm1201_vm8, %v1199_v39 }
 0xa9b   : > { %v1842_v40 = vpop.eup %1841 }
 0xa9c   : > { %v1264_v41 = vmul.f32 %v1842_v40, %v1840_v14 }
 0xa9e   : > { %v1265_v42 = vpack.c.bf16 %v1264_v41, %v1264_v41 }
 0xaa0   : > { %1737 = vmatmul.mubr.msk.bf16.vlgmr.msra.gmra.mrb[32].mxu1 %vm901_vm6, %v1265_v42 }
 0xb73   : > { %v1308_v51 = vpop.f32.mrb[32].mxu1 }
 0xb74   : > { %1315 = vrot.lane.b32.xlu1 %v1308_v51, %s1884_s26  ;;  %v1738_v52 = vpop.f32.mrb[33].mxu1 }
 0xb75   : > { %v1311_v53 = vpop.f32.mrb[34].mxu1 }
 0xb76   : > { %v1739_v54 = vpop.f32.mrb[35].mxu1 }
 0xbe6   : > { %v1316_v55 = vpop.permute.xlu1 %1315 }
 0xbe7   : > { %1319 = vst.msk [vmem:[#allocation4] sm:$0xff] %vm1318_vm9, %v1316_v55 }
 0xbee   : > { %v1320_v57 = vld [vmem:[#allocation4] sm:$0xff] }
 0xbef   : > { %v1321_v58 = vpack.c.bf16 %v1320_v57, %v1320_v57 }
 0xbf1   : > { %1757 = vmatmul.mubr.bf16.vlgmr.msra.gmra.mrb[8].mxu0 %v1321_v58 }
 0xcc4   : > { %v1427_v60 = vpop.f32.mrb[8].mxu0 }
 0xcc5   : > { %v1428_v3 = vadd.f32 %v1569_v59, %v1427_v60  ;;  %v1758_v61 = vpop.f32.mrb[9].mxu0 }
 0xcc6   : > { %v1430_v62 = vpop.f32.mrb[10].mxu0 }
 0xcc7   : > { %v1433_v63 = vadd.f32 %v1428_v3, %v1988_v1  ;;  %v1759_v0 = vpop.f32.mrb[11].mxu0 }
 0xcc9   : > { %v1434_v2 = vpack.c.bf16 %v1433_v63, %v1433_v63 }
 0xccb   : > { %1435 = vst [vmem:[%s463_s27] sm:$0xf] %v1434_v2 }
 0xccc PF: > { %s29_s15 = sadd.s32 1, %s1879_s15   ;;  %s2275_s30 = smov %s1875_s14 }
 0xccd   : > { %p26_p10 = scmp.ge.s32.totalorder %s29_s15, 4   ;;  %s2276_s14 = smov %s2278_s0 }
 0xccf   :  { %28 = sbr.rel (!%p26_p10) target bundleno = 17 (0x11), region = 105 }

</bundles_post_ra>
